<compile_context>
chip_gen: v7x
topology: tpu7x:2x2x1
jax: 0.10.0
libtpu: 0.0.40
codegen_flags: <defaults>
</compile_context>

<pallas_src>
import math
import functools

import jax
import jax.numpy as jnp
from jax.experimental import pallas as pl
from jax.experimental.pallas import tpu as pltpu


# ------------------------------ kernel helpers ------------------------------ #

def _gelu(x):
    # tanh-approx GELU (EUP tanh); HF BERT uses erf-GELU -> small documented deviation.
    return 0.5 * x * (1.0 + jnp.tanh(0.7978845608028654 * (x + 0.044715 * x * x * x)))


def _layer_norm(h, g, b, eps=1e-12):
    mu = jnp.mean(h, axis=-1, keepdims=True)
    var = jnp.mean((h - mu) ** 2, axis=-1, keepdims=True)
    return (h - mu) * jax.lax.rsqrt(var + eps) * g + b


def _device_kind():
    try:
        return jax.devices()[0].device_kind.lower()
    except Exception:
        return ""


def _pick_batch_blocks(B):
    # v7x has 2 TensorCores per chip: shard the parallel batch axis when the resulting
    # per-block sublane count stays a multiple of 8 (keeps all blocks (8,128)-legal).
    # v5e/v6e have a single TC: keep nb=1 (splitting only multiplies weight re-streaming).
    if "v7" in _device_kind():
        for nb in (2, 4):
            if B % nb == 0 and (B // nb) % 8 == 0:
                return nb
    return 1


def _vmem_limit_bytes():
    # v7x: 64 MiB physical VMEM -> stay well below; v5e/v6e: 128 MiB physical, but the
    # default scoped limit (16/32 MiB) would reject/spill large batch blocks -> raise it.
    if "v7" in _device_kind():
        return 56 * 1024 * 1024
    return 100 * 1024 * 1024


# ------------------------- fused encoder Pallas kernel ---------------------- #

def _encoder_kernel(emb_ref, neg_ref, eg_ref, eb_ref,
                    wqkv_ref, bqkv_ref, wo_ref, bo_ref,
                    g1_ref, be1_ref, w1_ref, b1_ref,
                    w2_ref, b2_ref, g2_ref, be2_ref,
                    o_ref, x_scr,
                    *, BB, S, H, num_heads, head_dim, ff_tile):
    l = pl.program_id(1)

    # Layer 0: fused embedding LayerNorm initializes the resident activation (bf16 emb -> f32).
    @pl.when(l == 0)
    def _():
        x_scr[...] = _layer_norm(emb_ref[...].astype(jnp.float32), eg_ref[...], eb_ref[...])

    x = x_scr[...]                                       # (BB*S, H) f32, resident across layers
    xb = x.astype(jnp.bfloat16)                          # cast once per layer, reused below

    # ---- fused QKV projection: one (BB*S, H) x (H, 3H) bf16 matmul, f32 accumulation ----
    qkv = jnp.dot(xb, wqkv_ref[0], preferred_element_type=jnp.float32) + bqkv_ref[0]

    negb = neg_ref[...].reshape(BB, 1, S)                # (BB, 1, S) additive key mask
    scale = 1.0 / math.sqrt(head_dim)

    # ---- multi-head self-attention: batched (over batch rows) einsums per head ----
    ctx_heads = []
    for h in range(num_heads):                           # small static head loop
        c = h * head_dim
        # TODO(synk): the D-offset lane slices still cost a relayout per head at D<128;
        #             a head-major QKV emit would remove them.
        qh = (qkv[:, c:c + head_dim] * scale).reshape(BB, S, head_dim).astype(jnp.bfloat16)
        kh = qkv[:, H + c:H + c + head_dim].reshape(BB, S, head_dim).astype(jnp.bfloat16)
        vh = qkv[:, 2 * H + c:2 * H + c + head_dim].reshape(BB, S, head_dim).astype(jnp.bfloat16)

        s = jnp.einsum('bqd,bkd->bqk', qh, kh,
                       preferred_element_type=jnp.float32) + negb        # (BB, S, S) f32
        s = s - jnp.max(s, axis=-1, keepdims=True)
        p = jnp.exp(s)
        p = p * pl.reciprocal(jnp.sum(p, axis=-1, keepdims=True), approx=True)
        ctx = jnp.einsum('bqk,bkd->bqd', p.astype(jnp.bfloat16), vh,
                         preferred_element_type=jnp.float32)             # (BB, S, D) f32
        ctx_heads.append(ctx.reshape(BB * S, head_dim))

    # One-time lane concat of heads, then a single full-depth (K=H) output projection.
    ctx_all = jnp.concatenate(ctx_heads, axis=-1).astype(jnp.bfloat16)   # (BB*S, H)
    attn = jnp.dot(ctx_all, wo_ref[0], preferred_element_type=jnp.float32)

    h1 = _layer_norm(x + attn + bo_ref[0], g1_ref[0], be1_ref[0])

    # ---- feed-forward, K-tiled over F so the (BB*S, F) intermediate is never fully live ----
    h1b = h1.astype(jnp.bfloat16)
    F = w1_ref.shape[-1]
    acc = h1 + b2_ref[0]                                 # residual + FFN output bias folded in
    for t in range(F // ff_tile):
        c0 = t * ff_tile
        f = jnp.dot(h1b, w1_ref[0, :, c0:c0 + ff_tile],
                    preferred_element_type=jnp.float32) + b1_ref[0, :, c0:c0 + ff_tile]
        f = _gelu(f)
        acc = acc + jnp.dot(f.astype(jnp.bfloat16), w2_ref[0, c0:c0 + ff_tile, :],
                            preferred_element_type=jnp.float32)
    h2 = _layer_norm(acc, g2_ref[0], be2_ref[0])

    x_scr[...] = h2                                      # carry activation to next layer

    # Last layer: emit only the CLS rows (last_hidden_state[:, 0, :]) via ONE strided read.
    @pl.when(l == pl.num_programs(1) - 1)
    def _():
        o_ref[...] = x_scr[pl.ds(0, BB, stride=S), :]


def encoder_forward(emb2, negmask, p, *, B, S, num_heads, head_dim, batch_blocks=None):
    H = p["emb_ln_g"].shape[-1]
    L = p["wqkv"].shape[0]
    F = p["w1"].shape[-1]

    nb = batch_blocks if batch_blocks is not None else _pick_batch_blocks(B)
    assert B % nb == 0
    BB = B // nb

    ff_tile = F if F <= 1024 else 1024
    if F % ff_tile:
        ff_tile = F

    kern = functools.partial(_encoder_kernel, BB=BB, S=S, H=H,
                             num_heads=num_heads, head_dim=head_dim, ff_tile=ff_tile)

    def lspec(arr):
        nd = arr.ndim             # per-layer weight block: leading L axis indexed by l
        return pl.BlockSpec((1,) + tuple(arr.shape[1:]),
                            lambda i, l, _nd=nd: (l,) + (0,) * (_nd - 1))

    layer_ws = [p["wqkv"], p["bqkv"], p["wo"], p["bo"],
                p["ln1_g"], p["ln1_b"], p["w1"], p["b1"],
                p["w2"], p["b2"], p["ln2_g"], p["ln2_b"]]

    in_specs = ([pl.BlockSpec((BB * S, H), lambda i, l: (i, 0)),     # bf16 embedding slab
                 pl.BlockSpec((BB, S), lambda i, l: (i, 0)),         # additive key mask
                 pl.BlockSpec((1, H), lambda i, l: (0, 0)),
                 pl.BlockSpec((1, H), lambda i, l: (0, 0))]
                + [lspec(w) for w in layer_ws])

    return pl.pallas_call(
        kern,
        out_shape=jax.ShapeDtypeStruct((B, H), jnp.float32),
        grid=(nb, L),
        in_specs=in_specs,
        out_specs=pl.BlockSpec((BB, H), lambda i, l: (i, 0)),
        scratch_shapes=[pltpu.VMEM((BB * S, H), jnp.float32)],
        compiler_params=pltpu.CompilerParams(
            dimension_semantics=("parallel", "arbitrary"),
            vmem_limit_bytes=_vmem_limit_bytes()),
    )(emb2, negmask, p["emb_ln_g"], p["emb_ln_b"], *layer_ws)


# --------------------------- cosine-similarity kernel ----------------------- #

def _cosine_kernel(a_ref, b_ref, o_ref):
    a = a_ref[...]                                       # (N, H): reduce along lanes
    b = b_ref[...]
    dot = jnp.sum(a * b, axis=-1, keepdims=True)         # (N, 1)
    na = jnp.sqrt(jnp.sum(a * a, axis=-1, keepdims=True))
    nb = jnp.sqrt(jnp.sum(b * b, axis=-1, keepdims=True))
    eps = 1e-8
    o_ref[...] = dot / (jnp.maximum(na, eps) * jnp.maximum(nb, eps))


def cosine_similarity(a, b):
    a = a.astype(jnp.float32)
    b = b.astype(jnp.float32)
    a, b = jnp.broadcast_arrays(a, b)
    N, H = a.shape
    out = pl.pallas_call(
        _cosine_kernel,
        out_shape=jax.ShapeDtypeStruct((N, 1), jnp.float32),
        in_specs=[pl.BlockSpec((N, H), lambda: (0, 0)),
                  pl.BlockSpec((N, H), lambda: (0, 0))],
        out_specs=pl.BlockSpec((N, 1), lambda: (0, 0)),
    )(a, b)
    return out[:, 0]                                     # (N,), matches torch.cosine_similarity


# --------------------------- synthetic BERT model --------------------------- #

def init_bert_params(key, *, vocab, max_pos, H, F, L, num_heads):
    k = jax.random.split(key, 6)
    nrm = lambda kk, shape: jax.random.normal(kk, shape, jnp.float32) * 0.02
    return {
        "word_emb": nrm(k[0], (vocab, H)),
        "pos_emb": nrm(k[1], (max_pos, H)),
        "emb_ln_g": jnp.ones((1, H), jnp.float32),
        "emb_ln_b": jnp.zeros((1, H), jnp.float32),
        # fused QKV projection (bf16 weights streamed per layer)
        "wqkv": nrm(k[2], (L, H, 3 * H)).astype(jnp.bfloat16),
        "bqkv": jnp.zeros((L, 1, 3 * H), jnp.float32),
        # full (H, H) output projection (single K=H matmul in the kernel)
        "wo": nrm(k[3], (L, H, H)).astype(jnp.bfloat16),
        "bo": jnp.zeros((L, 1, H), jnp.float32),
        "ln1_g": jnp.ones((L, 1, H), jnp.float32),
        "ln1_b": jnp.zeros((L, 1, H), jnp.float32),
        "w1": nrm(k[4], (L, H, F)).astype(jnp.bfloat16),
        "b1": jnp.zeros((L, 1, F), jnp.float32),
        "w2": nrm(k[5], (L, F, H)).astype(jnp.bfloat16),
        "b2": jnp.zeros((L, 1, H), jnp.float32),
        "ln2_g": jnp.ones((L, 1, H), jnp.float32),
        "ln2_b": jnp.zeros((L, 1, H), jnp.float32),
    }


def encode(params, input_ids, attention_mask, *, num_heads, head_dim):
    B, S = input_ids.shape
    H = params["word_emb"].shape[1]
    # glue: embedding-table gather + position embeddings stay in plain JAX
    emb = params["word_emb"][input_ids] + params["pos_emb"][None, :S, :]
    emb2 = emb.reshape(B * S, H).astype(jnp.bfloat16)            # stream embeddings as bf16
    negmask = (1.0 - attention_mask.astype(jnp.float32)) * -1e9  # (B, S) additive mask
    return encoder_forward(emb2, negmask, params, B=B, S=S,
                           num_heads=num_heads, head_dim=head_dim)   # (B, H) CLS embeddings


class DualRetriver:
    def __init__(self, q_params, a_params, *, num_heads, head_dim):
        self.q_params = q_params
        self.a_params = a_params
        self.num_heads = num_heads
        self.head_dim = head_dim

    def forward(self, inputs, **kwargs):
        input_ids = inputs["input_ids"]
        attention_mask = inputs["attention_mask"]
        input_ids = input_ids.reshape(-1, input_ids.shape[-1])
        attention_mask = attention_mask.reshape(-1, attention_mask.shape[-1])
        if "question" in kwargs and kwargs["question"]:
            params = self.q_params
        else:
            params = self.a_params
        return encode(params, input_ids, attention_mask,
                      num_heads=self.num_heads, head_dim=self.head_dim)

    def compare(self, doc, question):
        if doc.ndim == 1:
            doc = doc[None, :]
        if question.ndim == 1:
            question = question[None, :]
        return cosine_similarity(doc, question)


# ---------------------------------- main ------------------------------------ #

if __name__ == "__main__":
    VOCAB, MAX_POS = 100, 32
    S, H, NH, DH, F, L = 8, 32, 4, 8, 64, 2

    key = jax.random.PRNGKey(0)
    kq, ka, kids = jax.random.split(key, 3)
    q_params = init_bert_params(kq, vocab=VOCAB, max_pos=MAX_POS, H=H, F=F, L=L, num_heads=NH)
    a_params = init_bert_params(ka, vocab=VOCAB, max_pos=MAX_POS, H=H, F=F, L=L, num_heads=NH)

    # input dict like the HF tokenizer output: (batch=2, num_passages=2, seq=8)
    input_ids = jax.random.randint(kids, (2, 2, S), 0, VOCAB, dtype=jnp.int32)
    attention_mask = jnp.ones((2, 2, S), jnp.int32).at[:, :, -2:].set(0)   # last 2 tokens padded
    inputs = {"input_ids": input_ids, "attention_mask": attention_mask}

    retriever = DualRetriver(q_params, a_params, num_heads=NH, head_dim=DH)

    q_emb = retriever.forward(inputs, question=True)     # (4, 32) CLS embeddings from q_model
    a_emb = retriever.forward(inputs, question=False)    # (4, 32) CLS embeddings from a_model
    sims = retriever.compare(a_emb, q_emb)               # (4,) cosine similarities

    jax.block_until_ready((q_emb, a_emb, sims))
    assert q_emb.shape == (4, H) and a_emb.shape == (4, H) and sims.shape == (4,)
    print("KERNEL_OK")
</pallas_src>

<mosaic_0001>
module attributes {stable_mosaic.version = 11 : i64} {
  func.func @_encoder_kernel(%arg0: i32, %arg1: i32, %arg2: memref<32x32xbf16, #tpu.memory_space<vmem>>, %arg3: memref<4x8xf32, #tpu.memory_space<vmem>>, %arg4: memref<1x32xf32, #tpu.memory_space<vmem>>, %arg5: memref<1x32xf32, #tpu.memory_space<vmem>>, %arg6: memref<1x32x96xbf16, #tpu.memory_space<vmem>>, %arg7: memref<1x1x96xf32, #tpu.memory_space<vmem>>, %arg8: memref<1x32x32xbf16, #tpu.memory_space<vmem>>, %arg9: memref<1x1x32xf32, #tpu.memory_space<vmem>>, %arg10: memref<1x1x32xf32, #tpu.memory_space<vmem>>, %arg11: memref<1x1x32xf32, #tpu.memory_space<vmem>>, %arg12: memref<1x32x64xbf16, #tpu.memory_space<vmem>>, %arg13: memref<1x1x64xf32, #tpu.memory_space<vmem>>, %arg14: memref<1x64x32xbf16, #tpu.memory_space<vmem>>, %arg15: memref<1x1x32xf32, #tpu.memory_space<vmem>>, %arg16: memref<1x1x32xf32, #tpu.memory_space<vmem>>, %arg17: memref<1x1x32xf32, #tpu.memory_space<vmem>>, %arg18: memref<4x32xf32, #tpu.memory_space<vmem>>, %arg19: memref<32x32xf32, #tpu.memory_space<vmem>>) attributes {dimension_semantics = [#tpu.dimension_semantics<parallel>, #tpu.dimension_semantics<arbitrary>], iteration_bounds = array<i64: 1, 2>, scalar_prefetch = 0 : i64, scratch_operands = 1 : i64, tpu.core_type = #tpu.core_type<tc>, window_params = [{transform_indices = @transform_0, window_bounds = array<i64: 32, 32>}, {transform_indices = @transform_1, window_bounds = array<i64: 4, 8>}, {pipeline_mode = #tpu.pipeline_mode<synchronous>, transform_indices = @transform_2, window_bounds = array<i64: 1, 32>}, {pipeline_mode = #tpu.pipeline_mode<synchronous>, transform_indices = @transform_3, window_bounds = array<i64: 1, 32>}, {transform_indices = @transform_4, window_bounds = array<i64: 1, 32, 96>}, {transform_indices = @transform_5, window_bounds = array<i64: 1, 1, 96>}, {transform_indices = @transform_6, window_bounds = array<i64: 1, 32, 32>}, {transform_indices = @transform_7, window_bounds = array<i64: 1, 1, 32>}, {transform_indices = @transform_8, window_bounds = array<i64: 1, 1, 32>}, {transform_indices = @transform_9, window_bounds = array<i64: 1, 1, 32>}, {transform_indices = @transform_10, window_bounds = array<i64: 1, 32, 64>}, {transform_indices = @transform_11, window_bounds = array<i64: 1, 1, 64>}, {transform_indices = @transform_12, window_bounds = array<i64: 1, 64, 32>}, {transform_indices = @transform_13, window_bounds = array<i64: 1, 1, 32>}, {transform_indices = @transform_14, window_bounds = array<i64: 1, 1, 32>}, {transform_indices = @transform_15, window_bounds = array<i64: 1, 1, 32>}, {transform_indices = @transform_16, window_bounds = array<i64: 4, 32>}]} {
    %c0_i32 = arith.constant 0 : i32
    %0 = arith.cmpi eq, %arg1, %c0_i32 : i32
    %1 = arith.extui %0 : i1 to i32
    %c0_i32_0 = arith.constant 0 : i32
    %2 = arith.cmpi ne, %1, %c0_i32_0 : i32
    scf.if %2 {
      %c0_80 = arith.constant 0 : index
      %c0_81 = arith.constant 0 : index
      %218 = vector.load %arg2[%c0_80, %c0_81] : memref<32x32xbf16, #tpu.memory_space<vmem>>, vector<32x32xbf16>
      %219 = arith.extf %218 : vector<32x32xbf16> to vector<32x32xf32>
      %c0_82 = arith.constant 0 : index
      %c0_83 = arith.constant 0 : index
      %220 = vector.load %arg4[%c0_82, %c0_83] : memref<1x32xf32, #tpu.memory_space<vmem>>, vector<1x32xf32>
      %c0_84 = arith.constant 0 : index
      %c0_85 = arith.constant 0 : index
      %221 = vector.load %arg5[%c0_84, %c0_85] : memref<1x32xf32, #tpu.memory_space<vmem>>, vector<1x32xf32>
      %cst_86 = arith.constant dense<0.000000e+00> : vector<32xf32>
      %222 = vector.multi_reduction <add>, %219, %cst_86 [1] : vector<32x32xf32> to vector<32xf32>
      %223 = vector.shape_cast %222 : vector<32xf32> to vector<32x1xf32>
      %cst_87 = arith.constant 3.200000e+01 : f32
      %224 = vector.broadcast %cst_87 : f32 to vector<32x1xf32>
      %225 = arith.divf %223, %224 : vector<32x1xf32>
      %226 = vector.broadcast %225 : vector<32x1xf32> to vector<32x32xf32>
      %227 = arith.subf %219, %226 : vector<32x32xf32>
      %228 = arith.mulf %227, %227 : vector<32x32xf32>
      %cst_88 = arith.constant dense<0.000000e+00> : vector<32xf32>
      %229 = vector.multi_reduction <add>, %228, %cst_88 [1] : vector<32x32xf32> to vector<32xf32>
      %230 = vector.shape_cast %229 : vector<32xf32> to vector<32x1xf32>
      %cst_89 = arith.constant 3.200000e+01 : f32
      %231 = vector.broadcast %cst_89 : f32 to vector<32x1xf32>
      %232 = arith.divf %230, %231 : vector<32x1xf32>
      %233 = vector.broadcast %225 : vector<32x1xf32> to vector<32x32xf32>
      %234 = arith.subf %219, %233 : vector<32x32xf32>
      %cst_90 = arith.constant 9.99999996E-13 : f32
      %235 = vector.broadcast %cst_90 : f32 to vector<32x1xf32>
      %236 = arith.addf %232, %235 : vector<32x1xf32>
      %237 = math.rsqrt %236 : vector<32x1xf32>
      %238 = vector.broadcast %237 : vector<32x1xf32> to vector<32x32xf32>
      %239 = arith.mulf %234, %238 : vector<32x32xf32>
      %240 = vector.broadcast %220 : vector<1x32xf32> to vector<32x32xf32>
      %241 = arith.mulf %239, %240 : vector<32x32xf32>
      %242 = vector.broadcast %221 : vector<1x32xf32> to vector<32x32xf32>
      %243 = arith.addf %241, %242 : vector<32x32xf32>
      %c0_91 = arith.constant 0 : index
      %c0_92 = arith.constant 0 : index
      %244 = vector.load %arg19[%c0_91, %c0_92] : memref<32x32xf32, #tpu.memory_space<vmem>>, vector<32x32xf32>
      tpu.vector_store %arg19[%c0_91, %c0_92], %243 {strides = array<i32>} : memref<32x32xf32, #tpu.memory_space<vmem>>, vector<32x32xf32>,
    } else {
    }
    %c0 = arith.constant 0 : index
    %c0_1 = arith.constant 0 : index
    %3 = vector.load %arg19[%c0, %c0_1] : memref<32x32xf32, #tpu.memory_space<vmem>>, vector<32x32xf32>
    %4 = arith.truncf %3 : vector<32x32xf32> to vector<32x32xbf16>
    %c0_2 = arith.constant 0 : index
    %c0_3 = arith.constant 0 : index
    %c0_4 = arith.constant 0 : index
    %5 = vector.load %arg6[%c0_2, %c0_3, %c0_4] : memref<1x32x96xbf16, #tpu.memory_space<vmem>>, vector<1x32x96xbf16>
    %6 = vector.shape_cast %5 : vector<1x32x96xbf16> to vector<32x96xbf16>
    %cst = arith.constant dense<0.000000e+00> : vector<32x96xf32>
    %7 = tpu.matmul %4, %6, %cst {dimension_numbers = #tpu.dot_dimension_numbers<[1], [0], [0], [1], [0, 0, 1, 1], [], []>} : vector<32x32xbf16>, vector<32x96xbf16>, vector<32x96xf32> -> vector<32x96xf32>
    %c0_5 = arith.constant 0 : index
    %c0_6 = arith.constant 0 : index
    %c0_7 = arith.constant 0 : index
    %8 = vector.load %arg7[%c0_5, %c0_6, %c0_7] : memref<1x1x96xf32, #tpu.memory_space<vmem>>, vector<1x1x96xf32>
    %9 = vector.shape_cast %8 : vector<1x1x96xf32> to vector<1x96xf32>
    %10 = vector.broadcast %9 : vector<1x96xf32> to vector<32x96xf32>
    %11 = arith.addf %7, %10 : vector<32x96xf32>
    %c0_8 = arith.constant 0 : index
    %c0_9 = arith.constant 0 : index
    %12 = vector.load %arg3[%c0_8, %c0_9] : memref<4x8xf32, #tpu.memory_space<vmem>>, vector<4x8xf32>
    %13 = vector.shape_cast %12 : vector<4x8xf32> to vector<4x1x8xf32>
    %14 = vector.extract_strided_slice %11 {offsets = [0, 0], sizes = [32, 8], strides = [1, 1]} : vector<32x96xf32> to vector<32x8xf32>
    %cst_10 = arith.constant 0.353553385 : f32
    %15 = vector.broadcast %cst_10 : f32 to vector<32x8xf32>
    %16 = arith.mulf %14, %15 : vector<32x8xf32>
    %17 = vector.shape_cast %16 : vector<32x8xf32> to vector<4x8x8xf32>
    %18 = arith.truncf %17 : vector<4x8x8xf32> to vector<4x8x8xbf16>
    %19 = vector.extract_strided_slice %11 {offsets = [0, 32], sizes = [32, 8], strides = [1, 1]} : vector<32x96xf32> to vector<32x8xf32>
    %20 = vector.shape_cast %19 : vector<32x8xf32> to vector<4x8x8xf32>
    %21 = arith.truncf %20 : vector<4x8x8xf32> to vector<4x8x8xbf16>
    %22 = vector.extract_strided_slice %11 {offsets = [0, 64], sizes = [32, 8], strides = [1, 1]} : vector<32x96xf32> to vector<32x8xf32>
    %23 = vector.shape_cast %22 : vector<32x8xf32> to vector<4x8x8xf32>
    %24 = arith.truncf %23 : vector<4x8x8xf32> to vector<4x8x8xbf16>
    "tpu.trace_start"() <{level = 10 : i32, message = "bqd,bkd->bqk"}> : () -> ()
    %cst_11 = arith.constant dense<0.000000e+00> : vector<4x8x8xf32>
    %25 = tpu.matmul %18, %21, %cst_11 {dimension_numbers = #tpu.dot_dimension_numbers<[2], [2], [1], [1], [0, 0, 0, 1, 1, 1], [0], [0]>} : vector<4x8x8xbf16>, vector<4x8x8xbf16>, vector<4x8x8xf32> -> vector<4x8x8xf32>
    "tpu.trace_stop"() : () -> ()
    %26 = vector.broadcast %13 : vector<4x1x8xf32> to vector<4x8x8xf32>
    %27 = arith.addf %25, %26 : vector<4x8x8xf32>
    %cst_12 = arith.constant dense<0xFF800000> : vector<4x8xf32>
    %28 = vector.multi_reduction <maximumf>, %27, %cst_12 [2] : vector<4x8x8xf32> to vector<4x8xf32>
    %29 = vector.shape_cast %28 : vector<4x8xf32> to vector<4x8x1xf32>
    %30 = vector.broadcast %29 : vector<4x8x1xf32> to vector<4x8x8xf32>
    %31 = arith.subf %27, %30 : vector<4x8x8xf32>
    %32 = math.exp %31 : vector<4x8x8xf32>
    %cst_13 = arith.constant dense<0.000000e+00> : vector<4x8xf32>
    %33 = vector.multi_reduction <add>, %32, %cst_13 [2] : vector<4x8x8xf32> to vector<4x8xf32>
    %34 = vector.shape_cast %33 : vector<4x8xf32> to vector<4x8x1xf32>
    %35 = tpu.reciprocal %34 {approx = true} : vector<4x8x1xf32> -> vector<4x8x1xf32>
    %36 = vector.broadcast %35 : vector<4x8x1xf32> to vector<4x8x8xf32>
    %37 = arith.mulf %32, %36 : vector<4x8x8xf32>
    %38 = arith.truncf %37 : vector<4x8x8xf32> to vector<4x8x8xbf16>
    "tpu.trace_start"() <{level = 10 : i32, message = "bqk,bkd->bqd"}> : () -> ()
    %cst_14 = arith.constant dense<0.000000e+00> : vector<4x8x8xf32>
    %39 = tpu.matmul %38, %24, %cst_14 {dimension_numbers = #tpu.dot_dimension_numbers<[2], [1], [1], [2], [0, 0, 0, 1, 1, 2], [0], [0]>} : vector<4x8x8xbf16>, vector<4x8x8xbf16>, vector<4x8x8xf32> -> vector<4x8x8xf32>
    "tpu.trace_stop"() : () -> ()
    %40 = vector.shape_cast %39 : vector<4x8x8xf32> to vector<32x8xf32>
    %41 = vector.extract_strided_slice %11 {offsets = [0, 8], sizes = [32, 8], strides = [1, 1]} : vector<32x96xf32> to vector<32x8xf32>
    %cst_15 = arith.constant 0.353553385 : f32
    %42 = vector.broadcast %cst_15 : f32 to vector<32x8xf32>
    %43 = arith.mulf %41, %42 : vector<32x8xf32>
    %44 = vector.shape_cast %43 : vector<32x8xf32> to vector<4x8x8xf32>
    %45 = arith.truncf %44 : vector<4x8x8xf32> to vector<4x8x8xbf16>
    %46 = vector.extract_strided_slice %11 {offsets = [0, 40], sizes = [32, 8], strides = [1, 1]} : vector<32x96xf32> to vector<32x8xf32>
    %47 = vector.shape_cast %46 : vector<32x8xf32> to vector<4x8x8xf32>
    %48 = arith.truncf %47 : vector<4x8x8xf32> to vector<4x8x8xbf16>
    %49 = vector.extract_strided_slice %11 {offsets = [0, 72], sizes = [32, 8], strides = [1, 1]} : vector<32x96xf32> to vector<32x8xf32>
    %50 = vector.shape_cast %49 : vector<32x8xf32> to vector<4x8x8xf32>
    %51 = arith.truncf %50 : vector<4x8x8xf32> to vector<4x8x8xbf16>
    "tpu.trace_start"() <{level = 10 : i32, message = "bqd,bkd->bqk"}> : () -> ()
    %cst_16 = arith.constant dense<0.000000e+00> : vector<4x8x8xf32>
    %52 = tpu.matmul %45, %48, %cst_16 {dimension_numbers = #tpu.dot_dimension_numbers<[2], [2], [1], [1], [0, 0, 0, 1, 1, 1], [0], [0]>} : vector<4x8x8xbf16>, vector<4x8x8xbf16>, vector<4x8x8xf32> -> vector<4x8x8xf32>
    "tpu.trace_stop"() : () -> ()
    %53 = vector.broadcast %13 : vector<4x1x8xf32> to vector<4x8x8xf32>
    %54 = arith.addf %52, %53 : vector<4x8x8xf32>
    %cst_17 = arith.constant dense<0xFF800000> : vector<4x8xf32>
    %55 = vector.multi_reduction <maximumf>, %54, %cst_17 [2] : vector<4x8x8xf32> to vector<4x8xf32>
    %56 = vector.shape_cast %55 : vector<4x8xf32> to vector<4x8x1xf32>
    %57 = vector.broadcast %56 : vector<4x8x1xf32> to vector<4x8x8xf32>
    %58 = arith.subf %54, %57 : vector<4x8x8xf32>
    %59 = math.exp %58 : vector<4x8x8xf32>
    %cst_18 = arith.constant dense<0.000000e+00> : vector<4x8xf32>
    %60 = vector.multi_reduction <add>, %59, %cst_18 [2] : vector<4x8x8xf32> to vector<4x8xf32>
    %61 = vector.shape_cast %60 : vector<4x8xf32> to vector<4x8x1xf32>
    %62 = tpu.reciprocal %61 {approx = true} : vector<4x8x1xf32> -> vector<4x8x1xf32>
    %63 = vector.broadcast %62 : vector<4x8x1xf32> to vector<4x8x8xf32>
    %64 = arith.mulf %59, %63 : vector<4x8x8xf32>
    %65 = arith.truncf %64 : vector<4x8x8xf32> to vector<4x8x8xbf16>
    "tpu.trace_start"() <{level = 10 : i32, message = "bqk,bkd->bqd"}> : () -> ()
    %cst_19 = arith.constant dense<0.000000e+00> : vector<4x8x8xf32>
    %66 = tpu.matmul %65, %51, %cst_19 {dimension_numbers = #tpu.dot_dimension_numbers<[2], [1], [1], [2], [0, 0, 0, 1, 1, 2], [0], [0]>} : vector<4x8x8xbf16>, vector<4x8x8xbf16>, vector<4x8x8xf32> -> vector<4x8x8xf32>
    "tpu.trace_stop"() : () -> ()
    %67 = vector.shape_cast %66 : vector<4x8x8xf32> to vector<32x8xf32>
    %68 = vector.extract_strided_slice %11 {offsets = [0, 16], sizes = [32, 8], strides = [1, 1]} : vector<32x96xf32> to vector<32x8xf32>
    %cst_20 = arith.constant 0.353553385 : f32
    %69 = vector.broadcast %cst_20 : f32 to vector<32x8xf32>
    %70 = arith.mulf %68, %69 : vector<32x8xf32>
    %71 = vector.shape_cast %70 : vector<32x8xf32> to vector<4x8x8xf32>
    %72 = arith.truncf %71 : vector<4x8x8xf32> to vector<4x8x8xbf16>
    %73 = vector.extract_strided_slice %11 {offsets = [0, 48], sizes = [32, 8], strides = [1, 1]} : vector<32x96xf32> to vector<32x8xf32>
    %74 = vector.shape_cast %73 : vector<32x8xf32> to vector<4x8x8xf32>
    %75 = arith.truncf %74 : vector<4x8x8xf32> to vector<4x8x8xbf16>
    %76 = vector.extract_strided_slice %11 {offsets = [0, 80], sizes = [32, 8], strides = [1, 1]} : vector<32x96xf32> to vector<32x8xf32>
    %77 = vector.shape_cast %76 : vector<32x8xf32> to vector<4x8x8xf32>
    %78 = arith.truncf %77 : vector<4x8x8xf32> to vector<4x8x8xbf16>
    "tpu.trace_start"() <{level = 10 : i32, message = "bqd,bkd->bqk"}> : () -> ()
    %cst_21 = arith.constant dense<0.000000e+00> : vector<4x8x8xf32>
    %79 = tpu.matmul %72, %75, %cst_21 {dimension_numbers = #tpu.dot_dimension_numbers<[2], [2], [1], [1], [0, 0, 0, 1, 1, 1], [0], [0]>} : vector<4x8x8xbf16>, vector<4x8x8xbf16>, vector<4x8x8xf32> -> vector<4x8x8xf32>
    "tpu.trace_stop"() : () -> ()
    %80 = vector.broadcast %13 : vector<4x1x8xf32> to vector<4x8x8xf32>
    %81 = arith.addf %79, %80 : vector<4x8x8xf32>
    %cst_22 = arith.constant dense<0xFF800000> : vector<4x8xf32>
    %82 = vector.multi_reduction <maximumf>, %81, %cst_22 [2] : vector<4x8x8xf32> to vector<4x8xf32>
    %83 = vector.shape_cast %82 : vector<4x8xf32> to vector<4x8x1xf32>
    %84 = vector.broadcast %83 : vector<4x8x1xf32> to vector<4x8x8xf32>
    %85 = arith.subf %81, %84 : vector<4x8x8xf32>
    %86 = math.exp %85 : vector<4x8x8xf32>
    %cst_23 = arith.constant dense<0.000000e+00> : vector<4x8xf32>
    %87 = vector.multi_reduction <add>, %86, %cst_23 [2] : vector<4x8x8xf32> to vector<4x8xf32>
    %88 = vector.shape_cast %87 : vector<4x8xf32> to vector<4x8x1xf32>
    %89 = tpu.reciprocal %88 {approx = true} : vector<4x8x1xf32> -> vector<4x8x1xf32>
    %90 = vector.broadcast %89 : vector<4x8x1xf32> to vector<4x8x8xf32>
    %91 = arith.mulf %86, %90 : vector<4x8x8xf32>
    %92 = arith.truncf %91 : vector<4x8x8xf32> to vector<4x8x8xbf16>
    "tpu.trace_start"() <{level = 10 : i32, message = "bqk,bkd->bqd"}> : () -> ()
    %cst_24 = arith.constant dense<0.000000e+00> : vector<4x8x8xf32>
    %93 = tpu.matmul %92, %78, %cst_24 {dimension_numbers = #tpu.dot_dimension_numbers<[2], [1], [1], [2], [0, 0, 0, 1, 1, 2], [0], [0]>} : vector<4x8x8xbf16>, vector<4x8x8xbf16>, vector<4x8x8xf32> -> vector<4x8x8xf32>
    "tpu.trace_stop"() : () -> ()
    %94 = vector.shape_cast %93 : vector<4x8x8xf32> to vector<32x8xf32>
    %95 = vector.extract_strided_slice %11 {offsets = [0, 24], sizes = [32, 8], strides = [1, 1]} : vector<32x96xf32> to vector<32x8xf32>
    %cst_25 = arith.constant 0.353553385 : f32
    %96 = vector.broadcast %cst_25 : f32 to vector<32x8xf32>
    %97 = arith.mulf %95, %96 : vector<32x8xf32>
    %98 = vector.shape_cast %97 : vector<32x8xf32> to vector<4x8x8xf32>
    %99 = arith.truncf %98 : vector<4x8x8xf32> to vector<4x8x8xbf16>
    %100 = vector.extract_strided_slice %11 {offsets = [0, 56], sizes = [32, 8], strides = [1, 1]} : vector<32x96xf32> to vector<32x8xf32>
    %101 = vector.shape_cast %100 : vector<32x8xf32> to vector<4x8x8xf32>
    %102 = arith.truncf %101 : vector<4x8x8xf32> to vector<4x8x8xbf16>
    %103 = vector.extract_strided_slice %11 {offsets = [0, 88], sizes = [32, 8], strides = [1, 1]} : vector<32x96xf32> to vector<32x8xf32>
    %104 = vector.shape_cast %103 : vector<32x8xf32> to vector<4x8x8xf32>
    %105 = arith.truncf %104 : vector<4x8x8xf32> to vector<4x8x8xbf16>
    "tpu.trace_start"() <{level = 10 : i32, message = "bqd,bkd->bqk"}> : () -> ()
    %cst_26 = arith.constant dense<0.000000e+00> : vector<4x8x8xf32>
    %106 = tpu.matmul %99, %102, %cst_26 {dimension_numbers = #tpu.dot_dimension_numbers<[2], [2], [1], [1], [0, 0, 0, 1, 1, 1], [0], [0]>} : vector<4x8x8xbf16>, vector<4x8x8xbf16>, vector<4x8x8xf32> -> vector<4x8x8xf32>
    "tpu.trace_stop"() : () -> ()
    %107 = vector.broadcast %13 : vector<4x1x8xf32> to vector<4x8x8xf32>
    %108 = arith.addf %106, %107 : vector<4x8x8xf32>
    %cst_27 = arith.constant dense<0xFF800000> : vector<4x8xf32>
    %109 = vector.multi_reduction <maximumf>, %108, %cst_27 [2] : vector<4x8x8xf32> to vector<4x8xf32>
    %110 = vector.shape_cast %109 : vector<4x8xf32> to vector<4x8x1xf32>
    %111 = vector.broadcast %110 : vector<4x8x1xf32> to vector<4x8x8xf32>
    %112 = arith.subf %108, %111 : vector<4x8x8xf32>
    %113 = math.exp %112 : vector<4x8x8xf32>
    %cst_28 = arith.constant dense<0.000000e+00> : vector<4x8xf32>
    %114 = vector.multi_reduction <add>, %113, %cst_28 [2] : vector<4x8x8xf32> to vector<4x8xf32>
    %115 = vector.shape_cast %114 : vector<4x8xf32> to vector<4x8x1xf32>
    %116 = tpu.reciprocal %115 {approx = true} : vector<4x8x1xf32> -> vector<4x8x1xf32>
    %117 = vector.broadcast %116 : vector<4x8x1xf32> to vector<4x8x8xf32>
    %118 = arith.mulf %113, %117 : vector<4x8x8xf32>
    %119 = arith.truncf %118 : vector<4x8x8xf32> to vector<4x8x8xbf16>
    "tpu.trace_start"() <{level = 10 : i32, message = "bqk,bkd->bqd"}> : () -> ()
    %cst_29 = arith.constant dense<0.000000e+00> : vector<4x8x8xf32>
    %120 = tpu.matmul %119, %105, %cst_29 {dimension_numbers = #tpu.dot_dimension_numbers<[2], [1], [1], [2], [0, 0, 0, 1, 1, 2], [0], [0]>} : vector<4x8x8xbf16>, vector<4x8x8xbf16>, vector<4x8x8xf32> -> vector<4x8x8xf32>
    "tpu.trace_stop"() : () -> ()
    %121 = vector.shape_cast %120 : vector<4x8x8xf32> to vector<32x8xf32>
    %122 = tpu.concatenate %40, %67, %94, %121 in 1 : vector<32x8xf32>, vector<32x8xf32>, vector<32x8xf32>, vector<32x8xf32> -> vector<32x32xf32>
    %123 = arith.truncf %122 : vector<32x32xf32> to vector<32x32xbf16>
    %c0_30 = arith.constant 0 : index
    %c0_31 = arith.constant 0 : index
    %c0_32 = arith.constant 0 : index
    %124 = vector.load %arg8[%c0_30, %c0_31, %c0_32] : memref<1x32x32xbf16, #tpu.memory_space<vmem>>, vector<1x32x32xbf16>
    %125 = vector.shape_cast %124 : vector<1x32x32xbf16> to vector<32x32xbf16>
    %cst_33 = arith.constant dense<0.000000e+00> : vector<32x32xf32>
    %126 = tpu.matmul %123, %125, %cst_33 {dimension_numbers = #tpu.dot_dimension_numbers<[1], [0], [0], [1], [0, 0, 1, 1], [], []>} : vector<32x32xbf16>, vector<32x32xbf16>, vector<32x32xf32> -> vector<32x32xf32>
    %127 = arith.addf %3, %126 : vector<32x32xf32>
    %c0_34 = arith.constant 0 : index
    %c0_35 = arith.constant 0 : index
    %c0_36 = arith.constant 0 : index
    %128 = vector.load %arg9[%c0_34, %c0_35, %c0_36] : memref<1x1x32xf32, #tpu.memory_space<vmem>>, vector<1x1x32xf32>
    %129 = vector.shape_cast %128 : vector<1x1x32xf32> to vector<1x32xf32>
    %130 = vector.broadcast %129 : vector<1x32xf32> to vector<32x32xf32>
    %131 = arith.addf %127, %130 : vector<32x32xf32>
    %c0_37 = arith.constant 0 : index
    %c0_38 = arith.constant 0 : index
    %c0_39 = arith.constant 0 : index
    %132 = vector.load %arg10[%c0_37, %c0_38, %c0_39] : memref<1x1x32xf32, #tpu.memory_space<vmem>>, vector<1x1x32xf32>
    %133 = vector.shape_cast %132 : vector<1x1x32xf32> to vector<1x32xf32>
    %c0_40 = arith.constant 0 : index
    %c0_41 = arith.constant 0 : index
    %c0_42 = arith.constant 0 : index
    %134 = vector.load %arg11[%c0_40, %c0_41, %c0_42] : memref<1x1x32xf32, #tpu.memory_space<vmem>>, vector<1x1x32xf32>
    %135 = vector.shape_cast %134 : vector<1x1x32xf32> to vector<1x32xf32>
    %cst_43 = arith.constant dense<0.000000e+00> : vector<32xf32>
    %136 = vector.multi_reduction <add>, %131, %cst_43 [1] : vector<32x32xf32> to vector<32xf32>
    %137 = vector.shape_cast %136 : vector<32xf32> to vector<32x1xf32>
    %cst_44 = arith.constant 3.200000e+01 : f32
    %138 = vector.broadcast %cst_44 : f32 to vector<32x1xf32>
    %139 = arith.divf %137, %138 : vector<32x1xf32>
    %140 = vector.broadcast %139 : vector<32x1xf32> to vector<32x32xf32>
    %141 = arith.subf %131, %140 : vector<32x32xf32>
    %142 = arith.mulf %141, %141 : vector<32x32xf32>
    %cst_45 = arith.constant dense<0.000000e+00> : vector<32xf32>
    %143 = vector.multi_reduction <add>, %142, %cst_45 [1] : vector<32x32xf32> to vector<32xf32>
    %144 = vector.shape_cast %143 : vector<32xf32> to vector<32x1xf32>
    %cst_46 = arith.constant 3.200000e+01 : f32
    %145 = vector.broadcast %cst_46 : f32 to vector<32x1xf32>
    %146 = arith.divf %144, %145 : vector<32x1xf32>
    %147 = vector.broadcast %139 : vector<32x1xf32> to vector<32x32xf32>
    %148 = arith.subf %131, %147 : vector<32x32xf32>
    %cst_47 = arith.constant 9.99999996E-13 : f32
    %149 = vector.broadcast %cst_47 : f32 to vector<32x1xf32>
    %150 = arith.addf %146, %149 : vector<32x1xf32>
    %151 = math.rsqrt %150 : vector<32x1xf32>
    %152 = vector.broadcast %151 : vector<32x1xf32> to vector<32x32xf32>
    %153 = arith.mulf %148, %152 : vector<32x32xf32>
    %154 = vector.broadcast %133 : vector<1x32xf32> to vector<32x32xf32>
    %155 = arith.mulf %153, %154 : vector<32x32xf32>
    %156 = vector.broadcast %135 : vector<1x32xf32> to vector<32x32xf32>
    %157 = arith.addf %155, %156 : vector<32x32xf32>
    %158 = arith.truncf %157 : vector<32x32xf32> to vector<32x32xbf16>
    %c0_48 = arith.constant 0 : index
    %c0_49 = arith.constant 0 : index
    %c0_50 = arith.constant 0 : index
    %159 = vector.load %arg15[%c0_48, %c0_49, %c0_50] : memref<1x1x32xf32, #tpu.memory_space<vmem>>, vector<1x1x32xf32>
    %160 = vector.shape_cast %159 : vector<1x1x32xf32> to vector<1x32xf32>
    %161 = vector.broadcast %160 : vector<1x32xf32> to vector<32x32xf32>
    %162 = arith.addf %157, %161 : vector<32x32xf32>
    %c0_51 = arith.constant 0 : index
    %c0_52 = arith.constant 0 : index
    %c0_53 = arith.constant 0 : index
    %163 = vector.load %arg12[%c0_51, %c0_52, %c0_53] : memref<1x32x64xbf16, #tpu.memory_space<vmem>>, vector<1x32x64xbf16>
    %164 = vector.shape_cast %163 : vector<1x32x64xbf16> to vector<32x64xbf16>
    %cst_54 = arith.constant dense<0.000000e+00> : vector<32x64xf32>
    %165 = tpu.matmul %158, %164, %cst_54 {dimension_numbers = #tpu.dot_dimension_numbers<[1], [0], [0], [1], [0, 0, 1, 1], [], []>} : vector<32x32xbf16>, vector<32x64xbf16>, vector<32x64xf32> -> vector<32x64xf32>
    %c0_55 = arith.constant 0 : index
    %c0_56 = arith.constant 0 : index
    %c0_57 = arith.constant 0 : index
    %166 = vector.load %arg13[%c0_55, %c0_56, %c0_57] : memref<1x1x64xf32, #tpu.memory_space<vmem>>, vector<1x1x64xf32>
    %167 = vector.shape_cast %166 : vector<1x1x64xf32> to vector<1x64xf32>
    %168 = vector.broadcast %167 : vector<1x64xf32> to vector<32x64xf32>
    %169 = arith.addf %165, %168 : vector<32x64xf32>
    %cst_58 = arith.constant 5.000000e-01 : f32
    %170 = vector.broadcast %cst_58 : f32 to vector<32x64xf32>
    %171 = arith.mulf %170, %169 : vector<32x64xf32>
    %cst_59 = arith.constant 4.471500e-02 : f32
    %172 = vector.broadcast %cst_59 : f32 to vector<32x64xf32>
    %173 = arith.mulf %172, %169 : vector<32x64xf32>
    %174 = arith.mulf %173, %169 : vector<32x64xf32>
    %175 = arith.mulf %174, %169 : vector<32x64xf32>
    %176 = arith.addf %169, %175 : vector<32x64xf32>
    %cst_60 = arith.constant 0.797884583 : f32
    %177 = vector.broadcast %cst_60 : f32 to vector<32x64xf32>
    %178 = arith.mulf %177, %176 : vector<32x64xf32>
    %179 = math.tanh %178 : vector<32x64xf32>
    %cst_61 = arith.constant 1.000000e+00 : f32
    %180 = vector.broadcast %cst_61 : f32 to vector<32x64xf32>
    %181 = arith.addf %180, %179 : vector<32x64xf32>
    %182 = arith.mulf %171, %181 : vector<32x64xf32>
    %183 = arith.truncf %182 : vector<32x64xf32> to vector<32x64xbf16>
    %c0_62 = arith.constant 0 : index
    %c0_63 = arith.constant 0 : index
    %c0_64 = arith.constant 0 : index
    %184 = vector.load %arg14[%c0_62, %c0_63, %c0_64] : memref<1x64x32xbf16, #tpu.memory_space<vmem>>, vector<1x64x32xbf16>
    %185 = vector.shape_cast %184 : vector<1x64x32xbf16> to vector<64x32xbf16>
    %cst_65 = arith.constant dense<0.000000e+00> : vector<32x32xf32>
    %186 = tpu.matmul %183, %185, %cst_65 {dimension_numbers = #tpu.dot_dimension_numbers<[1], [0], [0], [1], [0, 0, 1, 1], [], []>} : vector<32x64xbf16>, vector<64x32xbf16>, vector<32x32xf32> -> vector<32x32xf32>
    %187 = arith.addf %162, %186 : vector<32x32xf32>
    %c0_66 = arith.constant 0 : index
    %c0_67 = arith.constant 0 : index
    %c0_68 = arith.constant 0 : index
    %188 = vector.load %arg16[%c0_66, %c0_67, %c0_68] : memref<1x1x32xf32, #tpu.memory_space<vmem>>, vector<1x1x32xf32>
    %189 = vector.shape_cast %188 : vector<1x1x32xf32> to vector<1x32xf32>
    %c0_69 = arith.constant 0 : index
    %c0_70 = arith.constant 0 : index
    %c0_71 = arith.constant 0 : index
    %190 = vector.load %arg17[%c0_69, %c0_70, %c0_71] : memref<1x1x32xf32, #tpu.memory_space<vmem>>, vector<1x1x32xf32>
    %191 = vector.shape_cast %190 : vector<1x1x32xf32> to vector<1x32xf32>
    %cst_72 = arith.constant dense<0.000000e+00> : vector<32xf32>
    %192 = vector.multi_reduction <add>, %187, %cst_72 [1] : vector<32x32xf32> to vector<32xf32>
    %193 = vector.shape_cast %192 : vector<32xf32> to vector<32x1xf32>
    %cst_73 = arith.constant 3.200000e+01 : f32
    %194 = vector.broadcast %cst_73 : f32 to vector<32x1xf32>
    %195 = arith.divf %193, %194 : vector<32x1xf32>
    %196 = vector.broadcast %195 : vector<32x1xf32> to vector<32x32xf32>
    %197 = arith.subf %187, %196 : vector<32x32xf32>
    %198 = arith.mulf %197, %197 : vector<32x32xf32>
    %cst_74 = arith.constant dense<0.000000e+00> : vector<32xf32>
    %199 = vector.multi_reduction <add>, %198, %cst_74 [1] : vector<32x32xf32> to vector<32xf32>
    %200 = vector.shape_cast %199 : vector<32xf32> to vector<32x1xf32>
    %cst_75 = arith.constant 3.200000e+01 : f32
    %201 = vector.broadcast %cst_75 : f32 to vector<32x1xf32>
    %202 = arith.divf %200, %201 : vector<32x1xf32>
    %203 = vector.broadcast %195 : vector<32x1xf32> to vector<32x32xf32>
    %204 = arith.subf %187, %203 : vector<32x32xf32>
    %cst_76 = arith.constant 9.99999996E-13 : f32
    %205 = vector.broadcast %cst_76 : f32 to vector<32x1xf32>
    %206 = arith.addf %202, %205 : vector<32x1xf32>
    %207 = math.rsqrt %206 : vector<32x1xf32>
    %208 = vector.broadcast %207 : vector<32x1xf32> to vector<32x32xf32>
    %209 = arith.mulf %204, %208 : vector<32x32xf32>
    %210 = vector.broadcast %189 : vector<1x32xf32> to vector<32x32xf32>
    %211 = arith.mulf %209, %210 : vector<32x32xf32>
    %212 = vector.broadcast %191 : vector<1x32xf32> to vector<32x32xf32>
    %213 = arith.addf %211, %212 : vector<32x32xf32>
    %c0_77 = arith.constant 0 : index
    %c0_78 = arith.constant 0 : index
    %214 = vector.load %arg19[%c0_77, %c0_78] : memref<32x32xf32, #tpu.memory_space<vmem>>, vector<32x32xf32>
    tpu.vector_store %arg19[%c0_77, %c0_78], %213 {strides = array<i32>} : memref<32x32xf32, #tpu.memory_space<vmem>>, vector<32x32xf32>,
    %c1_i32 = arith.constant 1 : i32
    %215 = arith.cmpi eq, %arg1, %c1_i32 : i32
    %216 = arith.extui %215 : i1 to i32
    %c0_i32_79 = arith.constant 0 : i32
    %217 = arith.cmpi ne, %216, %c0_i32_79 : i32
    scf.if %217 {
      %c0_80 = arith.constant 0 : index
      %c0_81 = arith.constant 0 : index
      %218 = tpu.strided_load %arg19[%c0_80, %c0_81] {strides = array<i32: 8, 1>} : memref<32x32xf32, #tpu.memory_space<vmem>>, vector<4x32xf32>
      %c0_82 = arith.constant 0 : index
      %c0_83 = arith.constant 0 : index
      %219 = vector.load %arg18[%c0_82, %c0_83] : memref<4x32xf32, #tpu.memory_space<vmem>>, vector<4x32xf32>
      tpu.vector_store %arg18[%c0_82, %c0_83], %218 {strides = array<i32>} : memref<4x32xf32, #tpu.memory_space<vmem>>, vector<4x32xf32>,
    } else {
    }
    return
  }
  func.func @transform_0(%arg0: i32, %arg1: i32) -> (i32, i32) {
    %c0_i32 = arith.constant 0 : i32
    %c0_i32_0 = arith.constant 0 : i32
    return %arg0, %c0_i32 : i32, i32
  }
  func.func @transform_1(%arg0: i32, %arg1: i32) -> (i32, i32) {
    %c0_i32 = arith.constant 0 : i32
    %c0_i32_0 = arith.constant 0 : i32
    return %arg0, %c0_i32 : i32, i32
  }
  func.func @transform_2(%arg0: i32, %arg1: i32) -> (i32, i32) {
    %c0_i32 = arith.constant 0 : i32
    %c0_i32_0 = arith.constant 0 : i32
    %c0_i32_1 = arith.constant 0 : i32
    return %c0_i32, %c0_i32_0 : i32, i32
  }
  func.func @transform_3(%arg0: i32, %arg1: i32) -> (i32, i32) {
    %c0_i32 = arith.constant 0 : i32
    %c0_i32_0 = arith.constant 0 : i32
    %c0_i32_1 = arith.constant 0 : i32
    return %c0_i32, %c0_i32_0 : i32, i32
  }
  func.func @transform_4(%arg0: i32, %arg1: i32) -> (i32, i32, i32) {
    %c0_i32 = arith.constant 0 : i32
    %c0_i32_0 = arith.constant 0 : i32
    %c0_i32_1 = arith.constant 0 : i32
    return %arg1, %c0_i32, %c0_i32_0 : i32, i32, i32
  }
  func.func @transform_5(%arg0: i32, %arg1: i32) -> (i32, i32, i32) {
    %c0_i32 = arith.constant 0 : i32
    %c0_i32_0 = arith.constant 0 : i32
    %c0_i32_1 = arith.constant 0 : i32
    return %arg1, %c0_i32, %c0_i32_0 : i32, i32, i32
  }
  func.func @transform_6(%arg0: i32, %arg1: i32) -> (i32, i32, i32) {
    %c0_i32 = arith.constant 0 : i32
    %c0_i32_0 = arith.constant 0 : i32
    %c0_i32_1 = arith.constant 0 : i32
    return %arg1, %c0_i32, %c0_i32_0 : i32, i32, i32
  }
  func.func @transform_7(%arg0: i32, %arg1: i32) -> (i32, i32, i32) {
    %c0_i32 = arith.constant 0 : i32
    %c0_i32_0 = arith.constant 0 : i32
    %c0_i32_1 = arith.constant 0 : i32
    return %arg1, %c0_i32, %c0_i32_0 : i32, i32, i32
  }
  func.func @transform_8(%arg0: i32, %arg1: i32) -> (i32, i32, i32) {
    %c0_i32 = arith.constant 0 : i32
    %c0_i32_0 = arith.constant 0 : i32
    %c0_i32_1 = arith.constant 0 : i32
    return %arg1, %c0_i32, %c0_i32_0 : i32, i32, i32
  }
  func.func @transform_9(%arg0: i32, %arg1: i32) -> (i32, i32, i32) {
    %c0_i32 = arith.constant 0 : i32
    %c0_i32_0 = arith.constant 0 : i32
    %c0_i32_1 = arith.constant 0 : i32
    return %arg1, %c0_i32, %c0_i32_0 : i32, i32, i32
  }
  func.func @transform_10(%arg0: i32, %arg1: i32) -> (i32, i32, i32) {
    %c0_i32 = arith.constant 0 : i32
    %c0_i32_0 = arith.constant 0 : i32
    %c0_i32_1 = arith.constant 0 : i32
    return %arg1, %c0_i32, %c0_i32_0 : i32, i32, i32
  }
  func.func @transform_11(%arg0: i32, %arg1: i32) -> (i32, i32, i32) {
    %c0_i32 = arith.constant 0 : i32
    %c0_i32_0 = arith.constant 0 : i32
    %c0_i32_1 = arith.constant 0 : i32
    return %arg1, %c0_i32, %c0_i32_0 : i32, i32, i32
  }
  func.func @transform_12(%arg0: i32, %arg1: i32) -> (i32, i32, i32) {
    %c0_i32 = arith.constant 0 : i32
    %c0_i32_0 = arith.constant 0 : i32
    %c0_i32_1 = arith.constant 0 : i32
    return %arg1, %c0_i32, %c0_i32_0 : i32, i32, i32
  }
  func.func @transform_13(%arg0: i32, %arg1: i32) -> (i32, i32, i32) {
    %c0_i32 = arith.constant 0 : i32
    %c0_i32_0 = arith.constant 0 : i32
    %c0_i32_1 = arith.constant 0 : i32
    return %arg1, %c0_i32, %c0_i32_0 : i32, i32, i32
  }
  func.func @transform_14(%arg0: i32, %arg1: i32) -> (i32, i32, i32) {
    %c0_i32 = arith.constant 0 : i32
    %c0_i32_0 = arith.constant 0 : i32
    %c0_i32_1 = arith.constant 0 : i32
    return %arg1, %c0_i32, %c0_i32_0 : i32, i32, i32
  }
  func.func @transform_15(%arg0: i32, %arg1: i32) -> (i32, i32, i32) {
    %c0_i32 = arith.constant 0 : i32
    %c0_i32_0 = arith.constant 0 : i32
    %c0_i32_1 = arith.constant 0 : i32
    return %arg1, %c0_i32, %c0_i32_0 : i32, i32, i32
  }
  func.func @transform_16(%arg0: i32, %arg1: i32) -> (i32, i32) {
    %c0_i32 = arith.constant 0 : i32
    %c0_i32_0 = arith.constant 0 : i32
    return %arg0, %c0_i32 : i32, i32
  }
}

</mosaic_0001>

<bundles_post_ra>
// kernel: tpu_custom_call.1
= control target key start
LH: loop header
LB: loop body
LE: loop exit
PB: predicated region body
PF: predicated region fallthrough
CT: control target
= control target key end

     0   :  { %s6260_s0 = inlined_call_operand.hbm [shape: bf16[32,32], index: 0, kind: input, shape index: {}]   ;;  %s6261_s1 = inlined_call_operand.hbm [shape: f32[4,8], index: 1, kind: input, shape index: {}]   ;;  %s6262_s2 = inlined_call_operand.hbm [shape: f32[1,32], index: 2, kind: input, shape index: {}]   ;;  %s6263_s3 = inlined_call_operand.hbm [shape: f32[1,32], index: 3, kind: input, shape index: {}]   ;;  %s6264_s4 = inlined_call_operand.hbm [shape: bf16[2,32,96], index: 4, kind: input, shape index: {}]   ;;  %s6265_s5 = inlined_call_operand.hbm [shape: f32[2,1,96], index: 5, kind: input, shape index: {}]   ;;  %s6266_s6 = inlined_call_operand.hbm [shape: bf16[2,32,32], index: 6, kind: input, shape index: {}]   ;;  %s6267_s7 = inlined_call_operand.hbm [shape: f32[2,1,32], index: 7, kind: input, shape index: {}]   ;;  %s6268_s8 = inlined_call_operand.hbm [shape: f32[2,1,32], index: 8, kind: input, shape index: {}]   ;;  %s6269_s9 = inlined_call_operand.hbm [shape: f32[2,1,32], index: 9, kind: input, shape index: {}]   ;;  %s6270_s10 = inlined_call_operand.hbm [shape: bf16[2,32,64], index: 10, kind: input, shape index: {}]   ;;  %s6271_s11 = inlined_call_operand.hbm [shape: f32[2,1,64], index: 11, kind: input, shape index: {}]   ;;  %s6272_s12 = inlined_call_operand.hbm [shape: bf16[2,64,32], index: 12, kind: input, shape index: {}]   ;;  %s6273_s13 = inlined_call_operand.hbm [shape: f32[2,1,32], index: 13, kind: input, shape index: {}]   ;;  %s6274_s14 = inlined_call_operand.hbm [shape: f32[2,1,32], index: 14, kind: input, shape index: {}]   ;;  %s6275_s15 = inlined_call_operand.hbm [shape: f32[2,1,32], index: 15, kind: input, shape index: {}]   ;;  %s6276_s16 = inlined_call_operand.hbm [shape: f32[4,32], index: 16, kind: output, shape index: {}]  }
   0x1   :  { %6318 = sst [smem:[#allocation40_spill]] %s6260_s0 }
   0x2   :  { %6319 = sst [smem:[#allocation41_spill]] %s6261_s1 }
   0x3   :  { %6320 = sst [smem:[#allocation42_spill]] %s6262_s2 }
   0x4   :  { %6321 = sst [smem:[#allocation43_spill]] %s6263_s3 }
   0x5   :  { %6322 = sst [smem:[#allocation44_spill]] %s6264_s4 }
   0x6   :  { %6323 = sst [smem:[#allocation45_spill]] %s6265_s5 }
   0x7   :  { %6324 = sst [smem:[#allocation46_spill]] %s6266_s6 }
   0x8   :  { %6325 = sst [smem:[#allocation47_spill]] %s6274_s14 }
   0x9   :  { %6326 = sst [smem:[#allocation48_spill]] %s6275_s15 }
   0xa   :  { %6327 = sst [smem:[#allocation49_spill]] %s6276_s16 }
   0xb   :  { %21 = vsyncpa [#allocation4], 0 }
   0xc   :  { %22 = vsyncpa [#allocation7], 0 }
   0xd   :  { %23 = vsyncpa [#allocation10], 0 }
   0xe   :  { %24 = vsyncpa [#allocation5], 0  ;;  %s5237_s21 = smov 0   ;;  %s5239_s22 = smov 0  }
   0xf   :  { %s5241_s23 = smov 0   ;;  %s5243_s24 = smov 0  }
  0x10   :  { %s5245_s25 = smov 0   ;;  %s5247_s26 = smov 0  }
  0x11 LB: > { %6328 = sst [smem:[#allocation29_spill]] %s5098_s22  ;;  %s5266_s27 = sadd.s32 4294967295, %s5114_s26   ;;  %s5114_s26 = sphi %s5247_s26, %s30_s26   ;;  %s5110_s25 = sphi %s5245_s25, %s6396_s25   ;;  %s5106_s24 = sphi %s5243_s24, %s6395_s24   ;;  %s5102_s23 = sphi %s5241_s23, %s6393_s23   ;;  %s5098_s22 = sphi %s5239_s22, %s6392_s22   ;;  %s5094_s21 = sphi %s5237_s21, %s6391_s21  }
  0x12   : > { %6329 = sst [smem:[#allocation30_spill]] %s5102_s23  ;;  %p150_p0 = scmp.ne.s32.totalorder %s5102_s23, %s5098_s22 }
  0x13   : > { %6330 = sst [smem:[#allocation31_spill]] %s5106_s24  ;;  %p151_p1 = scmp.eq.s32.totalorder %s5114_s26, 0 }
  0x14   : > { %6331 = sst [smem:[#allocation32_spill]] %s5114_s26  ;;  %p156_p2 = scmp.ne.s32.totalorder %s5098_s22, %s5094_s21 }
  0x15   : > { %6332 = sst [smem:[#allocation33_spill]] %s5266_s27  ;;  %p6286_p3 = scmp.eq.s32.totalorder %s5266_s27, 0 }
  0x16   : > { %p152_p4 = por %p151_p1, %p150_p0  ;;  %p3808_p5 = scmp.ge.s32.totalorder %s5114_s26, 1 }
  0x17   : > { %p5277_p6 = por %p6286_p3, %p156_p2  ;;  %p479_p7 = scmp.lt.s32.totalorder %s5114_s26, 3 }
  0x18   : > { %s5116_s0 = smov [#allocation3]   ;;  %p4331_p10 = scmp.lt.s32.totalorder %s5114_s26, 2 }
  0x19   : > { %s6333_s29 = scalar_select %p5277_p6, 1, 0 }
  0x1a   : > { %p5282_p8 = pnand %p3808_p5, %p479_p7  ;;  %s494_s17 = sshll.u32 %s5116_s0, 4  ;;  %s495_s17 = int_to_ptr.vmem [resolvable:$true] %s494_s17 }
  0x1b   : > { %6334 = sst [smem:[#allocation34_spill]] %s6333_s29  ;;  %s5296_s19 = sand.u32 1, %s5102_s23  }
  0x1c   : > { %s6335_s30 = scalar_select %p5282_p8, 1, 0 }
  0x1d   : > { %p4277_p9 = pneg %p5282_p8  ;;  %p5298_p12 = pnand %p4331_p10, %p152_p4 }
  0x1e   : > { %6336 = sst [smem:[#allocation35_spill]] %s6335_s30  ;;  %s6340_s16 = sld [smem:[#allocation40_spill]] }
  0x1f   : > { %p5291_p11 = pnand %p4277_p9, %p6286_p3 }
  0x20   : > { %s6339_s20 = scalar_select %p5298_p12, 1, 0 }
  0x21   : > { %s6337_s18 = scalar_select %p5291_p11, 1, 0 }
  0x22   : > { %p5310_p0 = pneg %p5291_p11 }
  0x23   : > { %6338 = sst [smem:[#allocation36_spill]] %s6337_s18 }
  0x24   : > { %s4550_s0 = scalar_lea.hbm %s6340_s16, 256 }
  0x25   : > { %p4551_p13 = scmp.ne.s32.totalorder %s6340_s16, %s4550_s0  ;;  %p4557_p4 = scmp.lt.u32.totalorder %s4550_s0, %s6340_s16 }
  0x26   : > { %s6341_s22 = scalar_select %p5310_p0, 1, 0 }
  0x27   : > { %p4553_p1 = pnand %p5310_p0, %p4551_p13 }
  0x28   : > { %6342 = sst [smem:[#allocation37_spill]] %s6341_s22 }
  0x29   : > { %p4554_p2 = pneg %p4553_p1 }
  0x2b   : > { %p4559_p5 = pnand %p4557_p4, %p4554_p2 }
  0x2d   : > { %4562 = shalt.err (!%p4559_p5)
}
  0x2e   : > { %s4563_s28 = scalar_lea.vmem %s495_s17, 256  ;;  %p4571_p3 = scmp.lt.s32.totalorder %s495_s17, %s495_s17 }
  0x2f   : > { %p4564_p7 = scmp.ne.s32.totalorder %s495_s17, %s4563_s28  ;;  %p4572_p6 = scmp.lt.s32.totalorder %s4563_s28, %s4563_s28 }
  0x31   : > { %p4566_p9 = pnand %p4564_p7, %p5310_p0  ;;  %p4573_p8 = por %p4572_p6, %p4571_p3 }
  0x33   : > { %p4567_p10 = pneg %p4566_p9 }
  0x35   : > { %p4574_p12 = pnand %p4573_p8, %p4567_p10 }
  0x37   : > { %4577 = shalt.err (!%p4574_p12)
}
  0x38   : > { %s6296_s24 = smov 64   ;;  %s6298_s27 = smov 4  }
  0x39   : > { %4280 = dma.hbm_to_vmem [thread:$0]  (!%p5291_p11), %s6340_s16, 256, %s495_s17, [#allocation4], %s6296_s24, %s6296_s24, %s6298_s27  }
  0x3a   : > { %s39_s21 = sadd.s32 1, %s5110_s25  ;;  %s543_s0 = sand.u32 1, %s5114_s26  }
  0x3b   : > { %p40_p3 = scmp.ge.s32.totalorder %s39_s21, 2  ;;  %s5332_s28 = sshll.u32 %s5296_s19, 4 }
  0x3c   : > { %s5337_s15 = sshll.u32 %s5110_s25, 8  ;;  %s6344_s4 = sld [smem:[#allocation44_spill]] }
  0x3d   : > { %s6398_s21 = smov (%p40_p3, %s39_s21), 0  ;;  %s547_s17 = scalar_lea.vmem [#allocation11], %s5332_s28 }
  0x3e   : > { %6343 = sst [smem:[#allocation38_spill]] %s6398_s21  ;;  %s140_s3 = ssub.s32 %s5110_s25, %s6398_s21 }
  0x3f   : > { %p141_p6 = scmp.eq.s32.totalorder %s140_s3, 0  ;;  %s554_s29 = sshll.u32 %s547_s17, 4  ;;  %s5348_s29 = int_to_ptr.vmem [resolvable:$true] %s554_s29 }
  0x40   : > { %s6345_s30 = sadd.s32 1, %s5102_s23  ;;  %s5355_s27 = scalar_lea.sflag [#allocation4], %s543_s0 }
  0x41   : > { %s5353_s24 = scalar_select %p141_p6, %s5102_s23, %s6345_s30  }
  0x42   : > { %s5345_s18 = scalar_lea.hbm %s6344_s4, %s5337_s15  ;;  %p6347_p12 = scmp.ne.s32.totalorder %s6339_s20, 0 }
  0x43   : > { %6346 = sst [smem:[#allocation39_spill]] %s5353_s24  ;;  %s4578_s16 = scalar_lea.hbm %s5345_s18, 256 }
  0x44   : > { %p4579_p8 = scmp.ne.s32.totalorder %s5345_s18, %s4578_s16  ;;  %p5361_p13 = pneg %p6347_p12 }
  0x45   : > { %s4583_s17 = scalar_lea.hbm %s6344_s4, 512  ;;  %p4584_p4 = scmp.lt.u32.totalorder %s5345_s18, %s6344_s4 }
  0x46   : > { %s6348_s2 = scalar_select %p5361_p13, 1, 0 }
  0x47   : > { %p4581_p1 = pnand %p5361_p13, %p4579_p8  ;;  %p4585_p5 = scmp.lt.u32.totalorder %s4583_s17, %s4578_s16 }
  0x48   : > { %p4587_p9 = scmp.lt.u32.totalorder %s4578_s16, %s5345_s18 }
  0x49   : > { %p4582_p2 = pneg %p4581_p1  ;;  %p4586_p7 = por %p4585_p5, %p4584_p4 }
  0x4b   : > { %p4588_p10 = por %p4587_p9, %p4586_p7 }
  0x4d   : > { %p4589_p3 = pnand %p4588_p10, %p4582_p2 }
  0x4f   : > { %4592 = shalt.err (!%p4589_p3)
}
  0x50   : > { %s4593_s0 = scalar_lea.vmem %s5348_s29, 256  ;;  %s5119_s3 = smov [#allocation11]  }
  0x51   : > { %p4594_p6 = scmp.ne.s32.totalorder %s5348_s29, %s4593_s0  ;;  %s4598_s14 = sshll.u32 %s5119_s3, 4  ;;  %s4599_s14 = int_to_ptr.vmem [resolvable:$false] %s4598_s14 }
  0x52   : > { %s4600_s21 = scalar_lea.vmem %s4599_s14, 512  ;;  %p4601_p11 = scmp.lt.s32.totalorder %s5348_s29, %s4599_s14 }
  0x53   : > { %p4596_p8 = pnand %p4594_p6, %p5361_p13  ;;  %p4602_p0 = scmp.lt.s32.totalorder %s4600_s21, %s4593_s0 }
  0x55   : > { %p4597_p1 = pneg %p4596_p8  ;;  %p4603_p4 = por %p4602_p0, %p4601_p11 }
  0x57   : > { %p4604_p5 = pnand %p4603_p4, %p4597_p1 }
  0x59   : > { %4607 = shalt.err (!%p4604_p5)
}
  0x5a   : > { %s6349_s16 = smov 4   ;;  %s6350_s17 = smov 64  }
  0x5b   : > { %4293 = dma.hbm_to_vmem [thread:$0]  (!%p6347_p12), %s5345_s18, 256, %s5348_s29, %s5355_s27, %s6350_s17, %s6350_s17, %s6349_s16  }
  0x5c   : > { %s5389_s30 = sshll.u32 %s5110_s25, 4  ;;  %s567_s3 = scalar_lea.vmem [#allocation12], %s5296_s19 }
  0x5d   : > { %s574_s0 = sshll.u32 %s567_s3, 4  ;;  %s6351_s5 = sld [smem:[#allocation45_spill]]  ;;  %s575_s0 = int_to_ptr.vmem [resolvable:$true] %s574_s0 }
  0x63   : > { %s572_s4 = scalar_lea.hbm %s6351_s5, %s5389_s30  ;;  %s4613_s1 = scalar_lea.hbm %s6351_s5, 32 }
  0x64   : > { %s4608_s24 = scalar_lea.hbm %s572_s4, 16  ;;  %p4614_p7 = scmp.lt.u32.totalorder %s572_s4, %s6351_s5 }
  0x65   : > { %p4609_p11 = scmp.ne.s32.totalorder %s572_s4, %s4608_s24  ;;  %p4615_p9 = scmp.lt.u32.totalorder %s4613_s1, %s4608_s24 }
  0x66   : > { %p4617_p3 = scmp.lt.u32.totalorder %s4608_s24, %s572_s4 }
  0x67   : > { %p4611_p0 = pnand %p4609_p11, %p5361_p13  ;;  %p4616_p10 = por %p4615_p9, %p4614_p7 }
  0x69   : > { %p4612_p2 = pneg %p4611_p0  ;;  %p4618_p6 = por %p4617_p3, %p4616_p10 }
  0x6b   : > { %p4619_p8 = pnand %p4618_p6, %p4612_p2 }
  0x6d   : > { %4622 = shalt.err (!%p4619_p8)
}
  0x6e   : > { %s4623_s3 = scalar_lea.vmem %s575_s0, 16  ;;  %s5120_s14 = smov [#allocation12]  }
  0x6f   : > { %p4624_p1 = scmp.ne.s32.totalorder %s575_s0, %s4623_s3  ;;  %s4628_s21 = sshll.u32 %s5120_s14, 4  ;;  %s4629_s21 = int_to_ptr.vmem [resolvable:$false] %s4628_s21 }
  0x70   : > { %s4630_s23 = scalar_lea.vmem %s4629_s21, 32  ;;  %p4631_p11 = scmp.lt.s32.totalorder %s575_s0, %s4629_s21 }
  0x71   : > { %p4626_p4 = pnand %p4624_p1, %p5361_p13  ;;  %p4632_p0 = scmp.lt.s32.totalorder %s4630_s23, %s4623_s3 }
  0x73   : > { %p4627_p5 = pneg %p4626_p4  ;;  %p4633_p12 = por %p4632_p0, %p4631_p11 }
  0x75   : > { %p4634_p7 = pnand %p4633_p12, %p4627_p5 }
  0x77   : > { %4637 = shalt.err (!%p4634_p7)
}
  0x78   : > { %p6352_p9 = scmp.ne.s32.totalorder %s6339_s20, 0  ;;  %s6353_s6 = sld [smem:[#allocation46_spill]] }
  0x79   : > { %s585_s18 = scalar_lea.vmem [#allocation13], %s5332_s28  ;;  %s5422_s21 = scalar_lea.hbm %s6267_s7, %s5389_s30 }
  0x7a   : > { %4296 = dma.hbm_to_vmem [thread:$0]  (!%p6352_p9), %s572_s4, 16, %s575_s0, %s5355_s27  }
  0x7b   : > { %s592_s29 = sshll.u32 %s585_s18, 4  ;;  %s5416_s29 = int_to_ptr.vmem [resolvable:$true] %s592_s29 }
  0x7e   : > { %s5413_s24 = scalar_lea.hbm %s6353_s6, %s5337_s15  ;;  %s4643_s1 = scalar_lea.hbm %s6353_s6, 512 }
  0x7f   : > { %s4638_s23 = scalar_lea.hbm %s5413_s24, 256  ;;  %p4644_p3 = scmp.lt.u32.totalorder %s5413_s24, %s6353_s6 }
  0x80   : > { %p4639_p12 = scmp.ne.s32.totalorder %s5413_s24, %s4638_s23  ;;  %p4645_p6 = scmp.lt.u32.totalorder %s4643_s1, %s4638_s23 }
  0x81   : > { %p4647_p1 = scmp.lt.u32.totalorder %s4638_s23, %s5413_s24 }
  0x82   : > { %p4641_p2 = pnand %p4639_p12, %p5361_p13  ;;  %p4646_p8 = por %p4645_p6, %p4644_p3 }
  0x84   : > { %p4642_p10 = pneg %p4641_p2  ;;  %p4648_p4 = por %p4647_p1, %p4646_p8 }
  0x86   : > { %p4649_p5 = pnand %p4648_p4, %p4642_p10 }
  0x88   : > { %4652 = shalt.err (!%p4649_p5)
}
  0x89   : > { %s4653_s18 = scalar_lea.vmem %s5416_s29, 256  ;;  %s5121_s3 = smov [#allocation13]  }
  0x8a   : > { %p4654_p11 = scmp.ne.s32.totalorder %s5416_s29, %s4653_s18  ;;  %s4658_s14 = sshll.u32 %s5121_s3, 4  ;;  %s4659_s14 = int_to_ptr.vmem [resolvable:$false] %s4658_s14 }
  0x8b   : > { %s4660_s5 = scalar_lea.vmem %s4659_s14, 512  ;;  %p4661_p12 = scmp.lt.s32.totalorder %s5416_s29, %s4659_s14 }
  0x8c   : > { %p4656_p0 = pnand %p4654_p11, %p5361_p13  ;;  %p4662_p2 = scmp.lt.s32.totalorder %s4660_s5, %s4653_s18 }
  0x8e   : > { %p4657_p7 = pneg %p4656_p0  ;;  %p4663_p3 = por %p4662_p2, %p4661_p12 }
  0x90   : > { %p4664_p6 = pnand %p4663_p3, %p4657_p7 }
  0x92   : > { %4667 = shalt.err (!%p4664_p6)
}
  0x93   : > { %4299 = dma.hbm_to_vmem [thread:$0]  (!%p6352_p9), %s5413_s24, 256, %s5416_s29, %s5355_s27, %s6350_s17, %s6350_s17, %s6349_s16  }
  0x94   : > { %s605_s23 = scalar_lea.vmem [#allocation14], %s5296_s19  ;;  %s5454_s26 = scalar_lea.hbm %s6268_s8, %s5389_s30 }
  0x95   : > { %s612_s4 = sshll.u32 %s605_s23, 4  ;;  %s4668_s18 = scalar_lea.hbm %s5422_s21, 16  ;;  %s613_s4 = int_to_ptr.vmem [resolvable:$true] %s612_s4 }
  0x96   : > { %p4669_p10 = scmp.ne.s32.totalorder %s5422_s21, %s4668_s18  ;;  %s4673_s5 = scalar_lea.hbm %s6267_s7, 32 }
  0x97   : > { %p4674_p4 = scmp.lt.u32.totalorder %s5422_s21, %s6267_s7  ;;  %p4675_p5 = scmp.lt.u32.totalorder %s4673_s5, %s4668_s18 }
  0x98   : > { %p4671_p8 = pnand %p4669_p10, %p5361_p13  ;;  %p4677_p0 = scmp.lt.u32.totalorder %s4668_s18, %s5422_s21 }
  0x99   : > { %p4676_p11 = por %p4675_p5, %p4674_p4 }
  0x9a   : > { %p4672_p1 = pneg %p4671_p8 }
  0x9b   : > { %p4678_p7 = por %p4677_p0, %p4676_p11 }
  0x9d   : > { %p4679_p12 = pnand %p4678_p7, %p4672_p1 }
  0x9f   : > { %4682 = shalt.err (!%p4679_p12)
}
  0xa0   : > { %s4683_s24 = scalar_lea.vmem %s613_s4, 16  ;;  %s5122_s29 = smov [#allocation14]  }
  0xa1   : > { %p4684_p2 = scmp.ne.s32.totalorder %s613_s4, %s4683_s24  ;;  %s4688_s23 = sshll.u32 %s5122_s29, 4  ;;  %s4689_s23 = int_to_ptr.vmem [resolvable:$false] %s4688_s23 }
  0xa2   : > { %s4690_s0 = scalar_lea.vmem %s4689_s23, 32  ;;  %p4691_p10 = scmp.lt.s32.totalorder %s613_s4, %s4689_s23 }
  0xa3   : > { %p4686_p3 = pnand %p4684_p2, %p5361_p13  ;;  %p4692_p8 = scmp.lt.s32.totalorder %s4690_s0, %s4683_s24 }
  0xa5   : > { %p4687_p6 = pneg %p4686_p3  ;;  %p4693_p9 = por %p4692_p8, %p4691_p10 }
  0xa7   : > { %p4694_p4 = pnand %p4693_p9, %p4687_p6 }
  0xa9   : > { %4697 = shalt.err (!%p4694_p4)
}
  0xaa   : > { %p6354_p5 = scmp.ne.s32.totalorder %s6339_s20, 0  ;;  %s622_s6 = scalar_lea.vmem [#allocation15], %s5296_s19 }
  0xab   : > { %s629_s22 = sshll.u32 %s622_s6, 4  ;;  %s5479_s3 = scalar_lea.hbm %s6269_s9, %s5389_s30  ;;  %s630_s22 = int_to_ptr.vmem [resolvable:$true] %s629_s22 }
  0xac   : > { %4302 = dma.hbm_to_vmem [thread:$0]  (!%p6354_p5), %s5422_s21, 16, %s613_s4, %s5355_s27  }
  0xad   : > { %s4698_s14 = scalar_lea.hbm %s5454_s26, 16  ;;  %s4703_s29 = scalar_lea.hbm %s6268_s8, 32 }
  0xae   : > { %p4699_p9 = scmp.ne.s32.totalorder %s5454_s26, %s4698_s14  ;;  %p4704_p0 = scmp.lt.u32.totalorder %s5454_s26, %s6268_s8 }
  0xaf   : > { %p4705_p7 = scmp.lt.u32.totalorder %s4703_s29, %s4698_s14  ;;  %p4707_p2 = scmp.lt.u32.totalorder %s4698_s14, %s5454_s26 }
  0xb0   : > { %p4701_p1 = pnand %p4699_p9, %p5361_p13 }
  0xb1   : > { %p4706_p12 = por %p4705_p7, %p4704_p0 }
  0xb2   : > { %p4702_p11 = pneg %p4701_p1 }
  0xb3   : > { %p4708_p3 = por %p4707_p2, %p4706_p12 }
  0xb5   : > { %p4709_p6 = pnand %p4708_p3, %p4702_p11 }
  0xb7   : > { %4712 = shalt.err (!%p4709_p6)
}
  0xb8   : > { %s4713_s21 = scalar_lea.vmem %s630_s22, 16  ;;  %s5123_s4 = smov [#allocation15]  }
  0xb9   : > { %p4714_p10 = scmp.ne.s32.totalorder %s630_s22, %s4713_s21  ;;  %s4718_s6 = sshll.u32 %s5123_s4, 4  ;;  %s4719_s6 = int_to_ptr.vmem [resolvable:$false] %s4718_s6 }
  0xba   : > { %s4720_s1 = scalar_lea.vmem %s4719_s6, 32  ;;  %p4721_p9 = scmp.lt.s32.totalorder %s630_s22, %s4719_s6 }
  0xbb   : > { %p4716_p8 = pnand %p4714_p10, %p5361_p13  ;;  %p4722_p1 = scmp.lt.s32.totalorder %s4720_s1, %s4713_s21 }
  0xbd   : > { %p4717_p4 = pneg %p4716_p8  ;;  %p4723_p5 = por %p4722_p1, %p4721_p9 }
  0xbf   : > { %p4724_p0 = pnand %p4723_p5, %p4717_p4 }
  0xc1   : > { %4727 = shalt.err (!%p4724_p0)
}
  0xc2   : > { %p6355_p7 = scmp.ne.s32.totalorder %s6339_s20, 0  ;;  %s639_s18 = scalar_lea.vmem [#allocation16], %s5296_s19 }
  0xc3   : > { %s646_s14 = sshll.u32 %s639_s18, 4  ;;  %s5504_s29 = scalar_lea.hbm %s6270_s10, %s5337_s15  ;;  %s647_s14 = int_to_ptr.vmem [resolvable:$true] %s646_s14 }
  0xc4   : > { %4305 = dma.hbm_to_vmem [thread:$0]  (!%p6355_p7), %s5454_s26, 16, %s630_s22, %s5355_s27  }
  0xc5   : > { %s4728_s23 = scalar_lea.hbm %s5479_s3, 16  ;;  %s4733_s4 = scalar_lea.hbm %s6269_s9, 32 }
  0xc6   : > { %p4729_p5 = scmp.ne.s32.totalorder %s5479_s3, %s4728_s23  ;;  %p4734_p2 = scmp.lt.u32.totalorder %s5479_s3, %s6269_s9 }
  0xc7   : > { %p4735_p3 = scmp.lt.u32.totalorder %s4733_s4, %s4728_s23  ;;  %p4737_p10 = scmp.lt.u32.totalorder %s4728_s23, %s5479_s3 }
  0xc8   : > { %p4731_p11 = pnand %p4729_p5, %p5361_p13 }
  0xc9   : > { %p4736_p6 = por %p4735_p3, %p4734_p2 }
  0xca   : > { %p4732_p12 = pneg %p4731_p11 }
  0xcb   : > { %p4738_p8 = por %p4737_p10, %p4736_p6 }
  0xcd   : > { %p4739_p4 = pnand %p4738_p8, %p4732_p12 }
  0xcf   : > { %4742 = shalt.err (!%p4739_p4)
}
  0xd0   : > { %s4743_s15 = scalar_lea.vmem %s647_s14, 16  ;;  %s5124_s26 = smov [#allocation16]  }
  0xd1   : > { %p4744_p9 = scmp.ne.s32.totalorder %s647_s14, %s4743_s15  ;;  %s4748_s22 = sshll.u32 %s5124_s26, 4  ;;  %s4749_s22 = int_to_ptr.vmem [resolvable:$false] %s4748_s22 }
  0xd2   : > { %s4750_s18 = scalar_lea.vmem %s4749_s22, 32  ;;  %p4751_p5 = scmp.lt.s32.totalorder %s647_s14, %s4749_s22 }
  0xd3   : > { %p4746_p1 = pnand %p4744_p9, %p5361_p13  ;;  %p4752_p11 = scmp.lt.s32.totalorder %s4750_s18, %s4743_s15 }
  0xd5   : > { %p4747_p0 = pneg %p4746_p1  ;;  %p4753_p7 = por %p4752_p11, %p4751_p5 }
  0xd7   : > { %p4754_p2 = pnand %p4753_p7, %p4747_p0 }
  0xd9   : > { %4757 = shalt.err (!%p4754_p2)
}
  0xda   : > { %p6356_p3 = scmp.ne.s32.totalorder %s6339_s20, 0  ;;  %s657_s5 = scalar_lea.vmem [#allocation17], %s5332_s28 }
  0xdb   : > { %s664_s24 = sshll.u32 %s657_s5, 4  ;;  %s5531_s21 = scalar_lea.hbm %s6271_s11, %s5389_s30  ;;  %s5525_s24 = int_to_ptr.vmem [resolvable:$true] %s664_s24 }
  0xdc   : > { %4308 = dma.hbm_to_vmem [thread:$0]  (!%p6356_p3), %s5479_s3, 16, %s647_s14, %s5355_s27  }
  0xdd   : > { %s4758_s4 = scalar_lea.hbm %s5504_s29, 256  ;;  %s4763_s15 = scalar_lea.hbm %s6270_s10, 512 }
  0xde   : > { %p4759_p7 = scmp.ne.s32.totalorder %s5504_s29, %s4758_s4  ;;  %p4764_p10 = scmp.lt.u32.totalorder %s5504_s29, %s6270_s10 }
  0xdf   : > { %p4765_p8 = scmp.lt.u32.totalorder %s4763_s15, %s4758_s4  ;;  %p4767_p9 = scmp.lt.u32.totalorder %s4758_s4, %s5504_s29 }
  0xe0   : > { %p4761_p12 = pnand %p4759_p7, %p5361_p13 }
  0xe1   : > { %p4766_p4 = por %p4765_p8, %p4764_p10 }
  0xe2   : > { %p4762_p6 = pneg %p4761_p12 }
  0xe3   : > { %p4768_p1 = por %p4767_p9, %p4766_p4 }
  0xe5   : > { %p4769_p0 = pnand %p4768_p1, %p4762_p6 }
  0xe7   : > { %4772 = shalt.err (!%p4769_p0)
}
  0xe8   : > { %s4773_s28 = scalar_lea.vmem %s5525_s24, 256  ;;  %s5125_s14 = smov [#allocation17]  }
  0xe9   : > { %p4774_p5 = scmp.ne.s32.totalorder %s5525_s24, %s4773_s28  ;;  %s4778_s22 = sshll.u32 %s5125_s14, 4  ;;  %s4779_s22 = int_to_ptr.vmem [resolvable:$false] %s4778_s22 }
  0xea   : > { %s4780_s18 = scalar_lea.vmem %s4779_s22, 512  ;;  %p4781_p7 = scmp.lt.s32.totalorder %s5525_s24, %s4779_s22 }
  0xeb   : > { %p4776_p11 = pnand %p4774_p5, %p5361_p13  ;;  %p4782_p12 = scmp.lt.s32.totalorder %s4780_s18, %s4773_s28 }
  0xed   : > { %p4777_p2 = pneg %p4776_p11  ;;  %p4783_p10 = por %p4782_p12, %p4781_p7 }
  0xef   : > { %p4784_p8 = pnand %p4783_p10, %p4777_p2 }
  0xf1   : > { %4787 = shalt.err (!%p4784_p8)
}
  0xf2   : > { %4311 = dma.hbm_to_vmem [thread:$0]  (!%p6356_p3), %s5504_s29, 256, %s5525_s24, %s5355_s27, %s6350_s17, %s6350_s17, %s6349_s16  }
  0xf3   : > { %s677_s5 = scalar_lea.vmem [#allocation18], %s5296_s19  ;;  %s3828_s0 = sshll.u32 %s5296_s19, 5 }
  0xf4   : > { %s684_s23 = sshll.u32 %s677_s5, 4  ;;  %s4788_s4 = scalar_lea.hbm %s5531_s21, 16  ;;  %s685_s23 = int_to_ptr.vmem [resolvable:$true] %s684_s23 }
  0xf5   : > { %p4789_p6 = scmp.ne.s32.totalorder %s5531_s21, %s4788_s4  ;;  %s4793_s15 = scalar_lea.hbm %s6271_s11, 32 }
  0xf6   : > { %p4794_p1 = scmp.lt.u32.totalorder %s5531_s21, %s6271_s11  ;;  %p4795_p0 = scmp.lt.u32.totalorder %s4793_s15, %s4788_s4 }
  0xf7   : > { %p4791_p4 = pnand %p4789_p6, %p5361_p13  ;;  %p4797_p11 = scmp.lt.u32.totalorder %s4788_s4, %s5531_s21 }
  0xf8   : > { %p4796_p5 = por %p4795_p0, %p4794_p1 }
  0xf9   : > { %p4792_p9 = pneg %p4791_p4 }
  0xfa   : > { %p4798_p2 = por %p4797_p11, %p4796_p5 }
  0xfc   : > { %p4799_p7 = pnand %p4798_p2, %p4792_p9 }
  0xfe   : > { %4802 = shalt.err (!%p4799_p7)
}
  0xff   : > { %s4803_s29 = scalar_lea.vmem %s685_s23, 16  ;;  %s5126_s24 = smov [#allocation18]  }
 0x100   : > { %p4804_p12 = scmp.ne.s32.totalorder %s685_s23, %s4803_s29  ;;  %s4808_s28 = sshll.u32 %s5126_s24, 4  ;;  %s4809_s28 = int_to_ptr.vmem [resolvable:$false] %s4808_s28 }
 0x101   : > { %s4810_s14 = scalar_lea.vmem %s4809_s28, 32  ;;  %p4811_p6 = scmp.lt.s32.totalorder %s685_s23, %s4809_s28 }
 0x102   : > { %p4806_p10 = pnand %p4804_p12, %p5361_p13  ;;  %p4812_p4 = scmp.lt.s32.totalorder %s4810_s14, %s4803_s29 }
 0x104   : > { %p4807_p8 = pneg %p4806_p10  ;;  %p4813_p3 = por %p4812_p4, %p4811_p6 }
 0x106   : > { %p4814_p0 = pnand %p4813_p3, %p4807_p8 }
 0x108   : > { %4817 = shalt.err (!%p4814_p0)
}
 0x109   : > { %p6357_p1 = scmp.ne.s32.totalorder %s6339_s20, 0  ;;  %s3913_s22 = sshll.u32 %s5110_s25, 9 }
 0x10a   : > { %s695_s18 = scalar_lea.vmem [#allocation19], %s3828_s0  ;;  %s5584_s1 = scalar_lea.hbm %s6272_s12, %s3913_s22 }
 0x10b   : > { %4314 = dma.hbm_to_vmem [thread:$0]  (!%p6357_p1), %s5531_s21, 16, %s685_s23, %s5355_s27  }
 0x10c   : > { %s702_s5 = sshll.u32 %s695_s18, 4  ;;  %s4818_s15 = scalar_lea.hbm %s5584_s1, 512  ;;  %s5586_s5 = int_to_ptr.vmem [resolvable:$true] %s702_s5 }
 0x10d   : > { %p4819_p3 = scmp.ne.s32.totalorder %s5584_s1, %s4818_s15  ;;  %s4823_s0 = scalar_lea.hbm %s6272_s12, 1024 }
 0x10e   : > { %p4824_p11 = scmp.lt.u32.totalorder %s5584_s1, %s6272_s12  ;;  %p4825_p2 = scmp.lt.u32.totalorder %s4823_s0, %s4818_s15 }
 0x10f   : > { %p4821_p9 = pnand %p4819_p3, %p5361_p13  ;;  %p4827_p12 = scmp.lt.u32.totalorder %s4818_s15, %s5584_s1 }
 0x110   : > { %p4826_p7 = por %p4825_p2, %p4824_p11 }
 0x111   : > { %p4822_p5 = pneg %p4821_p9 }
 0x112   : > { %p4828_p10 = por %p4827_p12, %p4826_p7 }
 0x114   : > { %p4829_p8 = pnand %p4828_p10, %p4822_p5 }
 0x116   : > { %4832 = shalt.err (!%p4829_p8)
}
 0x117   : > { %s4833_s29 = scalar_lea.vmem %s5586_s5, 512  ;;  %s5127_s24 = smov [#allocation19]  }
 0x118   : > { %p4834_p6 = scmp.ne.s32.totalorder %s5586_s5, %s4833_s29  ;;  %s4838_s28 = sshll.u32 %s5127_s24, 4  ;;  %s4839_s28 = int_to_ptr.vmem [resolvable:$false] %s4838_s28 }
 0x119   : > { %s4840_s14 = scalar_lea.vmem %s4839_s28, 1024  ;;  %p4841_p3 = scmp.lt.s32.totalorder %s5586_s5, %s4839_s28 }
 0x11a   : > { %p4836_p4 = pnand %p4834_p6, %p5361_p13  ;;  %p4842_p9 = scmp.lt.s32.totalorder %s4840_s14, %s4833_s29 }
 0x11c   : > { %p4837_p0 = pneg %p4836_p4  ;;  %p4843_p11 = por %p4842_p9, %p4841_p3 }
 0x11e   : > { %p4844_p2 = pnand %p4843_p11, %p4837_p0 }
 0x120   : > { %4847 = shalt.err (!%p4844_p2)
}
 0x121   : > { %4317 = dma.hbm_to_vmem [thread:$0]  (!%p6357_p1), %s5584_s1, 512, %s5586_s5, %s5355_s27, %s6350_s17, %s6350_s17, %s6349_s16  }
 0x122   : > { %s5617_s4 = scalar_lea.hbm %s6273_s13, %s5389_s30  ;;  %s715_s6 = scalar_lea.vmem [#allocation20], %s5296_s19 }
 0x123   : > { %s722_s15 = sshll.u32 %s715_s6, 4  ;;  %s5128_s21 = smov [#allocation6]   ;;  %s5620_s15 = int_to_ptr.vmem [resolvable:$true] %s722_s15 }
 0x124   : > { %s510_s23 = sshll.u32 %s5128_s21, 4  ;;  %s4848_s0 = scalar_lea.hbm %s5617_s4, 16  ;;  %s511_s23 = int_to_ptr.vmem [resolvable:$true] %s510_s23 }
 0x125   : > { %p4849_p5 = scmp.ne.s32.totalorder %s5617_s4, %s4848_s0  ;;  %s4853_s5 = scalar_lea.hbm %s6273_s13, 32 }
 0x126   : > { %p4854_p10 = scmp.lt.u32.totalorder %s5617_s4, %s6273_s13  ;;  %p4855_p8 = scmp.lt.u32.totalorder %s4853_s5, %s4848_s0 }
 0x127   : > { %p4851_p7 = pnand %p4849_p5, %p5361_p13  ;;  %p4857_p4 = scmp.lt.u32.totalorder %s4848_s0, %s5617_s4 }
 0x128   : > { %p4856_p6 = por %p4855_p8, %p4854_p10 }
 0x129   : > { %p4852_p12 = pneg %p4851_p7 }
 0x12a   : > { %p4858_p0 = por %p4857_p4, %p4856_p6 }
 0x12c   : > { %p4859_p3 = pnand %p4858_p0, %p4852_p12 }
 0x12e   : > { %4862 = shalt.err (!%p4859_p3)
}
 0x12f   : > { %s4863_s3 = scalar_lea.vmem %s5620_s15, 16  ;;  %s5129_s29 = smov [#allocation20]  }
 0x130   : > { %p4864_p9 = scmp.ne.s32.totalorder %s5620_s15, %s4863_s3  ;;  %s4868_s24 = sshll.u32 %s5129_s29, 4  ;;  %s4869_s24 = int_to_ptr.vmem [resolvable:$false] %s4868_s24 }
 0x131   : > { %s4870_s28 = scalar_lea.vmem %s4869_s24, 32  ;;  %p4871_p5 = scmp.lt.s32.totalorder %s5620_s15, %s4869_s24 }
 0x132   : > { %p4866_p11 = pnand %p4864_p9, %p5361_p13  ;;  %p4872_p7 = scmp.lt.s32.totalorder %s4870_s28, %s4863_s3 }
 0x134   : > { %p4867_p2 = pneg %p4866_p11  ;;  %p4873_p10 = por %p4872_p7, %p4871_p5 }
 0x136   : > { %p4874_p8 = pnand %p4873_p10, %p4867_p2 }
 0x138   : > { %4877 = shalt.err (!%p4874_p8)
}
 0x139   : > { %s6358_s14 = sld [smem:[#allocation37_spill]]  ;;  %s6359_s6 = sld [smem:[#allocation41_spill]] }
 0x13a   : > { %4320 = dma.hbm_to_vmem [thread:$0]  (!%p6357_p1), %s5617_s4, 16, %s5620_s15, %s5355_s27  }
 0x13f   : > { %s4878_s21 = scalar_lea.hbm %s6359_s6, 64  ;;  %p6360_p6 = scmp.ne.s32.totalorder %s6358_s14, 0 }
 0x140   : > { %p4879_p12 = scmp.ne.s32.totalorder %s6359_s6, %s4878_s21  ;;  %p4885_p3 = scmp.lt.u32.totalorder %s4878_s21, %s6359_s6 }
 0x142   : > { %p4881_p4 = pnand %p4879_p12, %p6360_p6 }
 0x144   : > { %p4882_p0 = pneg %p4881_p4 }
 0x146   : > { %p4887_p9 = pnand %p4885_p3, %p4882_p0 }
 0x148   : > { %4890 = shalt.err (!%p4887_p9)
}
 0x149   : > { %s4891_s1 = scalar_lea.vmem %s511_s23, 64  ;;  %p4899_p7 = scmp.lt.s32.totalorder %s511_s23, %s511_s23 }
 0x14a   : > { %p4892_p11 = scmp.ne.s32.totalorder %s511_s23, %s4891_s1  ;;  %p4900_p10 = scmp.lt.s32.totalorder %s4891_s1, %s4891_s1 }
 0x14c   : > { %p4894_p2 = pnand %p4892_p11, %p6360_p6  ;;  %p4901_p8 = por %p4900_p10, %p4899_p7 }
 0x14e   : > { %p4895_p5 = pneg %p4894_p2 }
 0x150   : > { %p4902_p1 = pnand %p4901_p8, %p4895_p5 }
 0x152   : > { %4905 = shalt.err (!%p4902_p1)
}
 0x153   : > { %s6361_s4 = sld [smem:[#allocation36_spill]]  ;;  %s6363_s24 = sld [smem:[#allocation47_spill]] }
 0x154   : > { %s732_s18 = scalar_lea.vmem [#allocation21], %s5296_s19 }
 0x155   : > { %s739_s21 = sshll.u32 %s732_s18, 4  ;;  %s740_s21 = int_to_ptr.vmem [resolvable:$true] %s739_s21 }
 0x159   : > { %p6362_p12 = scmp.ne.s32.totalorder %s6361_s4, 0  ;;  %s6364_s28 = smov %s6363_s24 }
 0x15a   : > { %s5666_s22 = scalar_lea.hbm %s6363_s24, %s5389_s30 }
 0x15b   : > { %4283 = dma.hbm_to_vmem [thread:$0]  (!%p6362_p12), %s6359_s6, 64, %s511_s23, [#allocation7]  }
 0x15c   : > { %s4906_s0 = scalar_lea.hbm %s5666_s22, 16  ;;  %s4911_s23 = scalar_lea.hbm %s6364_s28, 32 }
 0x15d   : > { %p4907_p1 = scmp.ne.s32.totalorder %s5666_s22, %s4906_s0  ;;  %p4912_p3 = scmp.lt.u32.totalorder %s5666_s22, %s6364_s28 }
 0x15e   : > { %p4913_p9 = scmp.lt.u32.totalorder %s4911_s23, %s4906_s0  ;;  %p4915_p2 = scmp.lt.u32.totalorder %s4906_s0, %s5666_s22 }
 0x15f   : > { %p4909_p4 = pnand %p4907_p1, %p5361_p13 }
 0x160   : > { %p4914_p11 = por %p4913_p9, %p4912_p3 }
 0x161   : > { %p4910_p0 = pneg %p4909_p4 }
 0x162   : > { %p4916_p5 = por %p4915_p2, %p4914_p11 }
 0x164   : > { %p4917_p7 = pnand %p4916_p5, %p4910_p0 }
 0x166   : > { %4920 = shalt.err (!%p4917_p7)
}
 0x167   : > { %s4921_s15 = scalar_lea.vmem %s740_s21, 16  ;;  %s5130_s26 = smov [#allocation21]  }
 0x168   : > { %p4922_p10 = scmp.ne.s32.totalorder %s740_s21, %s4921_s15  ;;  %s4926_s3 = sshll.u32 %s5130_s26, 4  ;;  %s4927_s3 = int_to_ptr.vmem [resolvable:$false] %s4926_s3 }
 0x169   : > { %s4928_s29 = scalar_lea.vmem %s4927_s3, 32  ;;  %p4929_p4 = scmp.lt.s32.totalorder %s740_s21, %s4927_s3 }
 0x16a   : > { %p4924_p8 = pnand %p4922_p10, %p5361_p13  ;;  %p4930_p12 = scmp.lt.s32.totalorder %s4928_s29, %s4921_s15 }
 0x16c   : > { %p4925_p1 = pneg %p4924_p8  ;;  %p4931_p6 = por %p4930_p12, %p4929_p4 }
 0x16e   : > { %p4932_p3 = pnand %p4931_p6, %p4925_p1 }
 0x170   : > { %4935 = shalt.err (!%p4932_p3)
}
 0x171   : > { %p6365_p9 = scmp.ne.s32.totalorder %s6339_s20, 0  ;;  %s5131_s24 = smov [#allocation8]  }
 0x172   : > { %s521_s18 = sshll.u32 %s5131_s24, 4  ;;  %s5132_s0 = smov [#allocation9]   ;;  %s522_s18 = int_to_ptr.vmem [resolvable:$true] %s521_s18 }
 0x173   : > { %4323 = dma.hbm_to_vmem [thread:$0]  (!%p6365_p9), %s5666_s22, 16, %s740_s21, %s5355_s27  }
 0x174   : > { %s532_s16 = sshll.u32 %s5132_s0, 4  ;;  %s6366_s5 = sld [smem:[#allocation42_spill]]  ;;  %s533_s16 = int_to_ptr.vmem [resolvable:$true] %s532_s16 }
 0x175   : > { %p6367_p12 = scmp.ne.s32.totalorder %s6358_s14, 0 }
 0x17a   : > { %s4936_s1 = scalar_lea.hbm %s6366_s5, 16 }
 0x17b   : > { %p4937_p6 = scmp.ne.s32.totalorder %s6366_s5, %s4936_s1  ;;  %p4943_p2 = scmp.lt.u32.totalorder %s4936_s1, %s6366_s5 }
 0x17d   : > { %p4939_p0 = pnand %p4937_p6, %p6367_p12 }
 0x17f   : > { %p4940_p11 = pneg %p4939_p0 }
 0x181   : > { %p4945_p5 = pnand %p4943_p2, %p4940_p11 }
 0x183   : > { %4948 = shalt.err (!%p4945_p5)
}
 0x184   : > { %s4949_s22 = scalar_lea.vmem %s522_s18, 16  ;;  %s4956_s21 = scalar_lea.vmem %s522_s18, 32 }
 0x185   : > { %p4950_p7 = scmp.ne.s32.totalorder %s522_s18, %s4949_s22  ;;  %p4957_p1 = scmp.lt.s32.totalorder %s522_s18, %s522_s18 }
 0x186   : > { %p4958_p4 = scmp.lt.s32.totalorder %s4956_s21, %s4949_s22 }
 0x187   : > { %p4952_p10 = pnand %p4950_p7, %p6367_p12 }
 0x188   : > { %p4959_p3 = por %p4958_p4, %p4957_p1 }
 0x189   : > { %p4953_p8 = pneg %p4952_p10 }
 0x18b   : > { %p4960_p9 = pnand %p4959_p3, %p4953_p8 }
 0x18d   : > { %4963 = shalt.err (!%p4960_p9)
}
 0x18e   : > { %p6368_p6 = scmp.ne.s32.totalorder %s6361_s4, 0  ;;  %s6369_s1 = sld [smem:[#allocation43_spill]] }
 0x190   : > { %4286 = dma.hbm_to_vmem [thread:$0]  (!%p6368_p6), %s6366_s5, 16, %s522_s18, [#allocation7]  }
 0x194   : > { %s4964_s26 = scalar_lea.hbm %s6369_s1, 16 }
 0x195   : > { %p4965_p0 = scmp.ne.s32.totalorder %s6369_s1, %s4964_s26  ;;  %p4971_p9 = scmp.lt.u32.totalorder %s4964_s26, %s6369_s1 }
 0x197   : > { %p4967_p11 = pnand %p4965_p0, %p6367_p12 }
 0x199   : > { %p4968_p2 = pneg %p4967_p11 }
 0x19b   : > { %p4973_p5 = pnand %p4971_p9, %p4968_p2 }
 0x19d   : > { %4976 = shalt.err (!%p4973_p5)
}
 0x19e   : > { %s4977_s21 = scalar_lea.vmem %s533_s16, 16  ;;  %s4984_s18 = scalar_lea.vmem %s533_s16, 32 }
 0x19f   : > { %p4978_p7 = scmp.ne.s32.totalorder %s533_s16, %s4977_s21  ;;  %p4985_p1 = scmp.lt.s32.totalorder %s533_s16, %s533_s16 }
 0x1a0   : > { %p4986_p4 = scmp.lt.s32.totalorder %s4984_s18, %s4977_s21 }
 0x1a1   : > { %p4980_p10 = pnand %p4978_p7, %p6367_p12 }
 0x1a2   : > { %p4987_p3 = por %p4986_p4, %p4985_p1 }
 0x1a3   : > { %p4981_p8 = pneg %p4980_p10 }
 0x1a5   : > { %p4988_p13 = pnand %p4987_p3, %p4981_p8 }
 0x1a7   : > { %4991 = shalt.err (!%p4988_p13)
}
 0x1a8   : > { %4289 = dma.hbm_to_vmem [thread:$0]  (!%p6368_p6), %s6369_s1, 16, %s533_s16, [#allocation10]  }
 0x1a9   : > { %s6370_s14 = sld [smem:[#allocation48_spill]]  ;;  %s749_s15 = scalar_lea.vmem [#allocation22], %s5296_s19 }
 0x1aa   : > { %s756_s3 = sshll.u32 %s749_s15, 4  ;;  %p6371_p12 = scmp.ne.s32.totalorder %s6348_s2, 0  ;;  %s757_s3 = int_to_ptr.vmem [resolvable:$true] %s756_s3 }
 0x1af   : > { %s5727_s26 = scalar_lea.hbm %s6370_s14, %s5389_s30  ;;  %s4997_s16 = scalar_lea.hbm %s6370_s14, 32 }
 0x1b0   : > { %s4992_s4 = scalar_lea.hbm %s5727_s26, 16  ;;  %p4998_p6 = scmp.lt.u32.totalorder %s5727_s26, %s6370_s14 }
 0x1b1   : > { %p4993_p13 = scmp.ne.s32.totalorder %s5727_s26, %s4992_s4  ;;  %p4999_p2 = scmp.lt.u32.totalorder %s4997_s16, %s4992_s4 }
 0x1b2   : > { %p5001_p5 = scmp.lt.u32.totalorder %s4992_s4, %s5727_s26 }
 0x1b3   : > { %p4995_p0 = pnand %p4993_p13, %p6371_p12  ;;  %p5000_p9 = por %p4999_p2, %p4998_p6 }
 0x1b5   : > { %p4996_p11 = pneg %p4995_p0  ;;  %p5002_p7 = por %p5001_p5, %p5000_p9 }
 0x1b7   : > { %p5003_p10 = pnand %p5002_p7, %p4996_p11 }
 0x1b9   : > { %5006 = shalt.err (!%p5003_p10)
}
 0x1ba   : > { %s5007_s19 = scalar_lea.vmem %s757_s3, 16  ;;  %s5133_s30 = smov [#allocation22]  }
 0x1bb   : > { %p5008_p8 = scmp.ne.s32.totalorder %s757_s3, %s5007_s19  ;;  %s5012_s24 = sshll.u32 %s5133_s30, 4  ;;  %s5013_s24 = int_to_ptr.vmem [resolvable:$false] %s5012_s24 }
 0x1bc   : > { %s5014_s0 = scalar_lea.vmem %s5013_s24, 32  ;;  %p5015_p3 = scmp.lt.s32.totalorder %s757_s3, %s5013_s24 }
 0x1bd   : > { %p5010_p1 = pnand %p5008_p8, %p6371_p12  ;;  %p5016_p13 = scmp.lt.s32.totalorder %s5014_s0, %s5007_s19 }
 0x1bf   : > { %p5011_p4 = pneg %p5010_p1  ;;  %p5017_p0 = por %p5016_p13, %p5015_p3 }
 0x1c1   : > { %p5018_p2 = pnand %p5017_p0, %p5011_p4 }
 0x1c3   : > { %5021 = shalt.err (!%p5018_p2)
}
 0x1c4   : > { %p6372_p6 = scmp.ne.s32.totalorder %s6339_s20, 0  ;;  %s6373_s17 = sld [smem:[#allocation35_spill]] }
 0x1c6   : > { %4326 = dma.hbm_to_vmem [thread:$0]  (!%p6372_p6), %s5727_s26, 16, %s757_s3, %s5355_s27  }
 0x1ca   : > { %p6374_p11 = scmp.ne.s32.totalorder %s6373_s17, 0 }
 0x1cb   : > { %s6375_s2 = sld [smem:[#allocation33_spill]] (!%p6374_p11) }
 0x1cc   : > { %765 = sbr.rel (%p6374_p11) target bundleno = 5197 (0x144d), region = 84 }
 0x1d1   : > { %p6376_p12 = scmp.eq.s32.totalorder (!%p6374_p11), %s6375_s2, 0 }
 0x1d3   : > { %5073 = dma.done.wait (%p6376_p12), [#allocation4], 256   ;;  %p6377_p9 = pmov %p6376_p12 }
 0x1d5   : > { %5075 = vsyncadd (%p6377_p9), [#allocation4], 4294967040  ;;  %p6378_p5 = pmov %p6377_p9 }
 0x1d7   : > { %5077 = dma.done.wait (%p6378_p5), [#allocation7], 80   ;;  %p6379_p7 = pmov %p6378_p5 }
 0x1d8   : > { %p6380_p10 = pmov %p6378_p5 }
 0x1d9   : > { %5079 = vsyncadd (%p6379_p7), [#allocation7], 4294967216 }
 0x1da   : > { %5081 = dma.done.wait (%p6380_p10), [#allocation10], 16   ;;  %p6381_p8 = pmov %p6378_p5 }
 0x1db   : > { %s6382_s20 = sld [smem:[#allocation29_spill]]  ;;  %s6383_s27 = sld [smem:[#allocation34_spill]] }
 0x1dc   : > { %5083 = vsyncadd (%p6381_p8), [#allocation10], 4294967280  ;;  %s783_s23 = sand.u32 1, %s6375_s2  }
 0x1dd   : > { %s784_s3 = scalar_lea.sflag [#allocation4], %s783_s23 }
 0x1e1   : > { %s5764_s26 = sand.u32 1, %s6382_s20   ;;  %p6384_p1 = scmp.ne.s32.totalorder %s6383_s27, 0 }
 0x1e2   : > { %s5767_s15 = sshll.u32 %s5764_s26, 4 }
 0x1e3   : > { %s787_s4 = scalar_lea.vmem [#allocation11], %s5767_s15 }
 0x1e4   : > { %5085 = dma.done.wait (%p6384_p1), %s784_s3, 1408  }
 0x1e5   : > { %5087 = vsyncadd (%p6384_p1), %s784_s3, 4294965888  ;;  %s3842_s29 = sshll.u32 %s5764_s26, 5  ;;  %s795_s22 = scalar_lea.vmem [#allocation12], %s5764_s26 }
 0x1e6   : > { %s804_s16 = scalar_lea.vmem [#allocation13], %s5767_s15  ;;  %s812_s21 = scalar_lea.vmem [#allocation14], %s5764_s26 }
 0x1e7   : > { %s820_s18 = scalar_lea.vmem [#allocation15], %s5764_s26  ;;  %s828_s19 = scalar_lea.vmem [#allocation16], %s5764_s26 }
 0x1e8   : > { %s837_s30 = scalar_lea.vmem [#allocation17], %s5767_s15  ;;  %s845_s24 = scalar_lea.vmem [#allocation18], %s5764_s26 }
 0x1e9   : > { %s5782_s0 = scalar_lea.vmem [#allocation19], %s3842_s29  ;;  %s862_s17 = scalar_lea.vmem [#allocation20], %s5764_s26 }
 0x1ea   : > { %s870_s2 = scalar_lea.vmem [#allocation21], %s5764_s26  ;;  %s878_s20 = scalar_lea.vmem [#allocation22], %s5764_s26 }
 0x1eb   : > { %s6385_s27 = sld [smem:[#allocation31_spill]] }
 0x1f1   : > { %p3843_p4 = scmp.ne.s32.totalorder %s6385_s27, 0 }
 0x1f2   : > { %v3915_v0 = vld [vmem:[#allocation3] sm:$0xff] (!%p3843_p4)   ;;  %vm985_vm0 = vcmask (!%p3843_p4), 261120   ;;  %v3922_v1 = vld [vmem:[#allocation3 + $0x8] sm:$0xff] (!%p3843_p4)   ;;  %v3844_v43 = vld [vmem:[#allocation8] ss:$0 sm:$0xff] (!%p3843_p4) }
 0x1f3   : > { %974 = sbr.rel (%p3843_p4) target bundleno = 823 (0x337), region = 152  ;;  %v3916_v2 = vunpack.c.l.bf16 (!%p3843_p4), %v3915_v0  ;;  %v3920_v3 = vunpack.c.l.bf16 (!%p3843_p4), %v3922_v1  ;;  %v3917_v4 = vunpack.c.h.bf16 (!%p3843_p4), %v3915_v0  ;;  %v3921_v5 = vunpack.c.h.bf16 (!%p3843_p4), %v3922_v1  ;;  %v3845_v45 = vld [vmem:[#allocation9] ss:$0 sm:$0xff] (!%p3843_p4) }
 0x1f5   : > { %v986_v6 = vsel (!%p3843_p4), %vm985_vm0, %v3916_v2, 0.0  ;;  %v992_v7 = vsel (!%p3843_p4), %vm985_vm0, %v3920_v3, 0.0  ;;  %v989_v8 = vsel (!%p3843_p4), %vm985_vm0, %v3917_v4, 0.0  ;;  %v995_v9 = vsel (!%p3843_p4), %vm985_vm0, %v3921_v5, 0.0 }
 0x1f6   : > { %987 = vadd.xlane.f32.xlu0 (!%p3843_p4), %v986_v6  ;;  %993 = vadd.xlane.f32.xlu1 (!%p3843_p4), %v992_v7 }
 0x1fa   : > { %990 = vadd.xlane.f32.xlu0 %v989_v8  ;;  %996 = vadd.xlane.f32.xlu1 %v995_v9 }
 0x283   : > { %v988_v10 = vpop.xlane.xlu0 %987  ;;  %v994_v11 = vpop.xlane.xlu1 %993 }
 0x284   : > { %v999_v12 = vmul.f32 0.03125, %v988_v10  ;;  %v1001_v13 = vmul.f32 0.03125, %v994_v11 }
 0x286   : > { %v1003_v14 = vsub.f32 %v3916_v2, %v999_v12  ;;  %v1005_v15 = vsub.f32 %v3920_v3, %v1001_v13 }
 0x287   : > { %v991_v16 = vpop.xlane.xlu0 %990  ;;  %v997_v17 = vpop.xlane.xlu1 %996 }
 0x288   : > { %v1000_v18 = vmul.f32 0.03125, %v991_v16  ;;  %v1002_v19 = vmul.f32 0.03125, %v997_v17  ;;  %v1007_v20 = vmul.f32 %v1003_v14, %v1003_v14  ;;  %v1009_v21 = vmul.f32 %v1005_v15, %v1005_v15 }
 0x28a   : > { %v1004_v22 = vsub.f32 %v3917_v4, %v1000_v18  ;;  %v1006_v23 = vsub.f32 %v3921_v5, %v1002_v19  ;;  %v1011_v24 = vsel %vm985_vm0, %v1007_v20, 0.0  ;;  %v1017_v25 = vsel %vm985_vm0, %v1009_v21, 0.0 }
 0x28b   : > { %1012 = vadd.xlane.f32.xlu0 %v1011_v24 }
 0x28c   : > { %v1008_v26 = vmul.f32 %v1004_v22, %v1004_v22  ;;  %v1010_v27 = vmul.f32 %v1006_v23, %v1006_v23 }
 0x28e   : > { %v1014_v28 = vsel %vm985_vm0, %v1008_v26, 0.0  ;;  %v1020_v29 = vsel %vm985_vm0, %v1010_v27, 0.0 }
 0x28f   : > { %1018 = vadd.xlane.f32.xlu0 %v1017_v25  ;;  %1015 = vadd.xlane.f32.xlu1 %v1014_v28 }
 0x293   : > { %1021 = vadd.xlane.f32.xlu1 %v1020_v29 }
 0x318   : > { %v1013_v30 = vpop.xlane.xlu0 %1012 }
 0x319   : > { %v1023_v31 = vmul.f32 0.03125, %v1013_v30 }
 0x31b   : > { %v1027_v32 = vadd.f32 1e-12, %v1023_v31 }
 0x31c   : > { %v1016_v33 = vpop.xlane.xlu1 %1015  ;;  %v1019_v34 = vpop.xlane.xlu0 %1018 }
 0x31d   : > { %4410 = vrsqrt.f32 %v1027_v32  ;;  %v1024_v35 = vmul.f32 0.03125, %v1016_v33  ;;  %v1025_v36 = vmul.f32 0.03125, %v1019_v34 }
 0x31f   : > { %v1028_v37 = vadd.f32 1e-12, %v1024_v35  ;;  %v1029_v38 = vadd.f32 1e-12, %v1025_v36 }
 0x320   : > { %v1022_v39 = vpop.xlane.xlu1 %1021 }
 0x321   : > { %4412 = vrsqrt.f32 %v1028_v37  ;;  %v1026_v40 = vmul.f32 0.03125, %v1022_v39 }
 0x322   : > { %4414 = vrsqrt.f32 %v1029_v38 }
 0x323   : > { %v1030_v41 = vadd.f32 1e-12, %v1026_v40 }
 0x325   : > { %4416 = vrsqrt.f32 %v1030_v41 }
 0x327   : > { %v4411_v42 = vpop.eup %4410 }
 0x328   : > { %v1035_v44 = vmul.f32 %v4411_v42, %v1003_v14 }
 0x32a   : > { %v1045_v46 = vmul.f32 %v3844_v43, %v1035_v44 }
 0x32b   : > { %v4413_v47 = vpop.eup %4412 }
 0x32c   : > { %v4415_v48 = vpop.eup %4414  ;;  %v1055_v49 = vadd.f32 %v3845_v45, %v1045_v46  ;;  %v1036_v50 = vmul.f32 %v4413_v47, %v1004_v22 }
 0x32d   : > { %v1037_v51 = vmul.f32 %v4415_v48, %v1005_v15 }
 0x32e   : > { %1059 = vst.msk [vmem:[#allocation2] sm:$0xff] %vm985_vm0, %v1055_v49  ;;  %v1046_v52 = vmul.f32 %v3844_v43, %v1036_v50 }
 0x32f   : > { %v4417_v53 = vpop.eup %4416  ;;  %v1047_v54 = vmul.f32 %v3844_v43, %v1037_v51 }
 0x330   : > { %v1056_v55 = vadd.f32 %v3845_v45, %v1046_v52  ;;  %v1038_v56 = vmul.f32 %v4417_v53, %v1006_v23 }
 0x331   : > { %v1057_v57 = vadd.f32 %v3845_v45, %v1047_v54 }
 0x332   : > { %1060 = vst.msk [vmem:[#allocation2 + $0x8] sm:$0xff] %vm985_vm0, %v1056_v55  ;;  %v1048_v58 = vmul.f32 %v3844_v43, %v1038_v56 }
 0x333   : > { %1061 = vst.msk [vmem:[#allocation2 + $0x10] sm:$0xff] %vm985_vm0, %v1057_v57 }
 0x334   : > { %v1058_v59 = vadd.f32 %v3845_v45, %v1048_v58 }
 0x336   : > { %1062 = vst.msk [vmem:[#allocation2 + $0x18] sm:$0xff] %vm985_vm0, %v1058_v59 }
 0x337 PF: > { %v4448_v60 = vld [vmem:[%s787_s4] sm:$0xff]   ;;  %v4449_v61 = vld [vmem:[%s787_s4 + $0x8] sm:$0xff]   ;;  %vm1092_vm1 = vcmask 261120   ;;  %v5134_v4 = vmov 0.0   ;;  %vm5135_vm2 = vmmov 0   ;;  %s5136_s23 = smov 96   ;;  %v1161_v36 = vlaneseq }
 0x338   : > { %4005 = vmatprep.subr.bf16.mxu0 %v4448_v60  ;;  %v1063_v62 = vld [vmem:[#allocation2] sm:$0xff]  ;;  %4013 = vmatprep.subr.bf16.mxu1 %v5134_v4  ;;  %vm1209_vm3 = vcmask 64512   ;;  %v5137_v34 = vmov 1966171168   ;;  %s5138_s3 = smov 64   ;;  %vm1456_vm4 = vcmask 1043456  }
 0x339   : > { %v1064_v63 = vld [vmem:[#allocation2 + $0x8] sm:$0xff]  ;;  %4006 = vmatpush3.bf16.msra.mxu0 %v4448_v60  ;;  %v3846_v5 = vld [vmem:[%s795_s22] ss:$0 sm:$0xff]  ;;  %4015 = vmatprep.mubr.msk.bf16.mxu1 %vm5135_vm2, %v5134_v4  ;;  %v1159_v35 = vunpack.c.l.s4 %v5137_v34  ;;  %v1162_v38 = vshrl.u32 %v1161_v36, 7  ;;  %s5139_s4 = smov 88   ;;  %s5140_s29 = smov 120  }
 0x33a   : > { %v1065_v0 = vld [vmem:[#allocation2 + $0x10] sm:$0xff]  ;;  %v1067_v1 = vpack.c.bf16 %v1064_v63, %v1063_v62  ;;  %4007 = vmatprep.subr.bf16.mxu0 %v4449_v61  ;;  %s5141_s22 = smov 56   ;;  %s5142_s27 = smov 80   ;;  %vm3020_vm5 = vcmask 130048   ;;  %vm3025_vm6 = vcmask 195584   ;;  %vm3354_vm7 = vcmask 523264  }
 0x33b   : > { %v1160_v37 = vunpack.c.0.s8 %v1159_v35  ;;  %v3851_v40 = vld.sshfl [vmem:[#allocation6] sm:$0x33 pattern:$0x75316420]  ;;  %v1188_v42 = vsub.s32 0, %v1162_v38  ;;  %s6386_s26 = sld [smem:[#allocation31_spill]] }
 0x33c   : > { %4009 = vmatprep.mubr.msk.bf16.mxu0 %vm1092_vm1, %v1067_v1  ;;  %v1157_v43 = vcombine.high %v3851_v40, %v3851_v40 }
 0x33d   : > { %v1066_v2 = vld [vmem:[#allocation2 + $0x18] sm:$0xff]  ;;  %4008 = vmatpush3.bf16.msra.mxu0 %v4449_v61  ;;  %v1163_v39 = vsub.s32 %v1160_v37, %v1162_v38 }
 0x33e   : > { %v1068_v3 = vpack.c.bf16 %v1066_v2, %v1065_v0  ;;  %4019 = vmatprep.subr.bf16.mxu0 %v5134_v4 }
 0x33f   : > { %v1164_v41 = vrot.slane %v3851_v40, %v1163_v39  ;;  %v1171_v45 = vrot.slane %v1157_v43, %v1163_v39 }
 0x340   : > { %4010 = vmatmul.mubr.msk.bf16.vlgmr.msra.gmra.mrb[0].mxu0 %vm1092_vm1, %v1068_v3 }
 0x341   : > { %4021 = vmatprep.mubr.msk.bf16.mxu0 %vm5135_vm2, %v5134_v4  ;;  %v5858_v44 = vrot.slane %v1164_v41, %v1188_v42  ;;  %v5861_v49 = vrot.slane %v1171_v45, %v1188_v42  ;;  %v1172_v50 = vcombine.high %v1164_v41, %v1164_v41  ;;  %v1173_v58 = vcombine.high %v1171_v45, %v1171_v45  ;;  %p3905_p3 = scmp.ne.s32.totalorder %s6386_s26, 1 }
 0x342   : > { %vm3497_vm8 = vcmask (!%p3905_p3), 257024  }
 0x343   : > { %v5865_v57 = vrot.slane %v1172_v50, %v1188_v42  ;;  %v5869_v1 = vrot.slane %v1173_v58, %v1188_v42 }
 0x413   : > { %v4011_v6 = vpop.f32.mrb[0].mxu0 }
 0x414   : > { %v1142_v7 = vadd.f32 %v4011_v6, %v3846_v5  ;;  %v1133_v8 = vpop.f32.mrb[1].mxu0 }
 0x415   : > { %v1134_v9 = vadd.f32 %v3846_v5, %v1133_v8  ;;  %v4012_v10 = vpop.f32.mrb[2].mxu0 }
 0x416   : > { %v5814_v11 = vpack.c.bf16 %v1142_v7, %v1142_v7  ;;  %v1145_v12 = vadd.f32 %v4012_v10, %v3846_v5  ;;  %v1136_v13 = vpop.f32.mrb[3].mxu0  ;;  %v1176_v28 = vmul.f32 0.35355338, %v1142_v7 }
 0x417   : > { %v5816_v14 = vpack.c.bf16 %v1134_v9, %v1134_v9  ;;  %v1137_v15 = vadd.f32 %v3846_v5, %v1136_v13  ;;  %v1174_v20 = vmul.f32 0.35355338, %v1134_v9 }
 0x418   : > { %1306 = vrot.lane.b32.xlu1 %v5814_v11, %s5136_s23  ;;  %v5820_v16 = vpack.c.bf16 %v1145_v12, %v1145_v12  ;;  %v5845_v31 = vpack.c.bf16 %v1176_v28, %v1176_v28  ;;  %v1177_v32 = vmul.f32 0.35355338, %v1145_v12 }
 0x419   : > { %1207 = vrot.lane.b32.xlu0 %v5816_v14, %s5136_s23  ;;  %v5822_v17 = vpack.c.bf16 %v1137_v15, %v1137_v15  ;;  %v5829_v24 = vpack.c.bf16 %v1174_v20, %v1174_v20  ;;  %v1175_v25 = vmul.f32 0.35355338, %v1137_v15 }
 0x41a   : > { %v5852_v33 = vpack.c.bf16 %v1177_v32, %v1177_v32 }
 0x41b   : > { %v5837_v29 = vpack.c.bf16 %v1175_v25, %v1175_v25 }
 0x41c   : > { %1355 = vrot.lane.b32.xlu1 %v5820_v16, %s5136_s23 }
 0x41d   : > { %1257 = vrot.lane.b32.xlu0 %v5822_v17, %s5136_s23  ;;  %s5143_s23 = smov 112  }
 0x48a   : > { %v1307_v21 = vpop.permute.xlu1 %1306 }
 0x48b   : > { %v1208_v18 = vpop.permute.xlu0 %1207  ;;  %v1312_v26 = vsel %vm1209_vm3, %v1307_v21, 0 }
 0x48c   : > { %v1214_v19 = vsel %vm1209_vm3, %v1208_v18, 0 }
 0x48d   : > { %4014 = vmatpush3.bf16.xpose.msra.mxu1 %v1214_v19 }
 0x48e   : > { %4025 = vmatprep.subr.bf16.mxu1 %v5134_v4  ;;  %v1356_v27 = vpop.permute.xlu1 %1355 }
 0x48f   : > { %v1258_v22 = vpop.permute.xlu0 %1257  ;;  %v1361_v30 = vsel %vm1209_vm3, %v1356_v27, 0 }
 0x490   : > { %v1263_v23 = vsel %vm1209_vm3, %v1258_v22, 0 }
 0x491   : > { %4020 = vmatpush3.bf16.xpose.msra.mxu0 %v1263_v23 }
 0x492   : > { %4031 = vmatprep.subr.bf16.mxu0 %v5134_v4 }
 0x494   : > { %4016 = vmatmul.mubr.msk.bf16.vlgmr.msra.gmra.mrb[0].mxu1 %vm1209_vm3, %v5829_v24 }
 0x495   : > { %4026 = vmatpush3.bf16.xpose.msra.mxu1 %v1312_v26  ;;  %4027 = vmatprep.mubr.msk.bf16.mxu1 %vm5135_vm2, %v5134_v4 }
 0x496   : > { %4037 = vmatprep.subr.bf16.mxu1 %v5134_v4 }
 0x498   : > { %4022 = vmatmul.mubr.msk.bf16.vlgmr.msra.gmra.mrb[4].mxu0 %vm1209_vm3, %v5837_v29 }
 0x499   : > { %4032 = vmatpush3.bf16.xpose.msra.mxu0 %v1361_v30  ;;  %4033 = vmatprep.mubr.msk.bf16.mxu0 %vm5135_vm2, %v5134_v4 }
 0x49a   : > { %4043 = vmatprep.subr.bf16.mxu0 %v5134_v4 }
 0x49c   : > { %4028 = vmatmul.mubr.msk.bf16.vlgmr.msra.gmra.mrb[4].mxu1 %vm1209_vm3, %v5845_v31 }
 0x49d   : > { %4039 = vmatprep.mubr.msk.bf16.mxu1 %vm5135_vm2, %v5134_v4 }
 0x4a0   : > { %4034 = vmatmul.mubr.msk.bf16.vlgmr.msra.gmra.mrb[8].mxu0 %vm1209_vm3, %v5852_v33 }
 0x4a1   : > { %4045 = vmatprep.mubr.msk.bf16.mxu0 %vm5135_vm2, %v5134_v4 }
 0x567   : > { %v1250_v46 = vpop.f32.mrb[0].mxu1 }
 0x568   : > { %v1251_v47 = vadd.f32 %v1250_v46, %v5858_v44  ;;  %v4017_v48 = vpop.f32.mrb[1].mxu1 }
 0x569   : > { %v1253_v51 = vpop.f32.mrb[2].mxu1 }
 0x56a   : > { %v4018_v52 = vpop.f32.mrb[3].mxu1  ;;  %v1403_v53 = vsel %vm1209_vm3, %v1251_v47, -inf }
 0x56b   : > { %v1299_v54 = vpop.f32.mrb[4].mxu0  ;;  %1404 = vmax.xlane.f32.xlu0 %v1403_v53 }
 0x56c   : > { %v1300_v55 = vadd.f32 %v1299_v54, %v5861_v49  ;;  %v4023_v56 = vpop.f32.mrb[5].mxu0 }
 0x56d   : > { %v1302_v59 = vpop.f32.mrb[6].mxu0 }
 0x56e   : > { %v4024_v60 = vpop.f32.mrb[7].mxu0  ;;  %v1406_v61 = vsel %vm1209_vm3, %v1300_v55, -inf }
 0x56f   : > { %1407 = vmax.xlane.f32.xlu1 %v1406_v61  ;;  %v1348_v62 = vpop.f32.mrb[4].mxu1 }
 0x570   : > { %v1349_v63 = vadd.f32 %v1348_v62, %v5865_v57  ;;  %v4029_v0 = vpop.f32.mrb[5].mxu1 }
 0x571   : > { %v1351_v2 = vpop.f32.mrb[6].mxu1 }
 0x572   : > { %v4030_v3 = vpop.f32.mrb[7].mxu1  ;;  %v1409_v5 = vsel %vm1209_vm3, %v1349_v63, -inf }
 0x573   : > { %v1397_v6 = vpop.f32.mrb[8].mxu0  ;;  %1410 = vmax.xlane.f32.xlu0 %v1409_v5 }
 0x574   : > { %v1398_v7 = vadd.f32 %v1397_v6, %v5869_v1  ;;  %v4035_v8 = vpop.f32.mrb[9].mxu0 }
 0x575   : > { %v1400_v9 = vpop.f32.mrb[10].mxu0 }
 0x576   : > { %v4036_v10 = vpop.f32.mrb[11].mxu0  ;;  %v1412_v12 = vsel %vm1209_vm3, %v1398_v7, -inf }
 0x577   : > { %1413 = vmax.xlane.f32.xlu0 %v1412_v12 }
 0x580   : > { %1451 = vrot.lane.b32.xlu1 %v5816_v14, %s5138_s3 }
 0x5f8   : > { %v1405_v13 = vpop.xlane.xlu0 %1404 }
 0x5f9   : > { %v1415_v15 = vsub.f32 %v1251_v47, %v1405_v13 }
 0x5fb   : > { %v1419_v18 = vmul.f32 1.442695, %v1415_v15 }
 0x5fc   : > { %v1408_v19 = vpop.xlane.xlu1 %1407 }
 0x5fd   : > { %4458 = vpow2.f32 %v1419_v18  ;;  %v1416_v20 = vsub.f32 %v1300_v55, %v1408_v19 }
 0x5ff   : > { %v1421_v21 = vmul.f32 1.442695, %v1416_v20 }
 0x600   : > { %v1452_v22 = vpop.permute.xlu1 %1451  ;;  %v1411_v30 = vpop.xlane.xlu0 %1410 }
 0x601   : > { %4460 = vpow2.f32 %v1421_v21  ;;  %v1458_v23 = vsel %vm1456_vm4, %v1452_v22, 0  ;;  %v1417_v34 = vsub.f32 %v1349_v63, %v1411_v30 }
 0x602   : > { %4038 = vmatpush3.bf16.msra.mxu1 %v1458_v23 }
 0x603   : > { %4049 = vmatprep.subr.bf16.mxu1 %v5134_v4  ;;  %v1423_v36 = vmul.f32 1.442695, %v1417_v34 }
 0x604   : > { %v1414_v32 = vpop.xlane.xlu0 %1413 }
 0x605   : > { %v1418_v35 = vsub.f32 %v1398_v7, %v1414_v32  ;;  %4462 = vpow2.f32 %v1423_v36 }
 0x607   : > { %v4459_v25 = vpop.eup %4458  ;;  %v1425_v37 = vmul.f32 1.442695, %v1418_v35 }
 0x608   : > { %v1427_v26 = vsel %vm1209_vm3, %v4459_v25, 0.0 }
 0x609   : > { %1428 = vadd.xlane.f32.xlu1 %v1427_v26  ;;  %4464 = vpow2.f32 %v1425_v37 }
 0x60b   : > { %v4461_v27 = vpop.eup %4460 }
 0x60c   : > { %v1430_v28 = vsel %vm1209_vm3, %v4461_v27, 0.0 }
 0x60d   : > { %1431 = vadd.xlane.f32.xlu0 %v1430_v28 }
 0x60f   : > { %v4463_v38 = vpop.eup %4462 }
 0x610   : > { %v1433_v40 = vsel %vm1209_vm3, %v4463_v38, 0.0 }
 0x613   : > { %v4465_v39 = vpop.eup %4464 }
 0x614   : > { %v1436_v41 = vsel %vm1209_vm3, %v4465_v39, 0.0 }
 0x61a   : > { %1548 = vrot.lane.b32.xlu1 %v5814_v11, %s5138_s3 }
 0x61e   : > { %1596 = vrot.lane.b32.xlu1 %v5820_v16, %s5138_s3 }
 0x623   : > { %1500 = vrot.lane.b32.xlu0 %v5822_v17, %s5138_s3  ;;  %s5144_s3 = smov 48  }
 0x642   : > { %1434 = vadd.xlane.f32.xlu1 %v1433_v40  ;;  %1437 = vadd.xlane.f32.xlu0 %v1436_v41 }
 0x653   : > { %1698 = vrot.lane.b32.xlu1 %v5822_v17, %s5139_s4 }
 0x657   : > { %1696 = vrot.lane.b32.xlu1 %v5837_v29, %s5140_s29 }
 0x658   : > { %1647 = vrot.lane.b32.xlu0 %v5816_v14, %s5139_s4 }
 0x65b   : > { %1800 = vrot.lane.b32.xlu1 %v5820_v16, %s5139_s4 }
 0x65c   : > { %1645 = vrot.lane.b32.xlu0 %v5829_v24, %s5140_s29 }
 0x65f   : > { %1798 = vrot.lane.b32.xlu1 %v5852_v33, %s5140_s29 }
 0x660   : > { %1749 = vrot.lane.b32.xlu0 %v5814_v11, %s5139_s4  ;;  %s5145_s4 = smov 72  }
 0x664   : > { %1747 = vrot.lane.b32.xlu0 %v5845_v31, %s5140_s29  ;;  %s5146_s29 = smov 104  }
 0x696   : > { %v1429_v42 = vpop.xlane.xlu1 %1428 }
 0x697   : > { %4466 = vrcp.f32 %v1429_v42 }
 0x69a   : > { %v1432_v43 = vpop.xlane.xlu0 %1431  ;;  %v1549_v48 = vpop.permute.xlu1 %1548 }
 0x69b   : > { %4468 = vrcp.f32 %v1432_v43  ;;  %v1554_v53 = vsel %vm1456_vm4, %v1549_v48, 0 }
 0x69e   : > { %v1501_v45 = vpop.permute.xlu0 %1500  ;;  %v1597_v55 = vpop.permute.xlu1 %1596 }
 0x69f   : > { %v1506_v46 = vsel %vm1456_vm4, %v1501_v45, 0  ;;  %v1602_v58 = vsel %vm1456_vm4, %v1597_v55, 0 }
 0x6a0   : > { %4044 = vmatpush3.bf16.msra.mxu0 %v1506_v46 }
 0x6a1   : > { %v4467_v47 = vpop.eup %4466  ;;  %4055 = vmatprep.subr.bf16.mxu0 %v5134_v4 }
 0x6a2   : > { %v1443_v50 = vmul.f32 %v4467_v47, %v4459_v25 }
 0x6a4   : > { %v1447_v51 = vpack.c.bf16 %v1443_v50, %v1443_v50 }
 0x6a5   : > { %v4469_v52 = vpop.eup %4468 }
 0x6a6   : > { %v1444_v54 = vmul.f32 %v4469_v52, %v4461_v27  ;;  %4040 = vmatmul.mubr.msk.bf16.vlgmr.msra.gmra.mrb[8].mxu1 %vm1209_vm3, %v1447_v51 }
 0x6a7   : > { %4050 = vmatpush3.bf16.msra.mxu1 %v1554_v53  ;;  %4051 = vmatprep.mubr.msk.bf16.mxu1 %vm5135_vm2, %v5134_v4 }
 0x6a8   : > { %v1448_v56 = vpack.c.bf16 %v1444_v54, %v1444_v54  ;;  %4061 = vmatprep.subr.bf16.mxu1 %v5134_v4 }
 0x6aa   : > { %4046 = vmatmul.mubr.msk.bf16.vlgmr.msra.gmra.mrb[12].mxu0 %vm1209_vm3, %v1448_v56 }
 0x6ab   : > { %4056 = vmatpush3.bf16.msra.mxu0 %v1602_v58  ;;  %4057 = vmatprep.mubr.msk.bf16.mxu0 %vm5135_vm2, %v5134_v4 }
 0x6ac   : > { %4067 = vmatprep.subr.bf16.mxu0 %v5134_v4 }
 0x6cf   : > { %v1435_v59 = vpop.xlane.xlu1 %1434  ;;  %v1438_v60 = vpop.xlane.xlu0 %1437 }
 0x6d0   : > { %4470 = vrcp.f32 %v1435_v59 }
 0x6d1   : > { %4472 = vrcp.f32 %v1438_v60 }
 0x6d3   : > { %v1648_v61 = vpop.permute.xlu0 %1647  ;;  %v1699_v62 = vpop.permute.xlu1 %1698 }
 0x6d4   : > { %v1653_v8 = vsel %vm1209_vm3, %v1648_v61, 0  ;;  %v1704_v10 = vsel %vm1209_vm3, %v1699_v62, 0 }
 0x6d7   : > { %v1646_v6 = vpop.permute.xlu0 %1645  ;;  %v1697_v9 = vpop.permute.xlu1 %1696 }
 0x6da   : > { %v4471_v63 = vpop.eup %4470 }
 0x6db   : > { %v4473_v0 = vpop.eup %4472  ;;  %v1445_v2 = vmul.f32 %v4471_v63, %v4463_v38  ;;  %v1750_v12 = vpop.permute.xlu0 %1749 }
 0x6dc   : > { %v1446_v3 = vmul.f32 %v4473_v0, %v4465_v39  ;;  %v1801_v13 = vpop.permute.xlu1 %1800  ;;  %v1755_v15 = vsel %vm1209_vm3, %v1750_v12, 0 }
 0x6dd   : > { %v1449_v5 = vpack.c.bf16 %v1445_v2, %v1445_v2  ;;  %v1806_v18 = vsel %vm1209_vm3, %v1801_v13, 0 }
 0x6de   : > { %v1450_v7 = vpack.c.bf16 %v1446_v3, %v1446_v3 }
 0x6df   : > { %4052 = vmatmul.mubr.msk.bf16.vlgmr.msra.gmra.mrb[12].mxu1 %vm1209_vm3, %v1449_v5  ;;  %v1748_v19 = vpop.permute.xlu0 %1747 }
 0x6e0   : > { %4058 = vmatmul.mubr.msk.bf16.vlgmr.msra.gmra.mrb[16].mxu0 %vm1209_vm3, %v1450_v7  ;;  %4062 = vmatpush3.bf16.xpose.msra.mxu1 %v1653_v8  ;;  %v1799_v20 = vpop.permute.xlu1 %1798 }
 0x6e1   : > { %4068 = vmatpush3.bf16.xpose.msra.mxu0 %v1704_v10  ;;  %4063 = vmatprep.mubr.msk.bf16.mxu1 %vm5135_vm2, %v5134_v4 }
 0x6e2   : > { %4069 = vmatprep.mubr.msk.bf16.mxu0 %vm5135_vm2, %v5134_v4  ;;  %4073 = vmatprep.subr.bf16.mxu1 %v5134_v4 }
 0x6e3   : > { %4079 = vmatprep.subr.bf16.mxu0 %v5134_v4 }
 0x6e7   : > { %4064 = vmatmul.mubr.msk.bf16.vlgmr.msra.gmra.mrb[16].mxu1 %vm1209_vm3, %v1646_v6 }
 0x6e8   : > { %4070 = vmatmul.mubr.msk.bf16.vlgmr.msra.gmra.mrb[20].mxu0 %vm1209_vm3, %v1697_v9  ;;  %4074 = vmatpush3.bf16.xpose.msra.mxu1 %v1755_v15 }
 0x6e9   : > { %4080 = vmatpush3.bf16.xpose.msra.mxu0 %v1806_v18  ;;  %4075 = vmatprep.mubr.msk.bf16.mxu1 %vm5135_vm2, %v5134_v4 }
 0x6ea   : > { %4081 = vmatprep.mubr.msk.bf16.mxu0 %vm5135_vm2, %v5134_v4  ;;  %4085 = vmatprep.subr.bf16.mxu1 %v5134_v4 }
 0x6eb   : > { %4091 = vmatprep.subr.bf16.mxu0 %v5134_v4 }
 0x6ef   : > { %4076 = vmatmul.mubr.msk.bf16.vlgmr.msra.gmra.mrb[20].mxu1 %vm1209_vm3, %v1748_v19 }
 0x6f0   : > { %4082 = vmatmul.mubr.msk.bf16.vlgmr.msra.gmra.mrb[24].mxu0 %vm1209_vm3, %v1799_v20  ;;  %4087 = vmatprep.mubr.msk.bf16.mxu1 %vm5135_vm2, %v5134_v4 }
 0x6f1   : > { %4093 = vmatprep.mubr.msk.bf16.mxu0 %vm5135_vm2, %v5134_v4 }
 0x779   : > { %v5930_v21 = vpop.f32.mrb[8].mxu1 }
 0x77a   : > { %v4041_v22 = vpop.f32.mrb[9].mxu1 }
 0x77b   : > { %v1497_v23 = vpop.f32.mrb[10].mxu1 }
 0x77c   : > { %v4042_v25 = vpop.f32.mrb[11].mxu1 }
 0x77d   : > { %v5932_v26 = vpop.f32.mrb[12].mxu0 }
 0x77e   : > { %v4047_v27 = vpop.f32.mrb[13].mxu0 }
 0x77f   : > { %v1545_v28 = vpop.f32.mrb[14].mxu0 }
 0x780   : > { %v4048_v30 = vpop.f32.mrb[15].mxu0 }
 0x7b2   : > { %v5934_v32 = vpop.f32.mrb[12].mxu1 }
 0x7b3   : > { %v5936_v34 = vpop.f32.mrb[16].mxu0  ;;  %v4053_v35 = vpop.f32.mrb[13].mxu1 }
 0x7b4   : > { %v4059_v36 = vpop.f32.mrb[17].mxu0  ;;  %v1593_v37 = vpop.f32.mrb[14].mxu1 }
 0x7b5   : > { %v1641_v38 = vpop.f32.mrb[18].mxu0  ;;  %v4054_v39 = vpop.f32.mrb[15].mxu1 }
 0x7b6   : > { %v4060_v40 = vpop.f32.mrb[19].mxu0 }
 0x7ba   : > { %v1689_v41 = vpop.f32.mrb[16].mxu1 }
 0x7bb   : > { %v1690_v42 = vadd.f32 %v1689_v41, %v5858_v44  ;;  %v1740_v43 = vpop.f32.mrb[20].mxu0  ;;  %v4065_v45 = vpop.f32.mrb[17].mxu1 }
 0x7bc   : > { %v1741_v46 = vadd.f32 %v1740_v43, %v5861_v49  ;;  %v4071_v47 = vpop.f32.mrb[21].mxu0  ;;  %v1692_v48 = vpop.f32.mrb[18].mxu1 }
 0x7bd   : > { %v1743_v50 = vpop.f32.mrb[22].mxu0  ;;  %v4066_v51 = vpop.f32.mrb[19].mxu1  ;;  %v1848_v52 = vsel %vm1209_vm3, %v1690_v42, -inf }
 0x7be   : > { %v4072_v53 = vpop.f32.mrb[23].mxu0  ;;  %v1851_v54 = vsel %vm1209_vm3, %v1741_v46, -inf  ;;  %1849 = vmax.xlane.f32.xlu0 %v1848_v52 }
 0x7bf   : > { %1852 = vmax.xlane.f32.xlu1 %v1851_v54 }
 0x7c2   : > { %v1791_v55 = vpop.f32.mrb[20].mxu1 }
 0x7c3   : > { %v1792_v56 = vadd.f32 %v1791_v55, %v5865_v57  ;;  %v1842_v58 = vpop.f32.mrb[24].mxu0  ;;  %v4077_v59 = vpop.f32.mrb[21].mxu1 }
 0x7c4   : > { %v4083_v60 = vpop.f32.mrb[25].mxu0  ;;  %v1794_v61 = vpop.f32.mrb[22].mxu1  ;;  %v1843_v62 = vadd.f32 %v1842_v58, %v5869_v1 }
 0x7c5   : > { %v1845_v63 = vpop.f32.mrb[26].mxu0  ;;  %v4078_v0 = vpop.f32.mrb[23].mxu1  ;;  %v1854_v2 = vsel %vm1209_vm3, %v1792_v56, -inf }
 0x7c6   : > { %v4084_v3 = vpop.f32.mrb[27].mxu0  ;;  %1855 = vmax.xlane.f32.xlu0 %v1854_v2  ;;  %v1857_v5 = vsel %vm1209_vm3, %v1843_v62, -inf }
 0x7ca   : > { %1858 = vmax.xlane.f32.xlu0 %v1857_v5 }
 0x7d0   : > { %1896 = vrot.lane.b32.xlu1 %v5816_v14, %s5141_s22 }
 0x84b   : > { %v1850_v6 = vpop.xlane.xlu0 %1849 }
 0x84c   : > { %v1853_v7 = vpop.xlane.xlu1 %1852  ;;  %v1860_v8 = vsub.f32 %v1690_v42, %v1850_v6 }
 0x84d   : > { %v1861_v9 = vsub.f32 %v1741_v46, %v1853_v7 }
 0x84e   : > { %v1864_v10 = vmul.f32 1.442695, %v1860_v8 }
 0x84f   : > { %v1866_v12 = vmul.f32 1.442695, %v1861_v9 }
 0x850   : > { %4474 = vpow2.f32 %v1864_v10  ;;  %v1897_v13 = vpop.permute.xlu1 %1896 }
 0x851   : > { %4476 = vpow2.f32 %v1866_v12  ;;  %v1902_v15 = vsel %vm1456_vm4, %v1897_v13, 0 }
 0x852   : > { %4086 = vmatpush3.bf16.msra.mxu1 %v1902_v15 }
 0x853   : > { %4097 = vmatprep.subr.bf16.mxu1 %v5134_v4  ;;  %v1856_v23 = vpop.xlane.xlu0 %1855 }
 0x854   : > { %v1862_v28 = vsub.f32 %v1792_v56, %v1856_v23 }
 0x856   : > { %v1868_v35 = vmul.f32 1.442695, %v1862_v28 }
 0x857   : > { %v1859_v25 = vpop.xlane.xlu0 %1858 }
 0x858   : > { %v1863_v27 = vsub.f32 %v1843_v62, %v1859_v25 }
 0x85a   : > { %v4475_v18 = vpop.eup %4474  ;;  %v1870_v30 = vmul.f32 1.442695, %v1863_v27 }
 0x85b   : > { %v4477_v19 = vpop.eup %4476  ;;  %v1872_v20 = vsel %vm1209_vm3, %v4475_v18, 0.0 }
 0x85c   : > { %1873 = vadd.xlane.f32.xlu1 %v1872_v20  ;;  %v1875_v22 = vsel %vm1209_vm3, %v4477_v19, 0.0  ;;  %4478 = vpow2.f32 %v1870_v30 }
 0x85d   : > { %1876 = vadd.xlane.f32.xlu0 %v1875_v22  ;;  %4480 = vpow2.f32 %v1868_v35 }
 0x866   : > { %v4479_v36 = vpop.eup %4478 }
 0x867   : > { %v4481_v37 = vpop.eup %4480  ;;  %v1881_v38 = vsel %vm1209_vm3, %v4479_v36, 0.0 }
 0x868   : > { %v1878_v39 = vsel %vm1209_vm3, %v4481_v37, 0.0 }
 0x86d   : > { %1992 = vrot.lane.b32.xlu1 %v5814_v11, %s5141_s22 }
 0x871   : > { %2040 = vrot.lane.b32.xlu1 %v5820_v16, %s5141_s22 }
 0x873   : > { %1944 = vrot.lane.b32.xlu0 %v5822_v17, %s5141_s22  ;;  %s5147_s22 = smov 40  }
 0x892   : > { %1882 = vadd.xlane.f32.xlu0 %v1881_v38 }
 0x895   : > { %1879 = vadd.xlane.f32.xlu1 %v1878_v39 }
 0x8a6   : > { %2140 = vrot.lane.b32.xlu1 %v5822_v17, %s5142_s27 }
 0x8a8   : > { %2090 = vrot.lane.b32.xlu0 %v5816_v14, %s5142_s27 }
 0x8aa   : > { %2138 = vrot.lane.b32.xlu1 %v5837_v29, %s5143_s23 }
 0x8ac   : > { %2088 = vrot.lane.b32.xlu0 %v5829_v24, %s5143_s23 }
 0x8ae   : > { %2240 = vrot.lane.b32.xlu1 %v5820_v16, %s5142_s27 }
 0x8b0   : > { %2190 = vrot.lane.b32.xlu0 %v5814_v11, %s5142_s27  ;;  %s5148_s27 = smov 8  }
 0x8b2   : > { %2238 = vrot.lane.b32.xlu1 %v5852_v33, %s5143_s23 }
 0x8b4   : > { %2188 = vrot.lane.b32.xlu0 %v5845_v31, %s5143_s23  ;;  %s5149_s23 = smov 16  }
 0x8e9   : > { %v1874_v40 = vpop.xlane.xlu1 %1873 }
 0x8ea   : > { %4482 = vrcp.f32 %v1874_v40  ;;  %v1877_v41 = vpop.xlane.xlu0 %1876 }
 0x8eb   : > { %4484 = vrcp.f32 %v1877_v41 }
 0x8ed   : > { %v1993_v45 = vpop.permute.xlu1 %1992 }
 0x8ee   : > { %v1945_v42 = vpop.permute.xlu0 %1944  ;;  %v1998_v54 = vsel %vm1456_vm4, %v1993_v45, 0 }
 0x8ef   : > { %v1950_v43 = vsel %vm1456_vm4, %v1945_v42, 0 }
 0x8f0   : > { %4092 = vmatpush3.bf16.msra.mxu0 %v1950_v43 }
 0x8f1   : > { %4103 = vmatprep.subr.bf16.mxu0 %v5134_v4  ;;  %v2041_v51 = vpop.permute.xlu1 %2040 }
 0x8f2   : > { %v2046_v55 = vsel %vm1456_vm4, %v2041_v51, 0 }
 0x8f4   : > { %v4483_v46 = vpop.eup %4482 }
 0x8f5   : > { %v4485_v47 = vpop.eup %4484  ;;  %v1888_v48 = vmul.f32 %v4483_v46, %v4475_v18 }
 0x8f6   : > { %v1889_v50 = vmul.f32 %v4485_v47, %v4477_v19 }
 0x8f7   : > { %v1892_v52 = vpack.c.bf16 %v1888_v48, %v1888_v48 }
 0x8f8   : > { %v1893_v53 = vpack.c.bf16 %v1889_v50, %v1889_v50 }
 0x8f9   : > { %4088 = vmatmul.mubr.msk.bf16.vlgmr.msra.gmra.mrb[24].mxu1 %vm1209_vm3, %v1892_v52 }
 0x8fa   : > { %4094 = vmatmul.mubr.msk.bf16.vlgmr.msra.gmra.mrb[28].mxu0 %vm1209_vm3, %v1893_v53  ;;  %4098 = vmatpush3.bf16.msra.mxu1 %v1998_v54 }
 0x8fb   : > { %4104 = vmatpush3.bf16.msra.mxu0 %v2046_v55  ;;  %4105 = vmatprep.mubr.msk.bf16.mxu0 %vm5135_vm2, %v5134_v4 }
 0x8fc   : > { %4115 = vmatprep.subr.bf16.mxu0 %v5134_v4  ;;  %4099 = vmatprep.mubr.msk.bf16.mxu1 %vm5135_vm2, %v5134_v4 }
 0x8fd   : > { %4109 = vmatprep.subr.bf16.mxu1 %v5134_v4 }
 0x91f   : > { %v1883_v56 = vpop.xlane.xlu0 %1882 }
 0x920   : > { %4486 = vrcp.f32 %v1883_v56 }
 0x922   : > { %v1880_v58 = vpop.xlane.xlu1 %1879 }
 0x923   : > { %4488 = vrcp.f32 %v1880_v58  ;;  %v2091_v62 = vpop.permute.xlu0 %2090 }
 0x924   : > { %v2096_v8 = vsel %vm1209_vm3, %v2091_v62, 0 }
 0x926   : > { %v2141_v59 = vpop.permute.xlu1 %2140 }
 0x927   : > { %v2146_v5 = vsel %vm1209_vm3, %v2141_v59, 0  ;;  %v2089_v7 = vpop.permute.xlu0 %2088 }
 0x92a   : > { %v4487_v60 = vpop.eup %4486  ;;  %v2139_v3 = vpop.permute.xlu1 %2138 }
 0x92b   : > { %v1891_v61 = vmul.f32 %v4487_v60, %v4479_v36  ;;  %v2191_v10 = vpop.permute.xlu0 %2190 }
 0x92c   : > { %v2196_v13 = vsel %vm1209_vm3, %v2191_v10, 0 }
 0x92d   : > { %v4489_v63 = vpop.eup %4488  ;;  %v1895_v0 = vpack.c.bf16 %v1891_v61, %v1891_v61 }
 0x92e   : > { %v1890_v2 = vmul.f32 %v4489_v63, %v4481_v37  ;;  %v2241_v9 = vpop.permute.xlu1 %2240 }
 0x92f   : > { %4106 = vmatmul.mubr.msk.bf16.vlgmr.msra.gmra.mrb[32].mxu0 %vm1209_vm3, %v1895_v0  ;;  %v2246_v12 = vsel %vm1209_vm3, %v2241_v9, 0  ;;  %v2189_v18 = vpop.permute.xlu0 %2188 }
 0x930   : > { %4116 = vmatpush3.bf16.xpose.msra.mxu0 %v2146_v5  ;;  %v1894_v6 = vpack.c.bf16 %v1890_v2, %v1890_v2  ;;  %4117 = vmatprep.mubr.msk.bf16.mxu0 %vm5135_vm2, %v5134_v4 }
 0x931   : > { %4127 = vmatprep.subr.bf16.mxu0 %v5134_v4 }
 0x932   : > { %4100 = vmatmul.mubr.msk.bf16.vlgmr.msra.gmra.mrb[28].mxu1 %vm1209_vm3, %v1894_v6  ;;  %v2239_v15 = vpop.permute.xlu1 %2238 }
 0x933   : > { %4110 = vmatpush3.bf16.xpose.msra.mxu1 %v2096_v8  ;;  %4111 = vmatprep.mubr.msk.bf16.mxu1 %vm5135_vm2, %v5134_v4 }
 0x934   : > { %4121 = vmatprep.subr.bf16.mxu1 %v5134_v4 }
 0x937   : > { %4118 = vmatmul.mubr.msk.bf16.vlgmr.msra.gmra.mrb[36].mxu0 %vm1209_vm3, %v2139_v3 }
 0x938   : > { %4128 = vmatpush3.bf16.xpose.msra.mxu0 %v2246_v12  ;;  %4129 = vmatprep.mubr.msk.bf16.mxu0 %vm5135_vm2, %v5134_v4 }
 0x939   : > { %4139 = vmatprep.subr.bf16.mxu0 %v5134_v4 }
 0x93a   : > { %4112 = vmatmul.mubr.msk.bf16.vlgmr.msra.gmra.mrb[32].mxu1 %vm1209_vm3, %v2089_v7 }
 0x93b   : > { %4122 = vmatpush3.bf16.xpose.msra.mxu1 %v2196_v13  ;;  %4123 = vmatprep.mubr.msk.bf16.mxu1 %vm5135_vm2, %v5134_v4 }
 0x93c   : > { %4133 = vmatprep.subr.bf16.mxu1 %v5134_v4 }
 0x93f   : > { %4130 = vmatmul.mubr.msk.bf16.vlgmr.msra.gmra.mrb[40].mxu0 %vm1209_vm3, %v2239_v15 }
 0x940   : > { %4141 = vmatprep.mubr.msk.bf16.mxu0 %vm5135_vm2, %v5134_v4 }
 0x942   : > { %4124 = vmatmul.mubr.msk.bf16.vlgmr.msra.gmra.mrb[36].mxu1 %vm1209_vm3, %v2189_v18 }
 0x943   : > { %4135 = vmatprep.mubr.msk.bf16.mxu1 %vm5135_vm2, %v5134_v4 }
 0x9cc   : > { %v6002_v19 = vpop.f32.mrb[24].mxu1 }
 0x9cd   : > { %v6004_v20 = vpop.f32.mrb[28].mxu0  ;;  %v4089_v22 = vpop.f32.mrb[25].mxu1 }
 0x9ce   : > { %v4418_v23 = vpack.i.bf16 %v6004_v20, %v6002_v19  ;;  %v4095_v25 = vpop.f32.mrb[29].mxu0  ;;  %v1941_v27 = vpop.f32.mrb[26].mxu1 }
 0x9cf   : > { %v1989_v28 = vpop.f32.mrb[30].mxu0  ;;  %v4090_v30 = vpop.f32.mrb[27].mxu1 }
 0x9d0   : > { %v4096_v35 = vpop.f32.mrb[31].mxu0 }
 0xa02   : > { %v6008_v36 = vpop.f32.mrb[32].mxu0 }
 0xa03   : > { %v4107_v37 = vpop.f32.mrb[33].mxu0 }
 0xa04   : > { %v2085_v38 = vpop.f32.mrb[34].mxu0 }
 0xa05   : > { %v4108_v39 = vpop.f32.mrb[35].mxu0  ;;  %v6010_v40 = vpop.f32.mrb[28].mxu1 }
 0xa06   : > { %v4423_v41 = vpack.i.bf16 %v6008_v36, %v6010_v40  ;;  %v4101_v42 = vpop.f32.mrb[29].mxu1 }
 0xa07   : > { %v2037_v43 = vpop.f32.mrb[30].mxu1 }
 0xa08   : > { %v4102_v45 = vpop.f32.mrb[31].mxu1 }
 0xa0a   : > { %v2182_v46 = vpop.f32.mrb[36].mxu0 }
 0xa0b   : > { %v2183_v47 = vadd.f32 %v2182_v46, %v5861_v49  ;;  %v4119_v48 = vpop.f32.mrb[37].mxu0 }
 0xa0c   : > { %v2185_v50 = vpop.f32.mrb[38].mxu0 }
 0xa0d   : > { %v4120_v51 = vpop.f32.mrb[39].mxu0  ;;  %v2291_v52 = vsel %vm1209_vm3, %v2183_v47, -inf  ;;  %v2132_v53 = vpop.f32.mrb[32].mxu1 }
 0xa0e   : > { %2292 = vmax.xlane.f32.xlu1 %v2291_v52  ;;  %v2133_v54 = vadd.f32 %v2132_v53, %v5858_v44  ;;  %v4113_v55 = vpop.f32.mrb[33].mxu1 }
 0xa0f   : > { %v2135_v56 = vpop.f32.mrb[34].mxu1 }
 0xa10   : > { %v4114_v58 = vpop.f32.mrb[35].mxu1  ;;  %v2288_v59 = vsel %vm1209_vm3, %v2133_v54, -inf }
 0xa11   : > { %2289 = vmax.xlane.f32.xlu0 %v2288_v59 }
 0xa12   : > { %v2282_v60 = vpop.f32.mrb[40].mxu0 }
 0xa13   : > { %v4131_v61 = vpop.f32.mrb[41].mxu0  ;;  %v2283_v6 = vadd.f32 %v2282_v60, %v5869_v1 }
 0xa14   : > { %v2285_v62 = vpop.f32.mrb[42].mxu0 }
 0xa15   : > { %v4132_v63 = vpop.f32.mrb[43].mxu0  ;;  %v2232_v0 = vpop.f32.mrb[36].mxu1  ;;  %v2297_v9 = vsel %vm1209_vm3, %v2283_v6, -inf }
 0xa16   : > { %v2233_v2 = vadd.f32 %v2232_v0, %v5865_v57  ;;  %v4125_v3 = vpop.f32.mrb[37].mxu1 }
 0xa17   : > { %v2235_v5 = vpop.f32.mrb[38].mxu1 }
 0xa18   : > { %v4126_v7 = vpop.f32.mrb[39].mxu1  ;;  %v2294_v8 = vsel %vm1209_vm3, %v2233_v2, -inf }
 0xa19   : > { %2295 = vmax.xlane.f32.xlu0 %v2294_v8 }
 0xa1d   : > { %2298 = vmax.xlane.f32.xlu0 %v2297_v9 }
 0xa1f   : > { %2336 = vrot.lane.b32.xlu1 %v5816_v14, %s5144_s3 }
 0xa9b   : > { %v2293_v10 = vpop.xlane.xlu1 %2292 }
 0xa9c   : > { %v2301_v12 = vsub.f32 %v2183_v47, %v2293_v10 }
 0xa9e   : > { %v2306_v13 = vmul.f32 1.442695, %v2301_v12  ;;  %v2290_v15 = vpop.xlane.xlu0 %2289 }
 0xa9f   : > { %v2337_v18 = vpop.permute.xlu1 %2336  ;;  %v2300_v22 = vsub.f32 %v2133_v54, %v2290_v15 }
 0xaa0   : > { %4490 = vpow2.f32 %v2306_v13  ;;  %v2342_v25 = vsel %vm1456_vm4, %v2337_v18, 0 }
 0xaa1   : > { %v2304_v27 = vmul.f32 1.442695, %v2300_v22  ;;  %4134 = vmatpush3.bf16.msra.mxu1 %v2342_v25 }
 0xaa2   : > { %4145 = vmatprep.subr.bf16.mxu1 %v5134_v4 }
 0xaa3   : > { %4492 = vpow2.f32 %v2304_v27 }
 0xaa6   : > { %v2296_v38 = vpop.xlane.xlu0 %2295 }
 0xaa7   : > { %v2302_v45 = vsub.f32 %v2233_v2, %v2296_v38 }
 0xaa9   : > { %v2308_v46 = vmul.f32 1.442695, %v2302_v45 }
 0xaaa   : > { %v4491_v28 = vpop.eup %4490  ;;  %v2299_v39 = vpop.xlane.xlu0 %2298 }
 0xaab   : > { %v2315_v30 = vsel %vm1209_vm3, %v4491_v28, 0.0  ;;  %v2303_v42 = vsub.f32 %v2283_v6, %v2299_v39 }
 0xaac   : > { %2316 = vadd.xlane.f32.xlu0 %v2315_v30 }
 0xaad   : > { %v4493_v35 = vpop.eup %4492  ;;  %v2310_v43 = vmul.f32 1.442695, %v2303_v42 }
 0xaae   : > { %v2312_v37 = vsel %vm1209_vm3, %v4493_v35, 0.0 }
 0xaaf   : > { %2313 = vadd.xlane.f32.xlu1 %v2312_v37  ;;  %4494 = vpow2.f32 %v2310_v43 }
 0xab0   : > { %4496 = vpow2.f32 %v2308_v46 }
 0xab9   : > { %v4495_v47 = vpop.eup %4494 }
 0xaba   : > { %v2321_v48 = vsel %vm1209_vm3, %v4495_v47, 0.0  ;;  %v4497_v50 = vpop.eup %4496 }
 0xabb   : > { %v2318_v51 = vsel %vm1209_vm3, %v4497_v50, 0.0 }
 0xac0   : > { %2432 = vrot.lane.b32.xlu1 %v5814_v11, %s5144_s3 }
 0xac2   : > { %2384 = vrot.lane.b32.xlu0 %v5822_v17, %s5144_s3 }
 0xac4   : > { %2480 = vrot.lane.b32.xlu1 %v5820_v16, %s5144_s3  ;;  %s5150_s3 = smov 24  }
 0xae1   : > { %2322 = vadd.xlane.f32.xlu0 %v2321_v48 }
 0xae8   : > { %2319 = vadd.xlane.f32.xlu1 %v2318_v51 }
 0xaf7   : > { %2530 = vrot.lane.b32.xlu0 %v5816_v14, %s5145_s4 }
 0xaf9   : > { %2580 = vrot.lane.b32.xlu1 %v5822_v17, %s5145_s4 }
 0xafb   : > { %2528 = vrot.lane.b32.xlu0 %v5829_v24, %s5146_s29 }
 0xafd   : > { %2578 = vrot.lane.b32.xlu1 %v5837_v29, %s5146_s29 }
 0xaff   : > { %2630 = vrot.lane.b32.xlu0 %v5814_v11, %s5145_s4 }
 0xb01   : > { %2680 = vrot.lane.b32.xlu1 %v5820_v16, %s5145_s4 }
 0xb03   : > { %2628 = vrot.lane.b32.xlu0 %v5845_v31, %s5146_s29 }
 0xb05   : > { %2678 = vrot.lane.b32.xlu1 %v5852_v33, %s5146_s29 }
 0xb39   : > { %v2317_v52 = vpop.xlane.xlu0 %2316 }
 0xb3a   : > { %4498 = vrcp.f32 %v2317_v52 }
 0xb3c   : > { %v2314_v53 = vpop.xlane.xlu1 %2313 }
 0xb3d   : > { %4500 = vrcp.f32 %v2314_v53  ;;  %v2385_v54 = vpop.permute.xlu0 %2384 }
 0xb3e   : > { %v2390_v55 = vsel %vm1456_vm4, %v2385_v54, 0 }
 0xb3f   : > { %4140 = vmatpush3.bf16.msra.mxu0 %v2390_v55 }
 0xb40   : > { %v2433_v56 = vpop.permute.xlu1 %2432  ;;  %4151 = vmatprep.subr.bf16.mxu0 %v5134_v4 }
 0xb41   : > { %v2438_v62 = vsel %vm1456_vm4, %v2433_v56, 0 }
 0xb44   : > { %v4499_v24 = vpop.eup %4498  ;;  %v2481_v58 = vpop.permute.xlu1 %2480 }
 0xb45   : > { %v2329_v29 = vmul.f32 %v4499_v24, %v4491_v28  ;;  %v2486_v31 = vsel %vm1456_vm4, %v2481_v58, 0 }
 0xb47   : > { %v4501_v59 = vpop.eup %4500  ;;  %v2333_v60 = vpack.c.bf16 %v2329_v29, %v2329_v29 }
 0xb48   : > { %v2328_v61 = vmul.f32 %v4501_v59, %v4493_v35 }
 0xb49   : > { %4142 = vmatmul.mubr.msk.bf16.vlgmr.msra.gmra.mrb[44].mxu0 %vm1209_vm3, %v2333_v60 }
 0xb4a   : > { %4152 = vmatpush3.bf16.msra.mxu0 %v2486_v31  ;;  %v2332_v33 = vpack.c.bf16 %v2328_v61, %v2328_v61  ;;  %4153 = vmatprep.mubr.msk.bf16.mxu0 %vm5135_vm2, %v5134_v4 }
 0xb4b   : > { %4163 = vmatprep.subr.bf16.mxu0 %v5134_v4 }
 0xb4c   : > { %4136 = vmatmul.mubr.msk.bf16.vlgmr.msra.gmra.mrb[40].mxu1 %vm1209_vm3, %v2332_v33 }
 0xb4d   : > { %4146 = vmatpush3.bf16.msra.mxu1 %v2438_v62  ;;  %4147 = vmatprep.mubr.msk.bf16.mxu1 %vm5135_vm2, %v5134_v4 }
 0xb4e   : > { %4157 = vmatprep.subr.bf16.mxu1 %v5134_v4 }
 0xb6e   : > { %v2323_v63 = vpop.xlane.xlu0 %2322 }
 0xb6f   : > { %4502 = vrcp.f32 %v2323_v63 }
 0xb72   : > { %v2531_v8 = vpop.permute.xlu0 %2530 }
 0xb73   : > { %v2536_v22 = vsel %vm1209_vm3, %v2531_v8, 0 }
 0xb75   : > { %v2320_v0 = vpop.xlane.xlu1 %2319 }
 0xb76   : > { %4504 = vrcp.f32 %v2320_v0  ;;  %v2529_v18 = vpop.permute.xlu0 %2528 }
 0xb79   : > { %v4503_v2 = vpop.eup %4502  ;;  %v2581_v3 = vpop.permute.xlu1 %2580 }
 0xb7a   : > { %v2331_v5 = vmul.f32 %v4503_v2, %v4495_v47  ;;  %v2586_v9 = vsel %vm1209_vm3, %v2581_v3, 0  ;;  %v2631_v27 = vpop.permute.xlu0 %2630 }
 0xb7b   : > { %v2636_v28 = vsel %vm1209_vm3, %v2631_v27, 0 }
 0xb7c   : > { %v2335_v6 = vpack.c.bf16 %v2331_v5, %v2331_v5 }
 0xb7d   : > { %v2579_v7 = vpop.permute.xlu1 %2578 }
 0xb7e   : > { %4154 = vmatmul.mubr.msk.bf16.vlgmr.msra.gmra.mrb[48].mxu0 %vm1209_vm3, %v2335_v6  ;;  %v2629_v35 = vpop.permute.xlu0 %2628 }
 0xb7f   : > { %4164 = vmatpush3.bf16.xpose.msra.mxu0 %v2586_v9  ;;  %4165 = vmatprep.mubr.msk.bf16.mxu0 %vm5135_vm2, %v5134_v4 }
 0xb80   : > { %v4505_v10 = vpop.eup %4504  ;;  %4175 = vmatprep.subr.bf16.mxu0 %v5134_v4 }
 0xb81   : > { %v2330_v12 = vmul.f32 %v4505_v10, %v4497_v50  ;;  %v2681_v13 = vpop.permute.xlu1 %2680 }
 0xb82   : > { %v2686_v25 = vsel %vm1209_vm3, %v2681_v13, 0 }
 0xb83   : > { %v2334_v15 = vpack.c.bf16 %v2330_v12, %v2330_v12 }
 0xb85   : > { %4148 = vmatmul.mubr.msk.bf16.vlgmr.msra.gmra.mrb[44].mxu1 %vm1209_vm3, %v2334_v15  ;;  %v2679_v30 = vpop.permute.xlu1 %2678 }
 0xb86   : > { %4158 = vmatpush3.bf16.xpose.msra.mxu1 %v2536_v22  ;;  %4166 = vmatmul.mubr.msk.bf16.vlgmr.msra.gmra.mrb[52].mxu0 %vm1209_vm3, %v2579_v7 }
 0xb87   : > { %4176 = vmatpush3.bf16.xpose.msra.mxu0 %v2686_v25  ;;  %4159 = vmatprep.mubr.msk.bf16.mxu1 %vm5135_vm2, %v5134_v4 }
 0xb88   : > { %4169 = vmatprep.subr.bf16.mxu1 %v5134_v4  ;;  %4177 = vmatprep.mubr.msk.bf16.mxu0 %vm5135_vm2, %v5134_v4 }
 0xb89   : > { %4187 = vmatprep.subr.bf16.mxu0 %v5134_v4 }
 0xb8d   : > { %4160 = vmatmul.mubr.msk.bf16.vlgmr.msra.gmra.mrb[48].mxu1 %vm1209_vm3, %v2529_v18 }
 0xb8e   : > { %4170 = vmatpush3.bf16.xpose.msra.mxu1 %v2636_v28  ;;  %4178 = vmatmul.mubr.msk.bf16.vlgmr.msra.gmra.mrb[56].mxu0 %vm1209_vm3, %v2679_v30 }
 0xb8f   : > { %4171 = vmatprep.mubr.msk.bf16.mxu1 %vm5135_vm2, %v5134_v4  ;;  %4181 = vmatprep.subr.bf16.mxu1 %v5134_v4 }
 0xb90   : > { %4189 = vmatprep.mubr.msk.bf16.mxu0 %vm5135_vm2, %v5134_v4 }
 0xb95   : > { %4172 = vmatmul.mubr.msk.bf16.vlgmr.msra.gmra.mrb[52].mxu1 %vm1209_vm3, %v2629_v35 }
 0xb96   : > { %4183 = vmatprep.mubr.msk.bf16.mxu1 %vm5135_vm2, %v5134_v4 }
 0xc1c   : > { %v6078_v37 = vpop.f32.mrb[44].mxu0 }
 0xc1d   : > { %v4143_v38 = vpop.f32.mrb[45].mxu0 }
 0xc1e   : > { %v2429_v39 = vpop.f32.mrb[46].mxu0 }
 0xc1f   : > { %v4144_v42 = vpop.f32.mrb[47].mxu0  ;;  %v6080_v43 = vpop.f32.mrb[40].mxu1 }
 0xc20   : > { %v4428_v45 = vpack.i.bf16 %v6078_v37, %v6080_v43  ;;  %v4137_v46 = vpop.f32.mrb[41].mxu1 }
 0xc21   : > { %v2381_v47 = vpop.f32.mrb[42].mxu1 }
 0xc22   : > { %v4138_v48 = vpop.f32.mrb[43].mxu1 }
 0xc51   : > { %v6084_v50 = vpop.f32.mrb[48].mxu0 }
 0xc52   : > { %v4155_v51 = vpop.f32.mrb[49].mxu0 }
 0xc53   : > { %v2525_v52 = vpop.f32.mrb[50].mxu0 }
 0xc54   : > { %v4156_v53 = vpop.f32.mrb[51].mxu0 }
 0xc58   : > { %v6086_v54 = vpop.f32.mrb[44].mxu1 }
 0xc59   : > { %v4433_v55 = vpack.i.bf16 %v6084_v50, %v6086_v54  ;;  %v2622_v56 = vpop.f32.mrb[52].mxu0  ;;  %v4149_v24 = vpop.f32.mrb[45].mxu1 }
 0xc5a   : > { %v2623_v29 = vadd.f32 %v2622_v56, %v5861_v49  ;;  %v4167_v58 = vpop.f32.mrb[53].mxu0  ;;  %v2477_v59 = vpop.f32.mrb[46].mxu1 }
 0xc5b   : > { %v2625_v60 = vpop.f32.mrb[54].mxu0  ;;  %v4150_v61 = vpop.f32.mrb[47].mxu1 }
 0xc5c   : > { %v4168_v31 = vpop.f32.mrb[55].mxu0  ;;  %v2731_v33 = vsel %vm1209_vm3, %v2623_v29, -inf }
 0xc5d   : > { %2732 = vmax.xlane.f32.xlu1 %v2731_v33 }
 0xc60   : > { %v2572_v62 = vpop.f32.mrb[48].mxu1 }
 0xc61   : > { %v2573_v63 = vadd.f32 %v2572_v62, %v5858_v44  ;;  %v2722_v0 = vpop.f32.mrb[56].mxu0  ;;  %v4161_v2 = vpop.f32.mrb[49].mxu1 }
 0xc62   : > { %v4179_v3 = vpop.f32.mrb[57].mxu0  ;;  %v2575_v5 = vpop.f32.mrb[50].mxu1  ;;  %v2723_v15 = vadd.f32 %v2722_v0, %v5869_v1  ;;  %v4450_v2 = vld [vmem:[%s804_s16] sm:$0xff]  }
 0xc63   : > { %v2725_v6 = vpop.f32.mrb[58].mxu0  ;;  %v4162_v7 = vpop.f32.mrb[51].mxu1  ;;  %v2728_v8 = vsel %vm1209_vm3, %v2573_v63, -inf }
 0xc64   : > { %v4180_v49 = vpop.f32.mrb[59].mxu0  ;;  %2729 = vmax.xlane.f32.xlu0 %v2728_v8  ;;  %v2737_v22 = vsel %vm1209_vm3, %v2723_v15, -inf  ;;  %v4451_v8 = vld [vmem:[%s804_s16 + $0x8] sm:$0xff]  }
 0xc68   : > { %v2672_v9 = vpop.f32.mrb[52].mxu1 }
 0xc69   : > { %v2673_v10 = vadd.f32 %v2672_v9, %v5865_v57  ;;  %v4173_v12 = vpop.f32.mrb[53].mxu1 }
 0xc6a   : > { %v2675_v13 = vpop.f32.mrb[54].mxu1 }
 0xc6b   : > { %v4174_v18 = vpop.f32.mrb[55].mxu1  ;;  %v2734_v44 = vsel %vm1209_vm3, %v2673_v10, -inf }
 0xc6c   : > { %2735 = vmax.xlane.f32.xlu0 %v2734_v44 }
 0xc6e   : > { %2776 = vrot.lane.b32.xlu1 %v5816_v14, %s5147_s22 }
 0xc70   : > { %2738 = vmax.xlane.f32.xlu0 %v2737_v22 }
 0xcea   : > { %v2733_v25 = vpop.xlane.xlu1 %2732 }
 0xceb   : > { %v2741_v27 = vsub.f32 %v2623_v29, %v2733_v25 }
 0xced   : > { %v2746_v28 = vmul.f32 1.442695, %v2741_v27 }
 0xcee   : > { %v2777_v30 = vpop.permute.xlu1 %2776 }
 0xcef   : > { %4506 = vpow2.f32 %v2746_v28  ;;  %v2782_v57 = vsel %vm1456_vm4, %v2777_v30, 0 }
 0xcf0   : > { %4182 = vmatpush3.bf16.msra.mxu1 %v2782_v57 }
 0xcf1   : > { %v2730_v1 = vpop.xlane.xlu0 %2729  ;;  %4193 = vmatprep.subr.bf16.mxu1 %v5134_v4 }
 0xcf2   : > { %v2740_v35 = vsub.f32 %v2573_v63, %v2730_v1 }
 0xcf4   : > { %v2744_v38 = vmul.f32 1.442695, %v2740_v35 }
 0xcf6   : > { %4508 = vpow2.f32 %v2744_v38 }
 0xcf9   : > { %v4507_v39 = vpop.eup %4506  ;;  %v2736_v42 = vpop.xlane.xlu0 %2735 }
 0xcfa   : > { %v2742_v14 = vsub.f32 %v2673_v10, %v2736_v42  ;;  %v2755_v46 = vsel %vm1209_vm3, %v4507_v39, 0.0 }
 0xcfb   : > { %2756 = vadd.xlane.f32.xlu0 %v2755_v46 }
 0xcfc   : > { %v2748_v47 = vmul.f32 1.442695, %v2742_v14 }
 0xcfd   : > { %v2739_v48 = vpop.xlane.xlu0 %2738 }
 0xcfe   : > { %4510 = vpow2.f32 %v2748_v47  ;;  %v2743_v51 = vsub.f32 %v2723_v15, %v2739_v48 }
 0xd00   : > { %v4509_v52 = vpop.eup %4508  ;;  %v2750_v53 = vmul.f32 1.442695, %v2743_v51 }
 0xd01   : > { %v2752_v56 = vsel %vm1209_vm3, %v4509_v52, 0.0 }
 0xd02   : > { %4512 = vpow2.f32 %v2750_v53  ;;  %2753 = vadd.xlane.f32.xlu1 %v2752_v56 }
 0xd08   : > { %v4511_v24 = vpop.eup %4510 }
 0xd09   : > { %v2758_v29 = vsel %vm1209_vm3, %v4511_v24, 0.0 }
 0xd0a   : > { %2759 = vadd.xlane.f32.xlu1 %v2758_v29 }
 0xd0c   : > { %v4513_v58 = vpop.eup %4512 }
 0xd0d   : > { %v2761_v59 = vsel %vm1209_vm3, %v4513_v58, 0.0 }
 0xd0e   : > { %2762 = vadd.xlane.f32.xlu0 %v2761_v59 }
 0xd1b   : > { %2872 = vrot.lane.b32.xlu1 %v5814_v11, %s5147_s22 }
 0xd1f   : > { %2920 = vrot.lane.b32.xlu1 %v5820_v16, %s5147_s22 }
 0xd23   : > { %4424 = vrot.lane.b32.xlu1 %v4423_v41, %s5148_s27 }
 0xd24   : > { %2824 = vrot.lane.b32.xlu0 %v5822_v17, %s5147_s22 }
 0xd27   : > { %4434 = vrot.lane.b32.xlu1 %v4433_v55, %s5149_s23 }
 0xd28   : > { %4419 = vrot.lane.b32.xlu0 %v4418_v23, %s5148_s27 }
 0xd2c   : > { %4429 = vrot.lane.b32.xlu0 %v4428_v45, %s5149_s23 }
 0xd88   : > { %v2757_v11 = vpop.xlane.xlu0 %2756 }
 0xd8f   : > { %v2754_v16 = vpop.xlane.xlu1 %2753 }
 0xd90   : > { %4514 = vrcp.f32 %v2754_v16 }
 0xd91   : > { %4516 = vrcp.f32 %v2757_v11 }
 0xd97   : > { %v2760_v36 = vpop.xlane.xlu1 %2759 }
 0xd98   : > { %4518 = vrcp.f32 %v2760_v36 }
 0xd9a   : > { %v4515_v17 = vpop.eup %4514 }
 0xd9b   : > { %v4517_v40 = vpop.eup %4516  ;;  %v2768_v41 = vmul.f32 %v4515_v17, %v4509_v52  ;;  %v2873_v60 = vpop.permute.xlu1 %2872 }
 0xd9c   : > { %v2763_v50 = vpop.xlane.xlu0 %2762  ;;  %v2769_v55 = vmul.f32 %v4517_v40, %v4507_v39  ;;  %v2878_v19 = vsel %vm1456_vm4, %v2873_v60, 0 }
 0xd9d   : > { %4520 = vrcp.f32 %v2763_v50  ;;  %v2772_v54 = vpack.c.bf16 %v2768_v41, %v2768_v41 }
 0xd9e   : > { %v2773_v45 = vpack.c.bf16 %v2769_v55, %v2769_v55 }
 0xd9f   : > { %4184 = vmatmul.mubr.msk.bf16.vlgmr.msra.gmra.mrb[56].mxu1 %vm1209_vm3, %v2772_v54  ;;  %v2921_v37 = vpop.permute.xlu1 %2920 }
 0xda0   : > { %v2825_v20 = vpop.permute.xlu0 %2824  ;;  %4194 = vmatpush3.bf16.msra.mxu1 %v2878_v19  ;;  %4195 = vmatprep.mubr.msk.bf16.mxu1 %vm5135_vm2, %v5134_v4  ;;  %v2926_v31 = vsel %vm1456_vm4, %v2921_v37, 0 }
 0xda1   : > { %v2830_v23 = vsel %vm1456_vm4, %v2825_v20, 0  ;;  %4205 = vmatprep.subr.bf16.mxu1 %v4450_v2 }
 0xda2   : > { %4188 = vmatpush3.bf16.msra.mxu0 %v2830_v23  ;;  %v4519_v43 = vpop.eup %4518 }
 0xda3   : > { %4199 = vmatprep.subr.bf16.mxu0 %v5134_v4  ;;  %v2770_v61 = vmul.f32 %v4519_v43, %v4511_v24  ;;  %v4425_v35 = vpop.permute.xlu1 %4424  ;;  %v4546_v43 = vld [vmem:[#allocation2 + $0x10] sm:$0xff] }
 0xda4   : > { %v4420_v57 = vpop.permute.xlu0 %4419  ;;  %v4427_v11 = vunpack.i.h.bf16 %v4425_v35  ;;  %v4426_v16 = vunpack.i.l.bf16 %v4425_v35 }
 0xda5   : > { %4190 = vmatmul.mubr.msk.bf16.vlgmr.msra.gmra.mrb[60].mxu0 %vm1209_vm3, %v2773_v45  ;;  %v2774_v33 = vpack.c.bf16 %v2770_v61, %v2770_v61  ;;  %v4422_v38 = vunpack.i.h.bf16 %v4420_v57  ;;  %v4421_v39 = vunpack.i.l.bf16 %v4420_v57 }
 0xda6   : > { %4200 = vmatpush3.bf16.msra.mxu0 %v2926_v31  ;;  %4201 = vmatprep.mubr.msk.bf16.mxu0 %vm5135_vm2, %v5134_v4  ;;  %v3019_v17 = vsel %vm1209_vm3, %v5936_v34, %v4427_v11  ;;  %v3018_v40 = vsel %vm1209_vm3, %v5934_v32, %v4426_v16  ;;  %v3888_v34 = vld [vmem:[%s812_s21] ss:$0 sm:$0xff] }
 0xda7   : > { %v4521_v62 = vpop.eup %4520  ;;  %4196 = vmatmul.mubr.msk.bf16.vlgmr.msra.gmra.mrb[60].mxu1 %vm1209_vm3, %v2774_v33  ;;  %v3017_v47 = vsel %vm1209_vm3, %v5932_v26, %v4422_v38  ;;  %v3016_v48 = vsel %vm1209_vm3, %v5930_v21, %v4421_v39  ;;  %v4435_v24 = vpop.permute.xlu1 %4434  ;;  %v4547_v32 = vld [vmem:[#allocation2] sm:$0xff] }
 0xda8   : > { %v2771_v63 = vmul.f32 %v4521_v62, %v4513_v58  ;;  %4206 = vmatpush3.bf16.msra.mxu1 %v4450_v2  ;;  %v4430_v1 = vpop.permute.xlu0 %4429  ;;  %v4437_v36 = vunpack.i.h.bf16 %v4435_v24  ;;  %v4436_v26 = vunpack.i.l.bf16 %v4435_v24  ;;  %v4548_v62 = vld [vmem:[#allocation2 + $0x8] sm:$0xff]  ;;  %v4549_v2 = vld [vmem:[#allocation2 + $0x18] sm:$0xff] }
 0xda9   : > { %4207 = vmatprep.subr.bf16.mxu1 %v4451_v8  ;;  %v4432_v42 = vunpack.i.h.bf16 %v4430_v1  ;;  %v4431_v14 = vunpack.i.l.bf16 %v4430_v1 }
 0xdaa   : > { %v2775_v0 = vpack.c.bf16 %v2771_v63, %v2771_v63  ;;  %v3023_v50 = vsel %vm3020_vm5, %v3018_v40, %v4436_v26  ;;  %v3024_v54 = vsel %vm3020_vm5, %v3019_v17, %v4437_v36  ;;  %v3889_v40 = vld [vmem:[%s820_s18] ss:$0 sm:$0xff] }
 0xdab   : > { %v3021_v53 = vsel %vm3020_vm5, %v3016_v48, %v4431_v14  ;;  %v3022_v56 = vsel %vm3020_vm5, %v3017_v47, %v4432_v42  ;;  %v4452_v48 = vld [vmem:[%s837_s30] sm:$0xff]  }
 0xdac   : > { %4208 = vmatpush3.bf16.msra.mxu1 %v4451_v8  ;;  %4213 = vmatprep.subr.bf16.mxu0 %v4452_v48 }
 0xdad   : > { %4202 = vmatmul.mubr.msk.bf16.vlgmr.msra.gmra.mrb[64].mxu0 %vm1209_vm3, %v2775_v0 }
 0xdae   : > { %4214 = vmatpush3.bf16.msra.mxu0 %v4452_v48 }
 0xe72   : > { %v2818_v3 = vpop.f32.mrb[56].mxu1 }
 0xe73   : > { %v4185_v5 = vpop.f32.mrb[57].mxu1 }
 0xe74   : > { %v2821_v6 = vpop.f32.mrb[58].mxu1 }
 0xe75   : > { %v4186_v7 = vpop.f32.mrb[59].mxu1 }
 0xe78   : > { %v2866_v49 = vpop.f32.mrb[60].mxu0 }
 0xe79   : > { %v4438_v9 = vpack.i.bf16 %v2866_v49, %v2818_v3  ;;  %v4191_v4 = vpop.f32.mrb[61].mxu0 }
 0xe7a   : > { %v2869_v10 = vpop.f32.mrb[62].mxu0  ;;  %v2914_v13 = vpop.f32.mrb[60].mxu1 }
 0xe7b   : > { %v4192_v12 = vpop.f32.mrb[63].mxu0  ;;  %4439 = vrot.lane.b32.xlu0 %v4438_v9, %s5150_s3  ;;  %v4197_v15 = vpop.f32.mrb[61].mxu1 }
 0xe7c   : > { %v2917_v18 = vpop.f32.mrb[62].mxu1 }
 0xe7d   : > { %v4198_v44 = vpop.f32.mrb[63].mxu1 }
 0xe80   : > { %v2962_v22 = vpop.f32.mrb[64].mxu0 }
 0xe81   : > { %v4443_v25 = vpack.i.bf16 %v2962_v22, %v2914_v13  ;;  %v4203_v27 = vpop.f32.mrb[65].mxu0 }
 0xe82   : > { %v2965_v28 = vpop.f32.mrb[66].mxu0 }
 0xe83   : > { %v4204_v30 = vpop.f32.mrb[67].mxu0  ;;  %4444 = vrot.lane.b32.xlu1 %v4443_v25, %s5150_s3 }
 0xeed   : > { %v4440_v46 = vpop.permute.xlu0 %4439 }
 0xeee   : > { %v4442_v51 = vunpack.i.h.bf16 %v4440_v46  ;;  %v4441_v52 = vunpack.i.l.bf16 %v4440_v46 }
 0xef0   : > { %v3027_v29 = vsel %vm3025_vm6, %v3022_v56, %v4442_v51  ;;  %v3026_v58 = vsel %vm3025_vm6, %v3021_v53, %v4441_v52  ;;  %v4453_v51 = vld [vmem:[%s837_s30 + $0x8] sm:$0xff]  }
 0xef1   : > { %v3030_v59 = vpack.c.bf16 %v3027_v29, %v3026_v58  ;;  %4215 = vmatprep.subr.bf16.mxu0 %v4453_v51 }
 0xef2   : > { %4216 = vmatpush3.bf16.msra.mxu0 %v4453_v51 }
 0xef3   : > { %4209 = vmatprep.mubr.msk.bf16.mxu1 %vm1092_vm1, %v3030_v59 }
 0xef5   : > { %v4445_v21 = vpop.permute.xlu1 %4444 }
 0xef6   : > { %v4447_v41 = vunpack.i.h.bf16 %v4445_v21  ;;  %v4446_v60 = vunpack.i.l.bf16 %v4445_v21 }
 0xef8   : > { %v3029_v55 = vsel %vm3025_vm6, %v3024_v54, %v4447_v41  ;;  %v3028_v19 = vsel %vm3025_vm6, %v3023_v50, %v4446_v60 }
 0xef9   : > { %v3031_v20 = vpack.c.bf16 %v3029_v55, %v3028_v19  ;;  %v3890_v19 = vld [vmem:[%s828_s19] ss:$0 sm:$0xff] }
 0xefb   : > { %4210 = vmatmul.mubr.msk.bf16.vlgmr.msra.gmra.mrb[64].mxu1 %vm1092_vm1, %v3031_v20 }
 0xfce   : > { %v4211_v23 = vpop.f32.mrb[64].mxu1 }
 0xfcf   : > { %v3088_v37 = vpop.f32.mrb[65].mxu1  ;;  %v3105_v45 = vadd.f32 %v4546_v43, %v4211_v23 }
 0xfd0   : > { %v3103_v61 = vadd.f32 %v4547_v32, %v3088_v37  ;;  %v4212_v31 = vpop.f32.mrb[66].mxu1 }
 0xfd1   : > { %v3091_v33 = vpop.f32.mrb[67].mxu1  ;;  %v3106_v3 = vadd.f32 %v4549_v2, %v4212_v31  ;;  %v3116_v7 = vadd.f32 %v3888_v34, %v3105_v45  ;;  %v4455_v2 = vld [vmem:[%s5782_s0 + $0x8] sm:$0xff]  }
 0xfd2   : > { %v3104_v63 = vadd.f32 %v4548_v62, %v3091_v33  ;;  %v3114_v0 = vadd.f32 %v3888_v34, %v3103_v61 }
 0xfd3   : > { %v3126_v49 = vsel %vm1092_vm1, %v3116_v7, 0.0  ;;  %v3117_v9 = vadd.f32 %v3888_v34, %v3106_v3  ;;  %v4456_v3 = vld [vmem:[%s5782_s0 + $0x10] sm:$0xff]  }
 0xfd4   : > { %v3120_v5 = vsel %vm1092_vm1, %v3114_v0, 0.0  ;;  %v3115_v6 = vadd.f32 %v3888_v34, %v3104_v63 }
 0xfd5   : > { %3121 = vadd.xlane.f32.xlu0 %v3120_v5  ;;  %v3129_v4 = vsel %vm1092_vm1, %v3117_v9, 0.0  ;;  %v4457_v5 = vld [vmem:[%s5782_s0 + $0x18] sm:$0xff]  }
 0xfd6   : > { %v3123_v8 = vsel %vm1092_vm1, %v3115_v6, 0.0 }
 0xfd7   : > { %3124 = vadd.xlane.f32.xlu1 %v3123_v8 }
 0xfd9   : > { %3127 = vadd.xlane.f32.xlu0 %v3126_v49 }
 0xfdd   : > { %3130 = vadd.xlane.f32.xlu0 %v3129_v4 }
0x1062   : > { %v3122_v10 = vpop.xlane.xlu0 %3121 }
0x1063   : > { %v3133_v12 = vmul.f32 0.03125, %v3122_v10 }
0x1064   : > { %v3125_v13 = vpop.xlane.xlu1 %3124 }
0x1065   : > { %v3137_v15 = vsub.f32 %v3114_v0, %v3133_v12  ;;  %v3134_v18 = vmul.f32 0.03125, %v3125_v13  ;;  %v4454_v0 = vld [vmem:[%s5782_s0] sm:$0xff]  }
0x1066   : > { %v3128_v44 = vpop.xlane.xlu0 %3127  ;;  %4221 = vmatprep.subr.bf16.mxu1 %v4454_v0 }
0x1067   : > { %v3138_v22 = vsub.f32 %v3115_v6, %v3134_v18  ;;  %v3135_v25 = vmul.f32 0.03125, %v3128_v44  ;;  %v3141_v27 = vmul.f32 %v3137_v15, %v3137_v15  ;;  %4222 = vmatpush3.bf16.msra.mxu1 %v4454_v0  ;;  %v3892_v6 = vld [vmem:[%s845_s24] ss:$0 sm:$0xff] }
0x1068   : > { %4223 = vmatprep.subr.bf16.mxu1 %v4455_v2 }
0x1069   : > { %v3139_v28 = vsub.f32 %v3116_v7, %v3135_v25  ;;  %v3145_v30 = vsel %vm1092_vm1, %v3141_v27, 0.0  ;;  %v3142_v57 = vmul.f32 %v3138_v22, %v3138_v22 }
0x106a   : > { %v3131_v1 = vpop.xlane.xlu0 %3130  ;;  %3146 = vadd.xlane.f32.xlu1 %v3145_v30 }
0x106b   : > { %v3136_v35 = vmul.f32 0.03125, %v3131_v1  ;;  %v3148_v38 = vsel %vm1092_vm1, %v3142_v57, 0.0  ;;  %v3143_v39 = vmul.f32 %v3139_v28, %v3139_v28  ;;  %4224 = vmatpush3.bf16.msra.mxu1 %v4455_v2 }
0x106c   : > { %3149 = vadd.xlane.f32.xlu0 %v3148_v38  ;;  %4225 = vmatprep.subr.bf16.mxu1 %v4456_v3 }
0x106d   : > { %v3140_v42 = vsub.f32 %v3117_v9, %v3136_v35  ;;  %v3151_v14 = vsel %vm1092_vm1, %v3143_v39, 0.0 }
0x106e   : > { %3152 = vadd.xlane.f32.xlu1 %v3151_v14 }
0x106f   : > { %v3144_v46 = vmul.f32 %v3140_v42, %v3140_v42  ;;  %4226 = vmatpush3.bf16.msra.mxu1 %v4456_v3 }
0x1070   : > { %4227 = vmatprep.subr.bf16.mxu1 %v4457_v5 }
0x1071   : > { %v3154_v47 = vsel %vm1092_vm1, %v3144_v46, 0.0 }
0x1072   : > { %3155 = vadd.xlane.f32.xlu0 %v3154_v47 }
0x1073   : > { %4228 = vmatpush3.bf16.msra.mxu1 %v4457_v5 }
0x10f7   : > { %v3147_v52 = vpop.xlane.xlu1 %3146 }
0x10f8   : > { %v3157_v53 = vmul.f32 0.03125, %v3147_v52 }
0x10f9   : > { %v3150_v56 = vpop.xlane.xlu0 %3149 }
0x10fa   : > { %v3161_v24 = vadd.f32 1e-12, %v3157_v53  ;;  %v3158_v29 = vmul.f32 0.03125, %v3150_v56 }
0x10fb   : > { %v3153_v58 = vpop.xlane.xlu1 %3152 }
0x10fc   : > { %4522 = vrsqrt.f32 %v3161_v24  ;;  %v3162_v59 = vadd.f32 1e-12, %v3158_v29  ;;  %v3159_v11 = vmul.f32 0.03125, %v3153_v58 }
0x10fe   : > { %4524 = vrsqrt.f32 %v3162_v59  ;;  %v3163_v16 = vadd.f32 1e-12, %v3159_v11 }
0x10ff   : > { %v3156_v36 = vpop.xlane.xlu0 %3155 }
0x1100   : > { %4526 = vrsqrt.f32 %v3163_v16  ;;  %v3160_v26 = vmul.f32 0.03125, %v3156_v36 }
0x1102   : > { %v3164_v21 = vadd.f32 1e-12, %v3160_v26 }
0x1104   : > { %4528 = vrsqrt.f32 %v3164_v21 }
0x1106   : > { %v4523_v17 = vpop.eup %4522 }
0x1107   : > { %v3169_v41 = vmul.f32 %v4523_v17, %v3137_v15 }
0x1108   : > { %v4525_v60 = vpop.eup %4524 }
0x1109   : > { %v3170_v50 = vmul.f32 %v4525_v60, %v3138_v22  ;;  %v3179_v54 = vmul.f32 %v3889_v40, %v3169_v41 }
0x110a   : > { %v4527_v55 = vpop.eup %4526 }
0x110b   : > { %v3171_v20 = vmul.f32 %v4527_v55, %v3139_v28  ;;  %v3180_v23 = vmul.f32 %v3889_v40, %v3170_v50  ;;  %v6176_v37 = vadd.f32 %v3890_v19, %v3179_v54 }
0x110d   : > { %v6178_v34 = vadd.f32 %v3890_v19, %v3180_v23  ;;  %v3181_v45 = vmul.f32 %v3889_v40, %v3171_v20 }
0x110e   : > { %v4529_v43 = vpop.eup %4528 }
0x110f   : > { %v3172_v32 = vmul.f32 %v4529_v43, %v3140_v42  ;;  %v3193_v61 = vpack.c.bf16 %v6178_v34, %v6176_v37  ;;  %v6183_v33 = vadd.f32 %v3890_v19, %v3181_v45 }
0x1111   : > { %v3182_v31 = vmul.f32 %v3889_v40, %v3172_v32  ;;  %4217 = vmatprep.mubr.msk.bf16.mxu0 %vm1092_vm1, %v3193_v61 }
0x1113   : > { %v6185_v62 = vadd.f32 %v3890_v19, %v3182_v31  ;;  %v3891_v19 = vld [vmem:[%s862_s17] ss:$0 sm:$0xff] }
0x1114   : > { %v3204_v20 = vadd.f32 %v3891_v19, %v6183_v33  ;;  %v3202_v43 = vadd.f32 %v3891_v19, %v6176_v37  ;;  %v3203_v0 = vadd.f32 %v3891_v19, %v6178_v34 }
0x1115   : > { %v3194_v63 = vpack.c.bf16 %v6185_v62, %v6183_v33  ;;  %v3205_v61 = vadd.f32 %v3891_v19, %v6185_v62 }
0x1117   : > { %4218 = vmatmul.mubr.msk.bf16.vlgmr.msra.gmra.mrb[68].mxu0 %vm1092_vm1, %v3194_v63 }
0x11ea   : > { %v4219_v7 = vpop.f32.mrb[68].mxu0 }
0x11eb   : > { %v3278_v8 = vadd.f32 %v4219_v7, %v3892_v6  ;;  %v3269_v49 = vpop.f32.mrb[69].mxu0 }
0x11ec   : > { %v3270_v9 = vadd.f32 %v3892_v6, %v3269_v49  ;;  %v4220_v4 = vpop.f32.mrb[70].mxu0 }
0x11ed   : > { %v3290_v10 = vmul.f32 0.044715, %v3278_v8  ;;  %v3281_v12 = vadd.f32 %v4220_v4, %v3892_v6  ;;  %v3272_v13 = vpop.f32.mrb[71].mxu0  ;;  %v3286_v11 = vmul.f32 0.5, %v3278_v8 }
0x11ee   : > { %v3288_v15 = vmul.f32 0.044715, %v3270_v9  ;;  %v3273_v18 = vadd.f32 %v3892_v6, %v3272_v13  ;;  %v3284_v26 = vmul.f32 0.5, %v3270_v9 }
0x11ef   : > { %v3294_v44 = vmul.f32 %v3290_v10, %v3278_v8  ;;  %v3291_v22 = vmul.f32 0.044715, %v3281_v12  ;;  %v3287_v16 = vmul.f32 0.5, %v3281_v12 }
0x11f0   : > { %v3292_v25 = vmul.f32 %v3288_v15, %v3270_v9  ;;  %v3289_v27 = vmul.f32 0.044715, %v3273_v18  ;;  %v3285_v21 = vmul.f32 0.5, %v3273_v18 }
0x11f1   : > { %v3298_v28 = vmul.f32 %v3294_v44, %v3278_v8  ;;  %v3295_v30 = vmul.f32 %v3291_v22, %v3281_v12 }
0x11f2   : > { %v3296_v57 = vmul.f32 %v3292_v25, %v3270_v9  ;;  %v3293_v1 = vmul.f32 %v3289_v27, %v3273_v18 }
0x11f3   : > { %v3302_v35 = vadd.f32 %v3298_v28, %v3278_v8  ;;  %v3299_v38 = vmul.f32 %v3295_v30, %v3281_v12 }
0x11f4   : > { %v3300_v39 = vadd.f32 %v3296_v57, %v3270_v9  ;;  %v3297_v42 = vmul.f32 %v3293_v1, %v3273_v18 }
0x11f5   : > { %v3306_v14 = vmul.f32 0.7978846, %v3302_v35  ;;  %v3303_v46 = vadd.f32 %v3299_v38, %v3281_v12 }
0x11f6   : > { %v3304_v47 = vmul.f32 0.7978846, %v3300_v39  ;;  %v3301_v48 = vadd.f32 %v3297_v42, %v3273_v18 }
0x11f7   : > { %4530 = vtanh.f32 %v3306_v14  ;;  %v3307_v51 = vmul.f32 0.7978846, %v3303_v46 }
0x11f8   : > { %4532 = vtanh.f32 %v3304_v47  ;;  %v3305_v52 = vmul.f32 0.7978846, %v3301_v48 }
0x11f9   : > { %4534 = vtanh.f32 %v3307_v51 }
0x11fa   : > { %4536 = vtanh.f32 %v3305_v52 }
0x1201   : > { %v4531_v53 = vpop.eup %4530 }
0x1202   : > { %v4533_v56 = vpop.eup %4532  ;;  %v3314_v24 = vadd.f32 1.0, %v4531_v53 }
0x1203   : > { %v4535_v29 = vpop.eup %4534  ;;  %v3312_v58 = vadd.f32 1.0, %v4533_v56 }
0x1204   : > { %v4537_v59 = vpop.eup %4536  ;;  %v3315_v36 = vadd.f32 1.0, %v4535_v29  ;;  %v3318_v40 = vmul.f32 %v3314_v24, %v3286_v11 }
0x1205   : > { %v3313_v17 = vadd.f32 1.0, %v4537_v59  ;;  %v3316_v60 = vmul.f32 %v3312_v58, %v3284_v26  ;;  %v3903_v58 = vld [vmem:[%s870_s2] ss:$0 sm:$0xff] }
0x1206   : > { %v3319_v41 = vmul.f32 %v3315_v36, %v3287_v16  ;;  %v3904_v16 = vld [vmem:[%s878_s20] ss:$0 sm:$0xff] }
0x1207   : > { %v3317_v50 = vmul.f32 %v3313_v17, %v3285_v21 }
0x1208   : > { %v3321_v54 = vpack.c.bf16 %v3319_v41, %v3318_v40 }
0x1209   : > { %v3320_v55 = vpack.c.bf16 %v3317_v50, %v3316_v60 }
0x120b   : > { %4229 = vmatprep.mubr.msk.bf16.mxu1 %vm3354_vm7, %v3320_v55 }
0x120c   : > { %4230 = vmatmul.mubr.msk.bf16.vlgmr.msra.gmra.mrb[68].mxu1 %vm3354_vm7, %v3321_v54 }
0x12df   : > { %v4231_v23 = vpop.f32.mrb[68].mxu1 }
0x12e0   : > { %v3412_v45 = vadd.f32 %v4231_v23, %v3204_v20  ;;  %v3395_v32 = vpop.f32.mrb[69].mxu1 }
0x12e1   : > { %v3410_v31 = vadd.f32 %v3395_v32, %v3202_v43  ;;  %v4232_v63 = vpop.f32.mrb[70].mxu1 }
0x12e2   : > { %v3413_v2 = vadd.f32 %v4232_v63, %v3205_v61  ;;  %v3398_v3 = vpop.f32.mrb[71].mxu1  ;;  %v3422_v33 = vsel %vm1092_vm1, %v3412_v45, 0.0 }
0x12e3   : > { %v3411_v5 = vadd.f32 %v3398_v3, %v3203_v0  ;;  %v3416_v6 = vsel %vm1092_vm1, %v3410_v31, 0.0 }
0x12e4   : > { %3417 = vadd.xlane.f32.xlu1 %v3416_v6  ;;  %v3425_v37 = vsel %vm1092_vm1, %v3413_v2, 0.0 }
0x12e5   : > { %v3419_v7 = vsel %vm1092_vm1, %v3411_v5, 0.0 }
0x12e6   : > { %3420 = vadd.xlane.f32.xlu0 %v3419_v7 }
0x12e8   : > { %3423 = vadd.xlane.f32.xlu1 %v3422_v33 }
0x12ea   : > { %3426 = vadd.xlane.f32.xlu0 %v3425_v37 }
0x1371   : > { %v3418_v62 = vpop.xlane.xlu1 %3417 }
0x1372   : > { %v3428_v8 = vmul.f32 0.03125, %v3418_v62 }
0x1373   : > { %v3421_v49 = vpop.xlane.xlu0 %3420 }
0x1374   : > { %v3432_v9 = vsub.f32 %v3410_v31, %v3428_v8  ;;  %v3429_v34 = vmul.f32 0.03125, %v3421_v49 }
0x1375   : > { %v3424_v4 = vpop.xlane.xlu1 %3423 }
0x1376   : > { %v3433_v10 = vsub.f32 %v3411_v5, %v3429_v34  ;;  %v3430_v12 = vmul.f32 0.03125, %v3424_v4  ;;  %v3436_v13 = vmul.f32 %v3432_v9, %v3432_v9 }
0x1377   : > { %v3427_v15 = vpop.xlane.xlu0 %3426 }
0x1378   : > { %v3434_v18 = vsub.f32 %v3412_v45, %v3430_v12  ;;  %v3431_v44 = vmul.f32 0.03125, %v3427_v15  ;;  %v3440_v22 = vsel %vm1092_vm1, %v3436_v13, 0.0  ;;  %v3437_v25 = vmul.f32 %v3433_v10, %v3433_v10 }
0x1379   : > { %3441 = vadd.xlane.f32.xlu1 %v3440_v22 }
0x137a   : > { %v3435_v27 = vsub.f32 %v3413_v2, %v3431_v44  ;;  %v3443_v28 = vsel %vm1092_vm1, %v3437_v25, 0.0  ;;  %v3438_v30 = vmul.f32 %v3434_v18, %v3434_v18 }
0x137b   : > { %3444 = vadd.xlane.f32.xlu0 %v3443_v28 }
0x137c   : > { %v3446_v57 = vsel %vm1092_vm1, %v3438_v30, 0.0  ;;  %v3439_v1 = vmul.f32 %v3435_v27, %v3435_v27 }
0x137d   : > { %3447 = vadd.xlane.f32.xlu1 %v3446_v57 }
0x137e   : > { %v3449_v35 = vsel %vm1092_vm1, %v3439_v1, 0.0 }
0x137f   : > { %3450 = vadd.xlane.f32.xlu0 %v3449_v35 }
0x1406   : > { %v3442_v38 = vpop.xlane.xlu1 %3441 }
0x1407   : > { %v3452_v39 = vmul.f32 0.03125, %v3442_v38 }
0x1408   : > { %v3445_v42 = vpop.xlane.xlu0 %3444 }
0x1409   : > { %v3456_v14 = vadd.f32 1e-12, %v3452_v39  ;;  %v3453_v46 = vmul.f32 0.03125, %v3445_v42 }
0x140a   : > { %v3448_v47 = vpop.xlane.xlu1 %3447 }
0x140b   : > { %4538 = vrsqrt.f32 %v3456_v14  ;;  %v3457_v48 = vadd.f32 1e-12, %v3453_v46  ;;  %v3454_v51 = vmul.f32 0.03125, %v3448_v47 }
0x140c   : > { %v3451_v52 = vpop.xlane.xlu0 %3450 }
0x140d   : > { %4540 = vrsqrt.f32 %v3457_v48  ;;  %v3458_v53 = vadd.f32 1e-12, %v3454_v51  ;;  %v3455_v56 = vmul.f32 0.03125, %v3451_v52 }
0x140f   : > { %4542 = vrsqrt.f32 %v3458_v53  ;;  %v3459_v24 = vadd.f32 1e-12, %v3455_v56 }
0x1411   : > { %4544 = vrsqrt.f32 %v3459_v24 }
0x1415   : > { %v4539_v29 = vpop.eup %4538 }
0x1416   : > { %v3464_v59 = vmul.f32 %v4539_v29, %v3432_v9 }
0x1417   : > { %v4541_v11 = vpop.eup %4540 }
0x1418   : > { %v3474_v36 = vmul.f32 %v3903_v58, %v3464_v59  ;;  %v3465_v26 = vmul.f32 %v4541_v11, %v3433_v10 }
0x1419   : > { %v4543_v21 = vpop.eup %4542 }
0x141a   : > { %v3484_v17 = vadd.f32 %v3904_v16, %v3474_v36  ;;  %v3475_v40 = vmul.f32 %v3903_v58, %v3465_v26  ;;  %v3466_v41 = vmul.f32 %v4543_v21, %v3434_v18 }
0x141b   : > { %v4545_v60 = vpop.eup %4544 }
0x141c   : > { %3488 = vst.msk [vmem:[#allocation2] sm:$0xff] %vm1092_vm1, %v3484_v17  ;;  %v3485_v50 = vadd.f32 %v3904_v16, %v3475_v40  ;;  %v3476_v54 = vmul.f32 %v3903_v58, %v3466_v41  ;;  %v3467_v55 = vmul.f32 %v4545_v60, %v3435_v27  ;;  %3495 = sbr.rel (%p3905_p3) target bundleno = 5163 (0x142b), region = 156 }
0x141e   : > { %3489 = vst.msk [vmem:[#allocation2 + $0x8] sm:$0xff] %vm1092_vm1, %v3485_v50  ;;  %v3486_v19 = vadd.f32 %v3904_v16, %v3476_v54  ;;  %v3477_v20 = vmul.f32 %v3903_v58, %v3467_v55 }
0x1420   : > { %3490 = vst.msk [vmem:[#allocation2 + $0x10] sm:$0xff] %vm1092_vm1, %v3486_v19  ;;  %v3487_v23 = vadd.f32 %v3904_v16, %v3477_v20 }
0x1422   : > { %3491 = vst.msk [vmem:[#allocation2 + $0x18] sm:$0xff] %vm1092_vm1, %v3487_v23 }
0x1429   : > { %v3496_v43 = vld [vmem:[#allocation2] ss:$8 sm:$0xf] }
0x142a   : > { %3498 = vst.msk [vmem:[#allocation23] sm:$0xf] %vm3497_vm8, %v3496_v43 }
0x142b PF: > { %s6387_s15 = sld [smem:[#allocation33_spill]]  ;;  %s5151_s16 = smov [#allocation23]  }
0x142c   : > { %s3508_s21 = sshll.u32 %s5151_s16, 4  ;;  %s3509_s21 = int_to_ptr.vmem [resolvable:$true] %s3508_s21 }
0x142d   : > { %s5022_s18 = scalar_lea.vmem %s3509_s21, 64  ;;  %p5029_p11 = scmp.lt.s32.totalorder %s3509_s21, %s3509_s21 }
0x142e   : > { %p5023_p0 = scmp.ne.s32.totalorder %s3509_s21, %s5022_s18  ;;  %p5030_p12 = scmp.lt.s32.totalorder %s5022_s18, %s5022_s18 }
0x1430   : > { %p5031_p9 = por %p5030_p12, %p5029_p11 }
0x1431   : > { %p4336_p13 = scmp.eq.s32.totalorder %s6387_s15, 1 }
0x1433   : > { %p5024_p2 = pnand %p5023_p0, %p4336_p13 }
0x1435   : > { %p5025_p6 = pneg %p5024_p2 }
0x1437   : > { %p5032_p5 = pnand %p5031_p9, %p5025_p6 }
0x1439   : > { %5035 = shalt.err (!%p5032_p5)
}
0x143a   : > { %s6388_s24 = sld [smem:[#allocation49_spill]] }
0x1440   : > { %s6389_s0 = smov %s6388_s24  ;;  %s5036_s17 = scalar_lea.hbm %s6388_s24, 64 }
0x1441   : > { %p5037_p7 = scmp.ne.s32.totalorder %s6389_s0, %s5036_s17  ;;  %p5042_p1 = scmp.lt.u32.totalorder %s5036_s17, %s6389_s0 }
0x1443   : > { %p5038_p10 = pnand %p5037_p7, %p4336_p13 }
0x1445   : > { %p5039_p8 = pneg %p5038_p10 }
0x1447   : > { %p5044_p4 = pnand %p5042_p1, %p5039_p8 }
0x1449   : > { %5047 = shalt.err (!%p5044_p4)
}
0x144a   : > { %4274 = dma.vmem_to_hbm [thread:$0]  (%p4336_p13), %s3509_s21, 64, %s6389_s0, [#allocation5]  }
0x144b   : > { %5089 = dma.done.wait (%p4336_p13), [#allocation5], 64  }
0x144c   : > { %5091 = vsyncadd (%p4336_p13), [#allocation5], 4294967232 }
0x144d PF: > { %s6390_s23 = sld [smem:[#allocation32_spill]]  ;;  %s6391_s21 = sld [smem:[#allocation29_spill]] }
0x144e   : > { %s6392_s22 = sld [smem:[#allocation30_spill]]  ;;  %s6394_s3 = sld [smem:[#allocation38_spill]] }
0x144f   : > { %s6395_s24 = smov %s5110_s25 }
0x1453   : > { %s30_s26 = sadd.s32 1, %s6390_s23   ;;  %s6393_s23 = sld [smem:[#allocation39_spill]] }
0x1454   : > { %p27_p3 = scmp.ge.s32.totalorder %s30_s26, 4   ;;  %s6396_s25 = smov %s6394_s3 }
0x1456   :  { %29 = sbr.rel (!%p27_p3) target bundleno = 17 (0x11), region = 268 }
0x145d   :  { %3521 = vsyncpa [#allocation4], 1 }
0x145e   :  { %3523 = vsyncpa [#allocation4 + $0x1], 1 }
0x145f   :  { %3524 = vsyncpa [#allocation7], 1 }
0x1460   :  { %3525 = vsyncpa [#allocation10], 1 }
0x1461   :  { %3526 = vsyncpa [#allocation5], 1 }
0x1462   :  { %3528 = vsyncpa [#allocation5 + $0x1], 1 }

</bundles_post_ra>
